<compile_context>
chip_gen: v6e
topology: v6e:2x2x1
jax: 0.10.0
libtpu: 0.0.40
codegen_flags: <defaults>
</compile_context>

<pallas_src>
import jax
import jax.numpy as jnp
from jax.experimental import pallas as pl
from jax.experimental.pallas import tpu as pltpu

H_OUT, W_OUT = 1088, 1456  # torch.Size([1088, 1456]) from the module
H_TILE = 272               # 1088 = 4 * 272; 272 % 16 == 0 (sublane-friendly)


def _interp_matrix(out_size: int, in_size: int) -> jnp.ndarray:
    """Row-interpolation matrix W (out_size, in_size) for bilinear,
    align_corners=True: (W @ v)[i] == bilinear sample of v at position i."""
    if out_size == 1 or in_size == 1:
        src = jnp.zeros((out_size,), jnp.float32)
    else:
        scale = (in_size - 1) / (out_size - 1)
        src = jnp.arange(out_size, dtype=jnp.float32) * scale
    i0 = jnp.clip(jnp.floor(src).astype(jnp.int32), 0, in_size - 1)
    i1 = jnp.clip(i0 + 1, 0, in_size - 1)
    frac = src - i0.astype(jnp.float32)
    oh0 = jax.nn.one_hot(i0, in_size, dtype=jnp.float32)
    oh1 = jax.nn.one_hot(i1, in_size, dtype=jnp.float32)
    return (1.0 - frac)[:, None] * oh0 + frac[:, None] * oh1


def _cgnet_end_kernel(tmp_ref, wh_ref, o_ref):
    # tmp_ref: (1, H_in, W_OUT)   precomputed x[b,c] @ Ww^T for one (b,c) slice
    # wh_ref:  (H_TILE, H_in)     one row-tile of the H interpolation matrix
    # o_ref:   (1, H_TILE, W_OUT) one output row-tile
    out = jnp.dot(wh_ref[...], tmp_ref[0],
                  preferred_element_type=jnp.float32)       # (H_TILE, W_OUT)
    o_ref[0] = jax.nn.sigmoid(out).astype(o_ref.dtype)


def cgnet_end(x: jnp.ndarray, out_dtype=jnp.float32) -> jnp.ndarray:
    """x: (B, C, H_in, W_in) float32 -> (B, C, 1088, 1456) in out_dtype.

    out_dtype=jnp.bfloat16 halves the (dominant) HBM writeback traffic if the
    downstream consumer tolerates bf16; default float32 matches PyTorch.
    """
    B, C, H_in, W_in = x.shape
    BC = B * C
    assert H_OUT % H_TILE == 0
    n_h = H_OUT // H_TILE

    wh = _interp_matrix(H_OUT, H_in)        # (H_out, H_in)
    wwt = _interp_matrix(W_OUT, W_in).T     # (W_in, W_out)

    # Width interpolation, batched over all B*C*H_in rows in one matmul
    # (hoisted out of the kernel: per-slice M=H_in=16 wastes the MXU tile).
    tmp = jnp.dot(x.reshape(BC * H_in, W_in).astype(jnp.float32), wwt,
                  preferred_element_type=jnp.float32)
    tmp = tmp.reshape(BC, H_in, W_OUT)      # (BC, H_in, W_out) ~93 KB per slice

    out_flat = pl.pallas_call(
        _cgnet_end_kernel,
        out_shape=jax.ShapeDtypeStruct((BC, H_OUT, W_OUT), out_dtype),
        grid_spec=pltpu.PrefetchScalarGridSpec(
            num_scalar_prefetch=0,
            grid=(BC, n_h),
            in_specs=[
                pl.BlockSpec((1, H_in, W_OUT), lambda i, h: (i, 0, 0)),
                pl.BlockSpec((H_TILE, H_in), lambda i, h: (h, 0)),
            ],
            out_specs=pl.BlockSpec((1, H_TILE, W_OUT), lambda i, h: (i, h, 0)),
        ),
        # ~5 MB live VMEM per step fits every generation's scoped default, so
        # no explicit vmem_limit_bytes (the old 96 MiB was invalid on v7x).
        compiler_params=pltpu.CompilerParams(
            dimension_semantics=("parallel", "parallel"),
        ),
    )(tmp, wh)

    return out_flat.reshape(B, C, H_OUT, W_OUT)


if __name__ == "__main__":
    key = jax.random.PRNGKey(0)
    B, C, H_in, W_in = 2, 4, 16, 16
    x = jax.random.normal(key, (B, C, H_in, W_in), dtype=jnp.float32)

    out = cgnet_end(x)
    out = jax.block_until_ready(out)

    # Reference (same separable formulation, plain JAX).
    wh = _interp_matrix(H_OUT, H_in)
    wwt = _interp_matrix(W_OUT, W_in).T
    ref = jax.nn.sigmoid(
        jnp.einsum("oh,bchw,wn->bcon", wh, x, wwt, precision="highest"))
    ref = jax.block_until_ready(ref)

    assert out.shape == (B, C, H_OUT, W_OUT), out.shape
    assert out.dtype == jnp.float32, out.dtype
    assert jnp.max(jnp.abs(out - ref)) < 1e-4, float(jnp.max(jnp.abs(out - ref)))

    # Optional bf16-output path (half the HBM writeback on v5e/v6e).
    out_bf16 = jax.block_until_ready(cgnet_end(x, out_dtype=jnp.bfloat16))
    assert out_bf16.dtype == jnp.bfloat16
    assert jnp.max(jnp.abs(out_bf16.astype(jnp.float32) - ref)) < 1e-2

    print("KERNEL_OK")
</pallas_src>

<mosaic_0001>
module attributes {stable_mosaic.version = 11 : i64} {
  func.func @_cgnet_end_kernel(%arg0: i32, %arg1: i32, %arg2: memref<1x16x1456xf32, #tpu.memory_space<vmem>>, %arg3: memref<272x16xf32, #tpu.memory_space<vmem>>, %arg4: memref<1x272x1456xf32, #tpu.memory_space<vmem>>) attributes {dimension_semantics = [#tpu.dimension_semantics<parallel>, #tpu.dimension_semantics<parallel>], iteration_bounds = array<i64: 8, 4>, scalar_prefetch = 0 : i64, scratch_operands = 0 : i64, tpu.core_type = #tpu.core_type<tc>, window_params = [{transform_indices = @transform_0, window_bounds = array<i64: 1, 16, 1456>}, {transform_indices = @transform_1, window_bounds = array<i64: 272, 16>}, {transform_indices = @transform_2, window_bounds = array<i64: 1, 272, 1456>}]} {
    %c0 = arith.constant 0 : index
    %c0_0 = arith.constant 0 : index
    %0 = vector.load %arg3[%c0, %c0_0] : memref<272x16xf32, #tpu.memory_space<vmem>>, vector<272x16xf32>
    %c0_1 = arith.constant 0 : index
    %c0_2 = arith.constant 0 : index
    %c0_3 = arith.constant 0 : index
    %1 = vector.load %arg2[%c0_1, %c0_2, %c0_3] : memref<1x16x1456xf32, #tpu.memory_space<vmem>>, vector<1x16x1456xf32>
    %2 = vector.shape_cast %1 : vector<1x16x1456xf32> to vector<16x1456xf32>
    %cst = arith.constant dense<0.000000e+00> : vector<272x1456xf32>
    %3 = tpu.matmul %0, %2, %cst {dimension_numbers = #tpu.dot_dimension_numbers<[1], [0], [0], [1], [0, 0, 1, 1], [], []>} : vector<272x16xf32>, vector<16x1456xf32>, vector<272x1456xf32> -> vector<272x1456xf32>
    %4 = arith.negf %3 : vector<272x1456xf32>
    %5 = math.exp %4 : vector<272x1456xf32>
    %cst_4 = arith.constant 1.000000e+00 : f32
    %6 = vector.broadcast %cst_4 : f32 to vector<272x1456xf32>
    %7 = arith.addf %6, %5 : vector<272x1456xf32>
    %8 = arith.divf %6, %7 : vector<272x1456xf32>
    %c0_5 = arith.constant 0 : index
    %c0_6 = arith.constant 0 : index
    %c0_7 = arith.constant 0 : index
    %9 = vector.load %arg4[%c0_5, %c0_6, %c0_7] : memref<1x272x1456xf32, #tpu.memory_space<vmem>>, vector<1x272x1456xf32>
    %10 = vector.shape_cast %9 : vector<1x272x1456xf32> to vector<272x1456xf32>
    %11 = vector.shape_cast %8 : vector<272x1456xf32> to vector<1x272x1456xf32>
    tpu.vector_store %arg4[%c0_5, %c0_6, %c0_7], %11 {strides = array<i32>} : memref<1x272x1456xf32, #tpu.memory_space<vmem>>, vector<1x272x1456xf32>,
    return
  }
  func.func @transform_0(%arg0: i32, %arg1: i32) -> (i32, i32, i32) {
    %c0_i32 = arith.constant 0 : i32
    %c0_i32_0 = arith.constant 0 : i32
    %c0_i32_1 = arith.constant 0 : i32
    return %arg0, %c0_i32, %c0_i32_0 : i32, i32, i32
  }
  func.func @transform_1(%arg0: i32, %arg1: i32) -> (i32, i32) {
    %c0_i32 = arith.constant 0 : i32
    %c0_i32_0 = arith.constant 0 : i32
    return %arg1, %c0_i32 : i32, i32
  }
  func.func @transform_2(%arg0: i32, %arg1: i32) -> (i32, i32, i32) {
    %c0_i32 = arith.constant 0 : i32
    %c0_i32_0 = arith.constant 0 : i32
    return %arg0, %arg1, %c0_i32 : i32, i32, i32
  }
}

</mosaic_0001>

<bundles_post_ra>
// kernel: tpu_custom_call.1
= control target key start
LH: loop header
LB: loop body
LE: loop exit
PB: predicated region body
PF: predicated region fallthrough
CT: control target
= control target key end

     0   :  { %7 = vsyncpa [#allocation3], 0  ;;  %s9382_s0 = inlined_call_operand.hbm [shape: f32[8,16,1456], index: 0, kind: input, shape index: {}]   ;;  %s9383_s1 = inlined_call_operand.vmem [shape: f32[1088,16], index: 1, kind: input, shape index: {}]   ;;  %s9384_s2 = inlined_call_operand.hbm [shape: f32[8,1088,1456], index: 2, kind: output, shape index: {}]  }
   0x1   :  { %9 = vsyncpa [#allocation3 + $0x1], 0 }
   0x2   :  { %10 = vsyncpa [#allocation4], 0 }
   0x3   :  { %12 = vsyncpa [#allocation4 + $0x1], 0  ;;  %s7521_s9 = smov 0   ;;  %s7523_s10 = smov 0  }
   0x4   :  { %s7525_s11 = smov 0   ;;  %s7527_s12 = smov 0  }
   0x5   :  { %s7529_s13 = smov 0   ;;  %s7531_s14 = smov 0  }
   0x6   :  { %s7533_s15 = smov 0   ;;  %s7535_s16 = smov 0  }
   0x7   :  { %s7537_s17 = smov 0   ;;  %s7539_s18 = smov 0  }
   0x8   :  { %s7541_s19 = smov 0  }
   0x9 LB: > { %9390 = sst [smem:[#allocation8_spill]] %s7493_s18  ;;  %s4947_s20 = sadd.s32 4294967295, %s7497_s19   ;;  %s7497_s19 = sphi %s7541_s19, %s18_s19   ;;  %s7493_s18 = sphi %s7539_s18, %s9445_s18   ;;  %s7489_s17 = sphi %s7537_s17, %s9453_s17   ;;  %s7485_s16 = sphi %s7535_s16, %s9443_s16   ;;  %s7481_s15 = sphi %s7533_s15, %s9452_s15   ;;  %s7477_s14 = sphi %s7531_s14, %s9451_s14   ;;  %s7473_s13 = sphi %s7529_s13, %s9450_s13   ;;  %s7469_s12 = sphi %s7527_s12, %s9449_s12   ;;  %s7465_s11 = sphi %s7525_s11, %s9448_s11   ;;  %s7461_s10 = sphi %s7523_s10, %s9447_s10   ;;  %s7457_s9 = sphi %s7521_s9, %s9446_s9  }
   0xa   : > { %s4948_s21 = sadd.s32 4294967294, %s7497_s19   ;;  %s27_s22 = sadd.s32 1, %s7489_s17 }
   0xb   : > { %s30_s23 = sadd.s32 1, %s7493_s18  ;;  %p28_p0 = scmp.ge.s32.totalorder %s27_s22, 4 }
   0xc   : > { %s37_s24 = sadd.s32 1, %s7477_s14  ;;  %p44_p1 = scmp.ne.s32.totalorder %s7477_s14, %s7473_s13 }
   0xd   : > { %p45_p2 = scmp.eq.s32.totalorder %s7497_s19, 0  ;;  %s9455_s22 = smov (%p28_p0, %s27_s22), 0 }
   0xe   : > { %9391 = sst [smem:[#allocation9_spill]] %s9455_s22  ;;  %s9457_s23 = smov (!%p28_p0, %s30_s23), %s7493_s18 }
   0xf   : > { %p7585_p3 = por %p45_p2, %p44_p1  ;;  %p50_p4 = scmp.ne.s32.totalorder %s7473_s13, %s7469_s12 }
  0x10   : > { %p32_p5 = scmp.ge.s32.totalorder %s9457_s23, 8  ;;  %p51_p6 = scmp.eq.s32.totalorder %s4947_s20, 0 }
  0x11   : > { %s87_s26 = ssub.s32 %s7489_s17, %s9455_s22  ;;  %s91_s27 = sadd.s32 1, %s7465_s11 }
  0x12   : > { %s9459_s23 = smov (%p32_p5, %s9457_s23), 0  ;;  %p7595_p7 = por %p51_p6, %p50_p4 }
  0x13   : > { %9393 = sst [smem:[#allocation10_spill]] %s9459_s23  ;;  %p101_p8 = scmp.ne.s32.totalorder %s7465_s11, %s7461_s10 }
  0x14   : > { %s34_s29 = ssub.s32 %s7493_s18, %s9459_s23  ;;  %p102_p9 = scmp.eq.s32.totalorder %s4947_s20, 31 }
  0x15   : > { %p35_p10 = scmp.eq.s32.totalorder %s34_s29, 0  ;;  %s88_s30 = sor.u32 %s87_s26, %s34_s29 }
  0x16   : > { %p89_p11 = scmp.eq.s32.totalorder %s88_s30, 0  ;;  %p7603_p12 = por %p102_p9, %p101_p8 }
  0x17   : > { %s7608_s4 = scalar_select %p35_p10, %s7477_s14, %s37_s24  }
  0x18   : > { %s7611_s5 = scalar_select %p89_p11, %s7465_s11, %s91_s27  }
  0x19   : > { %p107_p13 = scmp.ne.s32.totalorder %s7461_s10, %s7457_s9  ;;  %p108_p0 = scmp.eq.s32.totalorder %s4948_s21, 31 }
  0x1a   : > { %p5587_p1 = scmp.lt.s32.totalorder %s7497_s19, 32  ;;  %s128_s7 = sand.u32 1, %s7477_s14  }
  0x1b   : > { %p7616_p2 = por %p108_p0, %p107_p13  ;;  %s5569_s8 = smul.u32 192, %s128_s7 }
  0x1c   : > { %s5570_s12 = smul.u32 3072, %s7493_s18  ;;  %p7624_p4 = pnand %p5587_p1, %p7585_p3 }
  0x1d   : > { %s132_s29 = scalar_lea.vmem [#allocation2], %s5569_s8  ;;  %p4952_p5 = scmp.ge.s32.totalorder %s7497_s19, 1 }
  0x1e   : > { %s138_s27 = scalar_lea.hbm %s9382_s0, %s5570_s12  ;;  %s139_s21 = sshll.u32 %s132_s29, 4  ;;  %s140_s21 = int_to_ptr.vmem [resolvable:$true] %s139_s21 }
  0x1f   : > { %s129_s30 = scalar_lea.sflag [#allocation3], %s128_s7  ;;  %p7351_p6 = pneg %p7624_p4 }
  0x20   : > { %s7362_s23 = scalar_lea.vmem %s140_s21, 3072  ;;  %s7499_s25 = smov [#allocation2]  }
  0x21   : > { %p7363_p8 = scmp.ne.s32.totalorder %s140_s21, %s7362_s23  ;;  %s7367_s22 = sshll.u32 %s7499_s25, 4  ;;  %s7368_s22 = int_to_ptr.vmem [resolvable:$false] %s7367_s22 }
  0x22   : > { %s7369_s18 = scalar_lea.vmem %s7368_s22, 6144  ;;  %p7370_p3 = scmp.lt.s32.totalorder %s140_s21, %s7368_s22 }
  0x23   : > { %p7365_p9 = pnand %p7363_p8, %p7351_p6  ;;  %p7371_p11 = scmp.lt.s32.totalorder %s7369_s18, %s7362_s23 }
  0x25   : > { %p7366_p10 = pneg %p7365_p9  ;;  %p7372_p13 = por %p7371_p11, %p7370_p3 }
  0x27   : > { %p7373_p0 = pnand %p7372_p13, %p7366_p10 }
  0x29   : > { %7376 = shalt.err (!%p7373_p0)
}
  0x2a   : > { %s7500_s8 = smov 1536   ;;  %s7501_s7 = smov 96  }
  0x2b   : > { %5582 = dma.hbm_to_vmem [thread:$0]  (!%p7624_p4), %s138_s27, 3072, %s140_s21, %s129_s30, %s7500_s8, %s7500_s8, %s7501_s7  }
  0x2c   : > { %p156_p1 = scmp.lt.s32.totalorder %s7497_s19, 33 }
  0x2e   : > { %p157_p6 = pnand %p4952_p5, %p156_p1 }
  0x30   : > { %160 = sbr.rel (%p157_p6) target bundleno = 1112 (0x458), region = 28 }
  0x35   : > { %s162_s12 = sand.u32 1, %s7473_s13  }
  0x36   : > { %s5571_s26 = smul.u32 192, %s162_s12  ;;  %s163_s22 = scalar_lea.sflag [#allocation3], %s162_s12 }
  0x38   : > { %s7640_s18 = scalar_lea.vmem [#allocation2], %s5571_s26 }
  0x39   : > { %7448 = dma.done.wait (%p7595_p7), %s163_s22, 3072  }
  0x3a   : > { %7450 = vsyncadd (%p7595_p7), %s163_s22, 4294964224  ;;  %s192_s23 = smul.u32 34, %s7481_s15  ;;  %v9388_v0 = vmov 0.0   ;;  %v246_v1 = vld [vmem:[%s7640_s18 + $0x68] sm:$0xff]  ;;  %v248_v2 = vld [vmem:[%s7640_s18 + $0x78] sm:$0xff]  ;;  %vm257_vm0 = vcmask 130048  }
  0x3b   : > { %424 = vmatprep.mubr.f32.mxu0 %v9388_v0  ;;  %693 = vmatprep.mubr.f32.mxu1 %v9388_v0  ;;  %v245_v3 = vld [vmem:[%s7640_s18 + $0x60] sm:$0xff]  ;;  %v247_v4 = vld [vmem:[%s7640_s18 + $0x70] sm:$0xff]  ;;  %v234_v5 = vld [vmem:[%s7640_s18 + $0x8] sm:$0xff]  ;;  %s189_s29 = sand.u32 1, %s7461_s10   ;;  %vm4433_vm1 = vcmask 392192   ;;  %s5588_s25 = smul.u32 408, %s7481_s15 }
  0x3c   : > { %p193_p4 = scmp.lt.s32.totalorder %s192_s23, 135  ;;  %388 = vmatprep.subr.mxu0 %v246_v1  ;;  %657 = vmatprep.subr.mxu1 %v248_v2  ;;  %v236_v6 = vld [vmem:[%s7640_s18 + $0x18] sm:$0xff]  ;;  %v233_v7 = vld [vmem:[%s7640_s18] sm:$0xff]  ;;  %v235_v8 = vld [vmem:[%s7640_s18 + $0x10] sm:$0xff]  ;;  %s8133_s21 = smul.u32 3264, %s189_s29 }
  0x3d   : > { %389 = vmatpush1.msra.mxu0 %v245_v3  ;;  %658 = vmatpush1.msra.mxu1 %v247_v4  ;;  %v250_v10 = vld [vmem:[%s7640_s18 + $0x88] sm:$0xff]  ;;  %v252_v11 = vld [vmem:[%s7640_s18 + $0x98] sm:$0xff]  ;;  %v249_v12 = vld [vmem:[%s7640_s18 + $0x80] sm:$0xff]  ;;  %s5574_s8 = smul.u32 1632, %s7485_s16 }
  0x3e   : > { %s9461_s23 = smov (!%p193_p4, %s192_s23), 135  ;;  %390 = vmatprep.subr.mxu0 %v234_v5  ;;  %659 = vmatprep.subr.mxu1 %v236_v6  ;;  %v251_v13 = vld [vmem:[%s7640_s18 + $0x90] sm:$0xff]  ;;  %v238_v16 = vld [vmem:[%s7640_s18 + $0x28] sm:$0xff]  ;;  %v240_v17 = vld [vmem:[%s7640_s18 + $0x38] sm:$0xff]  ;;  %s8164_s30 = scalar_lea.vmem [#allocation5], %s8133_s21 }
  0x3f   : > { %s4953_s20 = sshll.u32 %s9461_s23, 3  ;;  %391 = vmatpush1.msra.mxu0 %v233_v7  ;;  %660 = vmatpush1.msra.mxu1 %v235_v8  ;;  %v237_v18 = vld [vmem:[%s7640_s18 + $0x20] sm:$0xff]  ;;  %v239_v19 = vld [vmem:[%s7640_s18 + $0x30] sm:$0xff]  ;;  %v254_v21 = vld [vmem:[%s7640_s18 + $0xa8] sm:$0xff]  ;;  %s4845_s7 = sadd.s32 %s5588_s25, %s5574_s8 }
  0x40   : > { %s7655_s27 = scalar_lea.vmem %s9383_s1, %s4953_s20  ;;  %926 = vmatprep.subr.mxu0 %v250_v10  ;;  %1195 = vmatprep.subr.mxu1 %v252_v11  ;;  %v256_v22 = vld [vmem:[%s7640_s18 + $0xb8] sm:$0xff]  ;;  %v253_v53 = vld [vmem:[%s7640_s18 + $0xa0] sm:$0xff]  ;;  %v255_v54 = vld [vmem:[%s7640_s18 + $0xb0] sm:$0xff]  ;;  %s5566_s12 = sshll.u32 %s4845_s7, 7 }
  0x41   : > { %v7663_v9 = vld [vmem:[%s7655_s27] sm:$0xff]  ;;  %v7674_v14 = vld [vmem:[%s7655_s27 + $0x8] sm:$0xff]  ;;  %v7683_v15 = vld [vmem:[%s7655_s27 + $0x10] sm:$0xff]  ;;  %s4848_s26 = sshll.u32 %s8164_s30, 4  ;;  %s9312_s22 = scalar_lea.hbm %s9384_s2, %s5566_s12  ;;  %s9314_s26 = int_to_ptr.vmem [resolvable:$true] %s4848_s26 }
  0x42   : > { %4954 = vmatmul.mubr.msk.f32.vlgmr.msra.gmra.mxu0 %vm257_vm0, %v7663_v9  ;;  %4988 = vmatmul.mubr.msk.f32.vlgmr.msra.gmra.mxu1 %vm257_vm0, %v7663_v9  ;;  %v7698_v20 = vld [vmem:[%s7655_s27 + $0x18] sm:$0xff]  ;;  %v7709_v23 = vld [vmem:[%s7655_s27 + $0x20] sm:$0xff]  ;;  %v7718_v24 = vld [vmem:[%s7655_s27 + $0x28] sm:$0xff]  ;;  %s7377_s23 = scalar_lea.vmem %s9314_s26, 52224  ;;  %s7503_s20 = smov [#allocation5]  }
  0x43   : > { %927 = vmatpush1.msra.mxu0 %v249_v12  ;;  %1196 = vmatpush1.msra.mxu1 %v251_v13  ;;  %v7727_v25 = vld [vmem:[%s7655_s27 + $0x30] sm:$0xff]  ;;  %v7736_v26 = vld [vmem:[%s7655_s27 + $0x38] sm:$0xff]  ;;  %v7745_v27 = vld [vmem:[%s7655_s27 + $0x40] sm:$0xff]  ;;  %p7378_p7 = scmp.ne.s32.totalorder %s9314_s26, %s7377_s23  ;;  %s7381_s28 = sshll.u32 %s7503_s20, 4  ;;  %s7382_s28 = int_to_ptr.vmem [resolvable:$false] %s7381_s28 }
  0x44   : > { %430 = vmatprep.mubr.f32.mxu0 %v9388_v0  ;;  %699 = vmatprep.mubr.f32.mxu1 %v9388_v0  ;;  %v7754_v28 = vld [vmem:[%s7655_s27 + $0x48] sm:$0xff]  ;;  %v7763_v29 = vld [vmem:[%s7655_s27 + $0x50] sm:$0xff]  ;;  %v7772_v30 = vld [vmem:[%s7655_s27 + $0x58] sm:$0xff]  ;;  %s7383_s24 = scalar_lea.vmem %s7382_s28, 104448  ;;  %p7384_p9 = scmp.lt.s32.totalorder %s9314_s26, %s7382_s28 }
  0x45   : > { %928 = vmatprep.subr.mxu0 %v238_v16  ;;  %1197 = vmatprep.subr.mxu1 %v240_v17  ;;  %v7781_v31 = vld [vmem:[%s7655_s27 + $0x60] sm:$0xff]  ;;  %v7790_v32 = vld [vmem:[%s7655_s27 + $0x68] sm:$0xff]  ;;  %v7799_v33 = vld [vmem:[%s7655_s27 + $0x70] sm:$0xff]  ;;  %p7379_p5 = pnand %p7378_p7, %p7603_p12  ;;  %p7385_p10 = scmp.lt.s32.totalorder %s7383_s24, %s7377_s23 }
  0x46   : > { %4955 = vmatmul.mubr.msk.f32.gmra.mxu0 %vm257_vm0, %v7674_v14  ;;  %4989 = vmatmul.mubr.msk.f32.gmra.mxu1 %vm257_vm0, %v7674_v14  ;;  %v7808_v34 = vld [vmem:[%s7655_s27 + $0x78] sm:$0xff]  ;;  %v7817_v35 = vld [vmem:[%s7655_s27 + $0x80] sm:$0xff]  ;;  %v7826_v36 = vld [vmem:[%s7655_s27 + $0x88] sm:$0xff] }
  0x47   : > { %436 = vmatprep.mubr.f32.mxu0 %v9388_v0  ;;  %705 = vmatprep.mubr.f32.mxu1 %v9388_v0  ;;  %v7835_v37 = vld [vmem:[%s7655_s27 + $0x90] sm:$0xff]  ;;  %v7844_v38 = vld [vmem:[%s7655_s27 + $0x98] sm:$0xff]  ;;  %v7853_v39 = vld [vmem:[%s7655_s27 + $0xa0] sm:$0xff]  ;;  %p7380_p8 = pneg %p7379_p5  ;;  %p7386_p3 = por %p7385_p10, %p7384_p9 }
  0x48   : > { %929 = vmatpush1.msra.mxu0 %v237_v18  ;;  %1198 = vmatpush1.msra.mxu1 %v239_v19  ;;  %v7862_v40 = vld [vmem:[%s7655_s27 + $0xa8] sm:$0xff]  ;;  %v7871_v41 = vld [vmem:[%s7655_s27 + $0xb0] sm:$0xff]  ;;  %v7880_v42 = vld [vmem:[%s7655_s27 + $0xb8] sm:$0xff] }
  0x49   : > { %1464 = vmatprep.subr.mxu0 %v254_v21  ;;  %1733 = vmatprep.subr.mxu1 %v256_v22  ;;  %v7889_v43 = vld [vmem:[%s7655_s27 + $0xc0] sm:$0xff]  ;;  %v7898_v44 = vld [vmem:[%s7655_s27 + $0xc8] sm:$0xff]  ;;  %v7907_v45 = vld [vmem:[%s7655_s27 + $0xd0] sm:$0xff]  ;;  %p7387_p11 = pnand %p7386_p3, %p7380_p8 }
  0x4a   : > { %4956 = vmatmul.mubr.msk.f32.gmra.mxu0 %vm257_vm0, %v7683_v15  ;;  %4990 = vmatmul.mubr.msk.f32.gmra.mxu1 %vm257_vm0, %v7683_v15  ;;  %v7916_v46 = vld [vmem:[%s7655_s27 + $0xd8] sm:$0xff]  ;;  %v7925_v47 = vld [vmem:[%s7655_s27 + $0xe0] sm:$0xff]  ;;  %v7934_v48 = vld [vmem:[%s7655_s27 + $0xe8] sm:$0xff] }
  0x4b   : > { %442 = vmatprep.mubr.f32.mxu0 %v9388_v0  ;;  %711 = vmatprep.mubr.f32.mxu1 %v9388_v0  ;;  %v7943_v49 = vld [vmem:[%s7655_s27 + $0xf0] sm:$0xff]  ;;  %v7952_v50 = vld [vmem:[%s7655_s27 + $0xf8] sm:$0xff]  ;;  %v7961_v51 = vld [vmem:[%s7655_s27 + $0x100] sm:$0xff] }
  0x4c   : > { %v7970_v52 = vld [vmem:[%s7655_s27 + $0x108] sm:$0xff]  ;;  %v244_v56 = vld [vmem:[%s7640_s18 + $0x58] sm:$0xff]  ;;  %v241_v57 = vld [vmem:[%s7640_s18 + $0x40] sm:$0xff] }
  0x4d   : > { %v242_v55 = vld [vmem:[%s7640_s18 + $0x48] sm:$0xff]  ;;  %v243_v58 = vld [vmem:[%s7640_s18 + $0x50] sm:$0xff]  ;;  %s9322_s18 = scalar_lea.sflag [#allocation4], %s189_s29 }
  0x4e   : > { %4957 = vmatmul.mubr.msk.f32.gmra.mxu0 %vm257_vm0, %v7698_v20  ;;  %4991 = vmatmul.mubr.msk.f32.gmra.mxu1 %vm257_vm0, %v7698_v20 }
  0x4f   : > { %448 = vmatprep.mubr.f32.mxu0 %v9388_v0  ;;  %717 = vmatprep.mubr.f32.mxu1 %v9388_v0 }
  0x52   : > { %4958 = vmatmul.mubr.msk.f32.gmra.mxu0 %vm257_vm0, %v7709_v23  ;;  %4992 = vmatmul.mubr.msk.f32.gmra.mxu1 %vm257_vm0, %v7709_v23 }
  0x53   : > { %454 = vmatprep.mubr.f32.mxu0 %v9388_v0  ;;  %723 = vmatprep.mubr.f32.mxu1 %v9388_v0 }
  0x56   : > { %4959 = vmatmul.mubr.msk.f32.gmra.mxu0 %vm257_vm0, %v7718_v24  ;;  %4993 = vmatmul.mubr.msk.f32.gmra.mxu1 %vm257_vm0, %v7718_v24 }
  0x57   : > { %460 = vmatprep.mubr.f32.mxu0 %v9388_v0  ;;  %729 = vmatprep.mubr.f32.mxu1 %v9388_v0 }
  0x5a   : > { %4960 = vmatmul.mubr.msk.f32.gmra.mxu0 %vm257_vm0, %v7727_v25  ;;  %4994 = vmatmul.mubr.msk.f32.gmra.mxu1 %vm257_vm0, %v7727_v25 }
  0x5b   : > { %466 = vmatprep.mubr.f32.mxu0 %v9388_v0  ;;  %735 = vmatprep.mubr.f32.mxu1 %v9388_v0 }
  0x5e   : > { %4961 = vmatmul.mubr.msk.f32.gmra.mxu0 %vm257_vm0, %v7736_v26  ;;  %4995 = vmatmul.mubr.msk.f32.gmra.mxu1 %vm257_vm0, %v7736_v26 }
  0x5f   : > { %472 = vmatprep.mubr.f32.mxu0 %v9388_v0  ;;  %741 = vmatprep.mubr.f32.mxu1 %v9388_v0 }
  0x62   : > { %4962 = vmatmul.mubr.msk.f32.gmra.mxu0 %vm257_vm0, %v7745_v27  ;;  %4996 = vmatmul.mubr.msk.f32.gmra.mxu1 %vm257_vm0, %v7745_v27 }
  0x63   : > { %478 = vmatprep.mubr.f32.mxu0 %v9388_v0  ;;  %747 = vmatprep.mubr.f32.mxu1 %v9388_v0 }
  0x66   : > { %4963 = vmatmul.mubr.msk.f32.gmra.mxu0 %vm257_vm0, %v7754_v28  ;;  %4997 = vmatmul.mubr.msk.f32.gmra.mxu1 %vm257_vm0, %v7754_v28 }
  0x67   : > { %484 = vmatprep.mubr.f32.mxu0 %v9388_v0  ;;  %753 = vmatprep.mubr.f32.mxu1 %v9388_v0 }
  0x6a   : > { %4964 = vmatmul.mubr.msk.f32.gmra.mxu0 %vm257_vm0, %v7763_v29  ;;  %4998 = vmatmul.mubr.msk.f32.gmra.mxu1 %vm257_vm0, %v7763_v29 }
  0x6b   : > { %490 = vmatprep.mubr.f32.mxu0 %v9388_v0  ;;  %759 = vmatprep.mubr.f32.mxu1 %v9388_v0 }
  0x6e   : > { %4965 = vmatmul.mubr.msk.f32.gmra.mxu0 %vm257_vm0, %v7772_v30  ;;  %4999 = vmatmul.mubr.msk.f32.gmra.mxu1 %vm257_vm0, %v7772_v30 }
  0x6f   : > { %496 = vmatprep.mubr.f32.mxu0 %v9388_v0  ;;  %765 = vmatprep.mubr.f32.mxu1 %v9388_v0 }
  0x72   : > { %4966 = vmatmul.mubr.msk.f32.gmra.mxu0 %vm257_vm0, %v7781_v31  ;;  %5000 = vmatmul.mubr.msk.f32.gmra.mxu1 %vm257_vm0, %v7781_v31 }
  0x73   : > { %502 = vmatprep.mubr.f32.mxu0 %v9388_v0  ;;  %771 = vmatprep.mubr.f32.mxu1 %v9388_v0 }
  0x76   : > { %4967 = vmatmul.mubr.msk.f32.gmra.mxu0 %vm257_vm0, %v7790_v32  ;;  %5001 = vmatmul.mubr.msk.f32.gmra.mxu1 %vm257_vm0, %v7790_v32 }
  0x77   : > { %508 = vmatprep.mubr.f32.mxu0 %v9388_v0  ;;  %777 = vmatprep.mubr.f32.mxu1 %v9388_v0 }
  0x7a   : > { %4968 = vmatmul.mubr.msk.f32.gmra.mxu0 %vm257_vm0, %v7799_v33  ;;  %5002 = vmatmul.mubr.msk.f32.gmra.mxu1 %vm257_vm0, %v7799_v33 }
  0x7b   : > { %514 = vmatprep.mubr.f32.mxu0 %v9388_v0  ;;  %783 = vmatprep.mubr.f32.mxu1 %v9388_v0 }
  0x7e   : > { %4969 = vmatmul.mubr.msk.f32.gmra.mxu0 %vm257_vm0, %v7808_v34  ;;  %5003 = vmatmul.mubr.msk.f32.gmra.mxu1 %vm257_vm0, %v7808_v34 }
  0x7f   : > { %520 = vmatprep.mubr.f32.mxu0 %v9388_v0  ;;  %789 = vmatprep.mubr.f32.mxu1 %v9388_v0 }
  0x82   : > { %4970 = vmatmul.mubr.msk.f32.gmra.mxu0 %vm257_vm0, %v7817_v35  ;;  %5004 = vmatmul.mubr.msk.f32.gmra.mxu1 %vm257_vm0, %v7817_v35 }
  0x83   : > { %526 = vmatprep.mubr.f32.mxu0 %v9388_v0  ;;  %795 = vmatprep.mubr.f32.mxu1 %v9388_v0 }
  0x86   : > { %4971 = vmatmul.mubr.msk.f32.gmra.mxu0 %vm257_vm0, %v7826_v36  ;;  %5005 = vmatmul.mubr.msk.f32.gmra.mxu1 %vm257_vm0, %v7826_v36 }
  0x87   : > { %532 = vmatprep.mubr.f32.mxu0 %v9388_v0  ;;  %801 = vmatprep.mubr.f32.mxu1 %v9388_v0 }
  0x8a   : > { %4972 = vmatmul.mubr.msk.f32.gmra.mxu0 %vm257_vm0, %v7835_v37  ;;  %5006 = vmatmul.mubr.msk.f32.gmra.mxu1 %vm257_vm0, %v7835_v37 }
  0x8b   : > { %538 = vmatprep.mubr.f32.mxu0 %v9388_v0  ;;  %807 = vmatprep.mubr.f32.mxu1 %v9388_v0 }
  0x8e   : > { %4973 = vmatmul.mubr.msk.f32.gmra.mxu0 %vm257_vm0, %v7844_v38  ;;  %5007 = vmatmul.mubr.msk.f32.gmra.mxu1 %vm257_vm0, %v7844_v38 }
  0x8f   : > { %544 = vmatprep.mubr.f32.mxu0 %v9388_v0  ;;  %813 = vmatprep.mubr.f32.mxu1 %v9388_v0 }
  0x92   : > { %4974 = vmatmul.mubr.msk.f32.gmra.mxu0 %vm257_vm0, %v7853_v39  ;;  %5008 = vmatmul.mubr.msk.f32.gmra.mxu1 %vm257_vm0, %v7853_v39 }
  0x93   : > { %550 = vmatprep.mubr.f32.mxu0 %v9388_v0  ;;  %819 = vmatprep.mubr.f32.mxu1 %v9388_v0 }
  0x96   : > { %4975 = vmatmul.mubr.msk.f32.gmra.mxu0 %vm257_vm0, %v7862_v40  ;;  %5009 = vmatmul.mubr.msk.f32.gmra.mxu1 %vm257_vm0, %v7862_v40 }
  0x97   : > { %556 = vmatprep.mubr.f32.mxu0 %v9388_v0  ;;  %825 = vmatprep.mubr.f32.mxu1 %v9388_v0 }
  0x9a   : > { %4976 = vmatmul.mubr.msk.f32.gmra.mxu0 %vm257_vm0, %v7871_v41  ;;  %5010 = vmatmul.mubr.msk.f32.gmra.mxu1 %vm257_vm0, %v7871_v41 }
  0x9b   : > { %562 = vmatprep.mubr.f32.mxu0 %v9388_v0  ;;  %831 = vmatprep.mubr.f32.mxu1 %v9388_v0 }
  0x9e   : > { %4977 = vmatmul.mubr.msk.f32.gmra.mxu0 %vm257_vm0, %v7880_v42  ;;  %5011 = vmatmul.mubr.msk.f32.gmra.mxu1 %vm257_vm0, %v7880_v42 }
  0x9f   : > { %568 = vmatprep.mubr.f32.mxu0 %v9388_v0  ;;  %837 = vmatprep.mubr.f32.mxu1 %v9388_v0 }
  0xa2   : > { %4978 = vmatmul.mubr.msk.f32.gmra.mxu0 %vm257_vm0, %v7889_v43  ;;  %5012 = vmatmul.mubr.msk.f32.gmra.mxu1 %vm257_vm0, %v7889_v43 }
  0xa3   : > { %574 = vmatprep.mubr.f32.mxu0 %v9388_v0  ;;  %843 = vmatprep.mubr.f32.mxu1 %v9388_v0 }
  0xa6   : > { %4979 = vmatmul.mubr.msk.f32.gmra.mxu0 %vm257_vm0, %v7898_v44  ;;  %5013 = vmatmul.mubr.msk.f32.gmra.mxu1 %vm257_vm0, %v7898_v44 }
  0xa7   : > { %580 = vmatprep.mubr.f32.mxu0 %v9388_v0  ;;  %849 = vmatprep.mubr.f32.mxu1 %v9388_v0 }
  0xaa   : > { %4980 = vmatmul.mubr.msk.f32.gmra.mxu0 %vm257_vm0, %v7907_v45  ;;  %5014 = vmatmul.mubr.msk.f32.gmra.mxu1 %vm257_vm0, %v7907_v45 }
  0xab   : > { %586 = vmatprep.mubr.f32.mxu0 %v9388_v0  ;;  %855 = vmatprep.mubr.f32.mxu1 %v9388_v0 }
  0xae   : > { %4981 = vmatmul.mubr.msk.f32.gmra.mxu0 %vm257_vm0, %v7916_v46  ;;  %5015 = vmatmul.mubr.msk.f32.gmra.mxu1 %vm257_vm0, %v7916_v46 }
  0xaf   : > { %592 = vmatprep.mubr.f32.mxu0 %v9388_v0  ;;  %861 = vmatprep.mubr.f32.mxu1 %v9388_v0 }
  0xb2   : > { %4982 = vmatmul.mubr.msk.f32.gmra.mxu0 %vm257_vm0, %v7925_v47  ;;  %5016 = vmatmul.mubr.msk.f32.gmra.mxu1 %vm257_vm0, %v7925_v47 }
  0xb3   : > { %598 = vmatprep.mubr.f32.mxu0 %v9388_v0  ;;  %867 = vmatprep.mubr.f32.mxu1 %v9388_v0 }
  0xb6   : > { %4983 = vmatmul.mubr.msk.f32.gmra.mxu0 %vm257_vm0, %v7934_v48  ;;  %5017 = vmatmul.mubr.msk.f32.gmra.mxu1 %vm257_vm0, %v7934_v48 }
  0xb7   : > { %604 = vmatprep.mubr.f32.mxu0 %v9388_v0  ;;  %873 = vmatprep.mubr.f32.mxu1 %v9388_v0 }
  0xba   : > { %4984 = vmatmul.mubr.msk.f32.gmra.mxu0 %vm257_vm0, %v7943_v49  ;;  %5018 = vmatmul.mubr.msk.f32.gmra.mxu1 %vm257_vm0, %v7943_v49 }
  0xbb   : > { %610 = vmatprep.mubr.f32.mxu0 %v9388_v0  ;;  %879 = vmatprep.mubr.f32.mxu1 %v9388_v0 }
  0xbe   : > { %4985 = vmatmul.mubr.msk.f32.gmra.mxu0 %vm257_vm0, %v7952_v50  ;;  %5019 = vmatmul.mubr.msk.f32.gmra.mxu1 %vm257_vm0, %v7952_v50 }
  0xbf   : > { %616 = vmatprep.mubr.f32.mxu0 %v9388_v0  ;;  %885 = vmatprep.mubr.f32.mxu1 %v9388_v0 }
  0xc2   : > { %4986 = vmatmul.mubr.msk.f32.gmra.mxu0 %vm257_vm0, %v7961_v51  ;;  %5020 = vmatmul.mubr.msk.f32.gmra.mxu1 %vm257_vm0, %v7961_v51 }
  0xc3   : > { %622 = vmatprep.mubr.f32.mxu0 %v9388_v0  ;;  %891 = vmatprep.mubr.f32.mxu1 %v9388_v0 }
  0xc6   : > { %4987 = vmatmul.mubr.msk.f32.gmra.mxu0 %vm257_vm0, %v7970_v52  ;;  %5021 = vmatmul.mubr.msk.f32.gmra.mxu1 %vm257_vm0, %v7970_v52 }
  0xc7   : > { %962 = vmatprep.mubr.f32.mxu0 %v9388_v0  ;;  %1231 = vmatprep.mubr.f32.mxu1 %v9388_v0 }
  0xca   : > { %5022 = vmatmul.mubr.msk.f32.vlgmr.msra.gmra.mxu0 %vm257_vm0, %v7663_v9  ;;  %5056 = vmatmul.mubr.msk.f32.vlgmr.msra.gmra.mxu1 %vm257_vm0, %v7663_v9 }
  0xcb   : > { %1465 = vmatpush1.msra.mxu0 %v253_v53  ;;  %1734 = vmatpush1.msra.mxu1 %v255_v54 }
  0xcc   : > { %968 = vmatprep.mubr.f32.mxu0 %v9388_v0  ;;  %1237 = vmatprep.mubr.f32.mxu1 %v9388_v0 }
  0xcd   : > { %1466 = vmatprep.subr.mxu0 %v242_v55  ;;  %1735 = vmatprep.subr.mxu1 %v244_v56 }
  0xce   : > { %5023 = vmatmul.mubr.msk.f32.gmra.mxu0 %vm257_vm0, %v7674_v14  ;;  %5057 = vmatmul.mubr.msk.f32.gmra.mxu1 %vm257_vm0, %v7674_v14 }
  0xcf   : > { %974 = vmatprep.mubr.f32.mxu0 %v9388_v0  ;;  %1243 = vmatprep.mubr.f32.mxu1 %v9388_v0 }
  0xd0   : > { %1467 = vmatpush1.msra.mxu0 %v241_v57  ;;  %1736 = vmatpush1.msra.mxu1 %v243_v58 }
  0xd2   : > { %5024 = vmatmul.mubr.msk.f32.gmra.mxu0 %vm257_vm0, %v7683_v15  ;;  %5058 = vmatmul.mubr.msk.f32.gmra.mxu1 %vm257_vm0, %v7683_v15 }
  0xd3   : > { %980 = vmatprep.mubr.f32.mxu0 %v9388_v0  ;;  %1249 = vmatprep.mubr.f32.mxu1 %v9388_v0 }
  0xd6   : > { %5025 = vmatmul.mubr.msk.f32.gmra.mxu0 %vm257_vm0, %v7698_v20  ;;  %5059 = vmatmul.mubr.msk.f32.gmra.mxu1 %vm257_vm0, %v7698_v20 }
  0xd7   : > { %986 = vmatprep.mubr.f32.mxu0 %v9388_v0  ;;  %1255 = vmatprep.mubr.f32.mxu1 %v9388_v0 }
  0xda   : > { %5026 = vmatmul.mubr.msk.f32.gmra.mxu0 %vm257_vm0, %v7709_v23  ;;  %5060 = vmatmul.mubr.msk.f32.gmra.mxu1 %vm257_vm0, %v7709_v23 }
  0xdb   : > { %992 = vmatprep.mubr.f32.mxu0 %v9388_v0  ;;  %1261 = vmatprep.mubr.f32.mxu1 %v9388_v0 }
  0xde   : > { %5027 = vmatmul.mubr.msk.f32.gmra.mxu0 %vm257_vm0, %v7718_v24  ;;  %5061 = vmatmul.mubr.msk.f32.gmra.mxu1 %vm257_vm0, %v7718_v24 }
  0xdf   : > { %998 = vmatprep.mubr.f32.mxu0 %v9388_v0  ;;  %1267 = vmatprep.mubr.f32.mxu1 %v9388_v0 }
  0xe2   : > { %5028 = vmatmul.mubr.msk.f32.gmra.mxu0 %vm257_vm0, %v7727_v25  ;;  %5062 = vmatmul.mubr.msk.f32.gmra.mxu1 %vm257_vm0, %v7727_v25 }
  0xe3   : > { %1004 = vmatprep.mubr.f32.mxu0 %v9388_v0  ;;  %1273 = vmatprep.mubr.f32.mxu1 %v9388_v0 }
  0xe6   : > { %5029 = vmatmul.mubr.msk.f32.gmra.mxu0 %vm257_vm0, %v7736_v26  ;;  %5063 = vmatmul.mubr.msk.f32.gmra.mxu1 %vm257_vm0, %v7736_v26 }
  0xe7   : > { %1010 = vmatprep.mubr.f32.mxu0 %v9388_v0  ;;  %1279 = vmatprep.mubr.f32.mxu1 %v9388_v0 }
  0xea   : > { %5030 = vmatmul.mubr.msk.f32.gmra.mxu0 %vm257_vm0, %v7745_v27  ;;  %5064 = vmatmul.mubr.msk.f32.gmra.mxu1 %vm257_vm0, %v7745_v27 }
  0xeb   : > { %1016 = vmatprep.mubr.f32.mxu0 %v9388_v0  ;;  %1285 = vmatprep.mubr.f32.mxu1 %v9388_v0 }
  0xee   : > { %5031 = vmatmul.mubr.msk.f32.gmra.mxu0 %vm257_vm0, %v7754_v28  ;;  %5065 = vmatmul.mubr.msk.f32.gmra.mxu1 %vm257_vm0, %v7754_v28 }
  0xef   : > { %1022 = vmatprep.mubr.f32.mxu0 %v9388_v0  ;;  %1291 = vmatprep.mubr.f32.mxu1 %v9388_v0 }
  0xf2   : > { %5032 = vmatmul.mubr.msk.f32.gmra.mxu0 %vm257_vm0, %v7763_v29  ;;  %5066 = vmatmul.mubr.msk.f32.gmra.mxu1 %vm257_vm0, %v7763_v29 }
  0xf3   : > { %1028 = vmatprep.mubr.f32.mxu0 %v9388_v0  ;;  %1297 = vmatprep.mubr.f32.mxu1 %v9388_v0 }
  0xf6   : > { %5033 = vmatmul.mubr.msk.f32.gmra.mxu0 %vm257_vm0, %v7772_v30  ;;  %5067 = vmatmul.mubr.msk.f32.gmra.mxu1 %vm257_vm0, %v7772_v30 }
  0xf7   : > { %1034 = vmatprep.mubr.f32.mxu0 %v9388_v0  ;;  %1303 = vmatprep.mubr.f32.mxu1 %v9388_v0 }
  0xfa   : > { %5034 = vmatmul.mubr.msk.f32.gmra.mxu0 %vm257_vm0, %v7781_v31  ;;  %5068 = vmatmul.mubr.msk.f32.gmra.mxu1 %vm257_vm0, %v7781_v31 }
  0xfb   : > { %1040 = vmatprep.mubr.f32.mxu0 %v9388_v0  ;;  %1309 = vmatprep.mubr.f32.mxu1 %v9388_v0 }
  0xfe   : > { %5035 = vmatmul.mubr.msk.f32.gmra.mxu0 %vm257_vm0, %v7790_v32  ;;  %5069 = vmatmul.mubr.msk.f32.gmra.mxu1 %vm257_vm0, %v7790_v32 }
  0xff   : > { %1046 = vmatprep.mubr.f32.mxu0 %v9388_v0  ;;  %1315 = vmatprep.mubr.f32.mxu1 %v9388_v0 }
 0x102   : > { %v426_v59 = vpop.f32.mrf.mxu0  ;;  %v695_v60 = vpop.f32.mrf.mxu1  ;;  %5036 = vmatmul.mubr.msk.f32.gmra.mxu0 %vm257_vm0, %v7799_v33  ;;  %5070 = vmatmul.mubr.msk.f32.gmra.mxu1 %vm257_vm0, %v7799_v33 }
 0x103   : > { %v5158_v61 = vmul.f32 -1.442695, %v426_v59  ;;  %v5160_v62 = vmul.f32 -1.442695, %v695_v60  ;;  %1052 = vmatprep.mubr.f32.mxu0 %v9388_v0  ;;  %1321 = vmatprep.mubr.f32.mxu1 %v9388_v0 }
 0x104   : > { %v428_v63 = vpop.f32.mrf.mxu0  ;;  %v697_v1 = vpop.f32.mrf.mxu1 }
 0x105   : > { %5683 = vpow2.f32 %v5158_v61  ;;  %v5159_v2 = vmul.f32 -1.442695, %v428_v63  ;;  %v5161_v3 = vmul.f32 -1.442695, %v697_v1 }
 0x106   : > { %5685 = vpow2.f32 %v5160_v62  ;;  %v432_v4 = vpop.f32.mrf.mxu0  ;;  %v701_v5 = vpop.f32.mrf.mxu1  ;;  %5037 = vmatmul.mubr.msk.f32.gmra.mxu0 %vm257_vm0, %v7808_v34  ;;  %5071 = vmatmul.mubr.msk.f32.gmra.mxu1 %vm257_vm0, %v7808_v34 }
 0x107   : > { %5687 = vpow2.f32 %v5159_v2  ;;  %v5170_v6 = vmul.f32 -1.442695, %v432_v4  ;;  %v5172_v7 = vmul.f32 -1.442695, %v701_v5  ;;  %1058 = vmatprep.mubr.f32.mxu0 %v9388_v0  ;;  %1327 = vmatprep.mubr.f32.mxu1 %v9388_v0 }
 0x108   : > { %5689 = vpow2.f32 %v5161_v3  ;;  %v434_v8 = vpop.f32.mrf.mxu0  ;;  %v703_v9 = vpop.f32.mrf.mxu1 }
 0x109   : > { %5691 = vpow2.f32 %v5170_v6  ;;  %v5171_v10 = vmul.f32 -1.442695, %v434_v8  ;;  %v5173_v11 = vmul.f32 -1.442695, %v703_v9 }
 0x10a   : > { %5693 = vpow2.f32 %v5172_v7  ;;  %v438_v12 = vpop.f32.mrf.mxu0  ;;  %v707_v13 = vpop.f32.mrf.mxu1  ;;  %5038 = vmatmul.mubr.msk.f32.gmra.mxu0 %vm257_vm0, %v7817_v35  ;;  %5072 = vmatmul.mubr.msk.f32.gmra.mxu1 %vm257_vm0, %v7817_v35 }
 0x10b   : > { %5695 = vpow2.f32 %v5171_v10  ;;  %v5182_v14 = vmul.f32 -1.442695, %v438_v12  ;;  %v5184_v15 = vmul.f32 -1.442695, %v707_v13  ;;  %1064 = vmatprep.mubr.f32.mxu0 %v9388_v0  ;;  %1333 = vmatprep.mubr.f32.mxu1 %v9388_v0 }
 0x10c   : > { %5697 = vpow2.f32 %v5173_v11  ;;  %v440_v16 = vpop.f32.mrf.mxu0  ;;  %v709_v17 = vpop.f32.mrf.mxu1 }
 0x10d   : > { %5699 = vpow2.f32 %v5182_v14  ;;  %v5183_v18 = vmul.f32 -1.442695, %v440_v16  ;;  %v5185_v19 = vmul.f32 -1.442695, %v709_v17 }
 0x10e   : > { %5701 = vpow2.f32 %v5184_v15  ;;  %v444_v20 = vpop.f32.mrf.mxu0  ;;  %v713_v21 = vpop.f32.mrf.mxu1  ;;  %5039 = vmatmul.mubr.msk.f32.gmra.mxu0 %vm257_vm0, %v7826_v36  ;;  %5073 = vmatmul.mubr.msk.f32.gmra.mxu1 %vm257_vm0, %v7826_v36 }
 0x10f   : > { %5703 = vpow2.f32 %v5183_v18  ;;  %v5194_v22 = vmul.f32 -1.442695, %v444_v20  ;;  %v5196_v23 = vmul.f32 -1.442695, %v713_v21  ;;  %1070 = vmatprep.mubr.f32.mxu0 %v9388_v0  ;;  %1339 = vmatprep.mubr.f32.mxu1 %v9388_v0 }
 0x110   : > { %5705 = vpow2.f32 %v5185_v19  ;;  %v446_v24 = vpop.f32.mrf.mxu0  ;;  %v715_v25 = vpop.f32.mrf.mxu1 }
 0x111   : > { %5707 = vpow2.f32 %v5194_v22  ;;  %v5195_v26 = vmul.f32 -1.442695, %v446_v24  ;;  %v5197_v27 = vmul.f32 -1.442695, %v715_v25 }
 0x112   : > { %v5684_v28 = vpop.eup %5683  ;;  %5709 = vpow2.f32 %v5196_v23  ;;  %v8092_v29 = vpop.f32.mrf.mxu0  ;;  %5040 = vmatmul.mubr.msk.f32.gmra.mxu0 %vm257_vm0, %v7835_v37  ;;  %5074 = vmatmul.mubr.msk.f32.gmra.mxu1 %vm257_vm0, %v7835_v37 }
 0x113   : > { %v8094_v30 = vpop.f32.mrf.mxu1  ;;  %v5686_v31 = vpop.eup %5685  ;;  %v3198_v32 = vadd.f32 1.0, %v5684_v28  ;;  %5711 = vpow2.f32 %v5195_v26  ;;  %1076 = vmatprep.mubr.f32.mxu0 %v9388_v0  ;;  %1345 = vmatprep.mubr.f32.mxu1 %v9388_v0 }
 0x114   : > { %v5688_v33 = vpop.eup %5687  ;;  %v3200_v34 = vadd.f32 1.0, %v5686_v31  ;;  %5713 = vpow2.f32 %v5197_v27  ;;  %v8102_v35 = vpop.f32.mrf.mxu0  ;;  %v5208_v27 = vmul.f32 -1.442695, %v8094_v30 }
 0x115   : > { %v8104_v36 = vpop.f32.mrf.mxu1  ;;  %v5690_v53 = vpop.eup %5689  ;;  %5715 = vrcp.f32 %v3198_v32  ;;  %v3199_v54 = vadd.f32 1.0, %v5688_v33 }
 0x116   : > { %v5692_v55 = vpop.eup %5691  ;;  %5717 = vrcp.f32 %v3200_v34  ;;  %v3201_v37 = vadd.f32 1.0, %v5690_v53  ;;  %v8106_v56 = vpop.f32.mrf.mxu0  ;;  %5041 = vmatmul.mubr.msk.f32.gmra.mxu0 %vm257_vm0, %v7844_v38  ;;  %5075 = vmatmul.mubr.msk.f32.gmra.mxu1 %vm257_vm0, %v7844_v38 }
 0x117   : > { %v8108_v57 = vpop.f32.mrf.mxu1  ;;  %v5694_v58 = vpop.eup %5693  ;;  %5719 = vrcp.f32 %v3199_v54  ;;  %v3210_v59 = vadd.f32 1.0, %v5692_v55  ;;  %1082 = vmatprep.mubr.f32.mxu0 %v9388_v0  ;;  %1351 = vmatprep.mubr.f32.mxu1 %v9388_v0  ;;  %v5218_v54 = vmul.f32 -1.442695, %v8106_v56 }
 0x118   : > { %v5696_v60 = vpop.eup %5695  ;;  %5721 = vrcp.f32 %v3201_v37  ;;  %v3212_v61 = vadd.f32 1.0, %v5694_v58  ;;  %v8116_v62 = vpop.f32.mrf.mxu0  ;;  %v5220_v55 = vmul.f32 -1.442695, %v8108_v57 }
 0x119   : > { %v8118_v63 = vpop.f32.mrf.mxu1  ;;  %v5698_v1 = vpop.eup %5697  ;;  %5723 = vrcp.f32 %v3210_v59  ;;  %v3211_v2 = vadd.f32 1.0, %v5696_v60  ;;  %v5219_v56 = vmul.f32 -1.442695, %v8116_v62 }
 0x11a   : > { %v5700_v38 = vpop.eup %5699  ;;  %5725 = vrcp.f32 %v3212_v61  ;;  %v3213_v3 = vadd.f32 1.0, %v5698_v1  ;;  %v8121_v4 = vpop.f32.mrf.mxu0  ;;  %5042 = vmatmul.mubr.msk.f32.gmra.mxu0 %vm257_vm0, %v7853_v39  ;;  %5076 = vmatmul.mubr.msk.f32.gmra.mxu1 %vm257_vm0, %v7853_v39  ;;  %v5221_v59 = vmul.f32 -1.442695, %v8118_v63 }
 0x11b   : > { %v8123_v5 = vpop.f32.mrf.mxu1  ;;  %v5702_v6 = vpop.eup %5701  ;;  %5727 = vrcp.f32 %v3211_v2  ;;  %v3222_v7 = vadd.f32 1.0, %v5700_v38  ;;  %1088 = vmatprep.mubr.f32.mxu0 %v9388_v0  ;;  %1357 = vmatprep.mubr.f32.mxu1 %v9388_v0  ;;  %v5230_v1 = vmul.f32 -1.442695, %v8121_v4 }
 0x11c   : > { %v5704_v8 = vpop.eup %5703  ;;  %5729 = vrcp.f32 %v3213_v3  ;;  %v3224_v9 = vadd.f32 1.0, %v5702_v6  ;;  %v8135_v10 = vpop.f32.mrf.mxu0  ;;  %v5232_v2 = vmul.f32 -1.442695, %v8123_v5 }
 0x11d   : > { %v8137_v11 = vpop.f32.mrf.mxu1  ;;  %v5706_v12 = vpop.eup %5705  ;;  %5731 = vrcp.f32 %v3222_v7  ;;  %v3223_v39 = vadd.f32 1.0, %v5704_v8  ;;  %v5231_v4 = vmul.f32 -1.442695, %v8135_v10 }
 0x11e   : > { %v5708_v13 = vpop.eup %5707  ;;  %5733 = vrcp.f32 %v3224_v9  ;;  %v3225_v14 = vadd.f32 1.0, %v5706_v12  ;;  %v8139_v15 = vpop.f32.mrf.mxu0  ;;  %5043 = vmatmul.mubr.msk.f32.gmra.mxu0 %vm257_vm0, %v7862_v40  ;;  %5077 = vmatmul.mubr.msk.f32.gmra.mxu1 %vm257_vm0, %v7862_v40  ;;  %v5206_v40 = vmul.f32 -1.442695, %v8092_v29  ;;  %v5207_v29 = vmul.f32 -1.442695, %v8102_v35 }
 0x11f   : > { %v8141_v16 = vpop.f32.mrf.mxu1  ;;  %v5710_v17 = vpop.eup %5709  ;;  %5735 = vrcp.f32 %v3223_v39  ;;  %v3234_v18 = vadd.f32 1.0, %v5708_v13  ;;  %1094 = vmatprep.mubr.f32.mxu0 %v9388_v0  ;;  %1363 = vmatprep.mubr.f32.mxu1 %v9388_v0  ;;  %v5233_v6 = vmul.f32 -1.442695, %v8137_v11  ;;  %v5242_v9 = vmul.f32 -1.442695, %v8139_v15 }
 0x120   : > { %v5712_v19 = vpop.eup %5711  ;;  %5737 = vrcp.f32 %v3225_v14  ;;  %v3236_v20 = vadd.f32 1.0, %v5710_v17  ;;  %v8149_v21 = vpop.f32.mrf.mxu0  ;;  %v5244_v12 = vmul.f32 -1.442695, %v8141_v16 }
 0x121   : > { %v8151_v22 = vpop.f32.mrf.mxu1  ;;  %v5714_v23 = vpop.eup %5713  ;;  %5739 = vrcp.f32 %v3234_v18  ;;  %v3235_v24 = vadd.f32 1.0, %v5712_v19  ;;  %v5243_v14 = vmul.f32 -1.442695, %v8149_v21 }
 0x122   : > { %v5716_v25 = vpop.eup %5715  ;;  %5741 = vrcp.f32 %v3236_v20  ;;  %v3237_v26 = vadd.f32 1.0, %v5714_v23  ;;  %v8155_v28 = vpop.f32.mrf.mxu0  ;;  %5044 = vmatmul.mubr.msk.f32.gmra.mxu0 %vm257_vm0, %v7871_v41  ;;  %5078 = vmatmul.mubr.msk.f32.gmra.mxu1 %vm257_vm0, %v7871_v41  ;;  %v5209_v41 = vmul.f32 -1.442695, %v8104_v36  ;;  %v5245_v16 = vmul.f32 -1.442695, %v8151_v22 }
 0x123   : > { %v8157_v31 = vpop.f32.mrf.mxu1  ;;  %v5718_v32 = vpop.eup %5717  ;;  %4422 = vst [vmem:[%s8164_s30] sm:$0xff] %v5716_v25  ;;  %5743 = vrcp.f32 %v3235_v24  ;;  %1100 = vmatprep.mubr.f32.mxu0 %v9388_v0  ;;  %1369 = vmatprep.mubr.f32.mxu1 %v9388_v0 }
 0x124   : > { %v5720_v30 = vpop.eup %5719  ;;  %4424 = vst [vmem:[%s8164_s30 + $0x10] sm:$0xff] %v5718_v32  ;;  %5745 = vrcp.f32 %v3237_v26  ;;  %v8172_v33 = vpop.f32.mrf.mxu0 }
 0x125   : > { %v8174_v34 = vpop.f32.mrf.mxu1  ;;  %v5722_v53 = vpop.eup %5721  ;;  %4423 = vst [vmem:[%s8164_s30 + $0x8] sm:$0xff] %v5720_v30  ;;  %5747 = vpow2.f32 %v5206_v40 }
 0x126   : > { %v5724_v35 = vpop.eup %5723  ;;  %4425 = vst [vmem:[%s8164_s30 + $0x18] sm:$0xff] %v5722_v53  ;;  %5749 = vpow2.f32 %v5208_v27  ;;  %v8180_v37 = vpop.f32.mrf.mxu0  ;;  %5045 = vmatmul.mubr.msk.f32.gmra.mxu0 %vm257_vm0, %v7880_v42  ;;  %5079 = vmatmul.mubr.msk.f32.gmra.mxu1 %vm257_vm0, %v7880_v42 }
 0x127   : > { %v8182_v58 = vpop.f32.mrf.mxu1  ;;  %v5726_v36 = vpop.eup %5725  ;;  %4435 = vst [vmem:[%s8164_s30 + $0x60] sm:$0xff] %v5724_v35  ;;  %5751 = vpow2.f32 %v5207_v29  ;;  %1106 = vmatprep.mubr.f32.mxu0 %v9388_v0  ;;  %1375 = vmatprep.mubr.f32.mxu1 %v9388_v0 }
 0x128   : > { %v5728_v57 = vpop.eup %5727  ;;  %4437 = vst [vmem:[%s8164_s30 + $0x70] sm:$0xff] %v5726_v36  ;;  %5753 = vpow2.f32 %v5209_v41  ;;  %v8194_v60 = vpop.f32.mrf.mxu0 }
 0x129   : > { %v8196_v61 = vpop.f32.mrf.mxu1  ;;  %v5730_v42 = vpop.eup %5729  ;;  %4436 = vst [vmem:[%s8164_s30 + $0x68] sm:$0xff] %v5728_v57  ;;  %5755 = vpow2.f32 %v5218_v54 }
 0x12a   : > { %v5732_v62 = vpop.eup %5731  ;;  %4438 = vst [vmem:[%s8164_s30 + $0x78] sm:$0xff] %v5730_v42  ;;  %5757 = vpow2.f32 %v5220_v55  ;;  %v8202_v38 = vpop.f32.mrf.mxu0  ;;  %5046 = vmatmul.mubr.msk.f32.gmra.mxu0 %vm257_vm0, %v7889_v43  ;;  %5080 = vmatmul.mubr.msk.f32.gmra.mxu1 %vm257_vm0, %v7889_v43 }
 0x12b   : > { %v8204_v3 = vpop.f32.mrf.mxu1  ;;  %v5734_v63 = vpop.eup %5733  ;;  %4447 = vst [vmem:[%s8164_s30 + $0xc0] sm:$0xff] %v5732_v62  ;;  %5759 = vpow2.f32 %v5219_v56  ;;  %1112 = vmatprep.mubr.f32.mxu0 %v9388_v0  ;;  %1381 = vmatprep.mubr.f32.mxu1 %v9388_v0 }
 0x12c   : > { %v5736_v5 = vpop.eup %5735  ;;  %4449 = vst [vmem:[%s8164_s30 + $0xd0] sm:$0xff] %v5734_v63  ;;  %5761 = vpow2.f32 %v5221_v59  ;;  %v8216_v7 = vpop.f32.mrf.mxu0 }
 0x12d   : > { %v8218_v8 = vpop.f32.mrf.mxu1  ;;  %v5738_v43 = vpop.eup %5737  ;;  %4448 = vst [vmem:[%s8164_s30 + $0xc8] sm:$0xff] %v5736_v5  ;;  %5763 = vpow2.f32 %v5230_v1 }
 0x12e   : > { %v5740_v10 = vpop.eup %5739  ;;  %4450 = vst [vmem:[%s8164_s30 + $0xd8] sm:$0xff] %v5738_v43  ;;  %5765 = vpow2.f32 %v5232_v2  ;;  %v8224_v39 = vpop.f32.mrf.mxu0  ;;  %5047 = vmatmul.mubr.msk.f32.gmra.mxu0 %vm257_vm0, %v7898_v44  ;;  %5081 = vmatmul.mubr.msk.f32.gmra.mxu1 %vm257_vm0, %v7898_v44 }
 0x12f   : > { %v8226_v13 = vpop.f32.mrf.mxu1  ;;  %v5742_v11 = vpop.eup %5741  ;;  %4459 = vst [vmem:[%s8164_s30 + $0x120] sm:$0xff] %v5740_v10  ;;  %5767 = vpow2.f32 %v5231_v4  ;;  %1118 = vmatprep.mubr.f32.mxu0 %v9388_v0  ;;  %1387 = vmatprep.mubr.f32.mxu1 %v9388_v0 }
 0x130   : > { %v5744_v15 = vpop.eup %5743  ;;  %4461 = vst [vmem:[%s8164_s30 + $0x130] sm:$0xff] %v5742_v11  ;;  %5769 = vpow2.f32 %v5233_v6  ;;  %v8238_v17 = vpop.f32.mrf.mxu0 }
 0x131   : > { %v8240_v18 = vpop.f32.mrf.mxu1  ;;  %v5746_v44 = vpop.eup %5745  ;;  %4460 = vst [vmem:[%s8164_s30 + $0x128] sm:$0xff] %v5744_v15  ;;  %5771 = vpow2.f32 %v5242_v9 }
 0x132   : > { %v5748_v19 = vpop.eup %5747  ;;  %4462 = vst [vmem:[%s8164_s30 + $0x138] sm:$0xff] %v5746_v44  ;;  %5773 = vpow2.f32 %v5244_v12  ;;  %v8244_v20 = vpop.f32.mrf.mxu0  ;;  %5048 = vmatmul.mubr.msk.f32.gmra.mxu0 %vm257_vm0, %v7907_v45  ;;  %5082 = vmatmul.mubr.msk.f32.gmra.mxu1 %vm257_vm0, %v7907_v45 }
 0x133   : > { %v8246_v21 = vpop.f32.mrf.mxu1  ;;  %v5750_v22 = vpop.eup %5749  ;;  %v3246_v23 = vadd.f32 1.0, %v5748_v19  ;;  %5775 = vpow2.f32 %v5243_v14  ;;  %1124 = vmatprep.mubr.f32.mxu0 %v9388_v0  ;;  %1393 = vmatprep.mubr.f32.mxu1 %v9388_v0 }
 0x134   : > { %v5752_v24 = vpop.eup %5751  ;;  %v3248_v40 = vadd.f32 1.0, %v5750_v22  ;;  %5777 = vpow2.f32 %v5245_v16  ;;  %v8254_v25 = vpop.f32.mrf.mxu0 }
 0x135   : > { %v8256_v26 = vpop.f32.mrf.mxu1  ;;  %v5754_v27 = vpop.eup %5753  ;;  %5779 = vrcp.f32 %v3246_v23  ;;  %v3247_v32 = vadd.f32 1.0, %v5752_v24 }
 0x136   : > { %v5756_v29 = vpop.eup %5755  ;;  %5781 = vrcp.f32 %v3248_v40  ;;  %v3249_v45 = vadd.f32 1.0, %v5754_v27  ;;  %v8258_v30 = vpop.f32.mrf.mxu0  ;;  %5049 = vmatmul.mubr.msk.f32.gmra.mxu0 %vm257_vm0, %v7916_v46  ;;  %5083 = vmatmul.mubr.msk.f32.gmra.mxu1 %vm257_vm0, %v7916_v46 }
 0x137   : > { %v8260_v41 = vpop.f32.mrf.mxu1  ;;  %v5758_v53 = vpop.eup %5757  ;;  %5783 = vrcp.f32 %v3247_v32  ;;  %v3258_v54 = vadd.f32 1.0, %v5756_v29  ;;  %1130 = vmatprep.mubr.f32.mxu0 %v9388_v0  ;;  %1399 = vmatprep.mubr.f32.mxu1 %v9388_v0  ;;  %v5256_v29 = vmul.f32 -1.442695, %v8157_v31 }
 0x138   : > { %v5760_v35 = vpop.eup %5759  ;;  %5785 = vrcp.f32 %v3249_v45  ;;  %v3260_v55 = vadd.f32 1.0, %v5758_v53  ;;  %v8268_v36 = vpop.f32.mrf.mxu0 }
 0x139   : > { %v8270_v56 = vpop.f32.mrf.mxu1  ;;  %v5762_v57 = vpop.eup %5761  ;;  %5787 = vrcp.f32 %v3258_v54  ;;  %v3259_v59 = vadd.f32 1.0, %v5760_v35  ;;  %v5257_v35 = vmul.f32 -1.442695, %v8174_v34 }
 0x13a   : > { %v5764_v42 = vpop.eup %5763  ;;  %5789 = vrcp.f32 %v3260_v55  ;;  %v3261_v46 = vadd.f32 1.0, %v5762_v57  ;;  %v8272_v1 = vpop.f32.mrf.mxu0  ;;  %5050 = vmatmul.mubr.msk.f32.gmra.mxu0 %vm257_vm0, %v7925_v47  ;;  %5084 = vmatmul.mubr.msk.f32.gmra.mxu1 %vm257_vm0, %v7925_v47 }
 0x13b   : > { %v8274_v62 = vpop.f32.mrf.mxu1  ;;  %v5766_v2 = vpop.eup %5765  ;;  %5791 = vrcp.f32 %v3259_v59  ;;  %v3270_v63 = vadd.f32 1.0, %v5764_v42  ;;  %1136 = vmatprep.mubr.f32.mxu0 %v9388_v0  ;;  %1405 = vmatprep.mubr.f32.mxu1 %v9388_v0  ;;  %v5266_v59 = vmul.f32 -1.442695, %v8180_v37  ;;  %v5268_v42 = vmul.f32 -1.442695, %v8182_v58 }
 0x13c   : > { %v5768_v4 = vpop.eup %5767  ;;  %5793 = vrcp.f32 %v3261_v46  ;;  %v3272_v5 = vadd.f32 1.0, %v5766_v2  ;;  %v8282_v6 = vpop.f32.mrf.mxu0  ;;  %v5267_v37 = vmul.f32 -1.442695, %v8194_v60 }
 0x13d   : > { %v8284_v43 = vpop.f32.mrf.mxu1  ;;  %v5770_v9 = vpop.eup %5769  ;;  %5795 = vrcp.f32 %v3270_v63  ;;  %v3271_v10 = vadd.f32 1.0, %v5768_v4  ;;  %v5269_v63 = vmul.f32 -1.442695, %v8196_v61 }
 0x13e   : > { %v5772_v12 = vpop.eup %5771  ;;  %5797 = vrcp.f32 %v3272_v5  ;;  %v3273_v47 = vadd.f32 1.0, %v5770_v9  ;;  %v8286_v11 = vpop.f32.mrf.mxu0  ;;  %5051 = vmatmul.mubr.msk.f32.gmra.mxu0 %vm257_vm0, %v7934_v48  ;;  %5085 = vmatmul.mubr.msk.f32.gmra.mxu1 %vm257_vm0, %v7934_v48  ;;  %v5254_v48 = vmul.f32 -1.442695, %v8155_v28  ;;  %v5255_v28 = vmul.f32 -1.442695, %v8172_v33 }
 0x13f   : > { %v8288_v14 = vpop.f32.mrf.mxu1  ;;  %v5774_v15 = vpop.eup %5773  ;;  %5799 = vrcp.f32 %v3271_v10  ;;  %v3282_v16 = vadd.f32 1.0, %v5772_v12  ;;  %1142 = vmatprep.mubr.f32.mxu0 %v9388_v0  ;;  %1411 = vmatprep.mubr.f32.mxu1 %v9388_v0  ;;  %v5278_v9 = vmul.f32 -1.442695, %v8202_v38  ;;  %v5280_v10 = vmul.f32 -1.442695, %v8204_v3 }
 0x140   : > { %v5776_v44 = vpop.eup %5775  ;;  %5801 = vrcp.f32 %v3273_v47  ;;  %v3284_v19 = vadd.f32 1.0, %v5774_v15  ;;  %v8296_v22 = vpop.f32.mrf.mxu0  ;;  %v5279_v38 = vmul.f32 -1.442695, %v8216_v7  ;;  %v5281_v15 = vmul.f32 -1.442695, %v8218_v8 }
 0x141   : > { %v8298_v23 = vpop.f32.mrf.mxu1  ;;  %v5778_v24 = vpop.eup %5777  ;;  %5803 = vrcp.f32 %v3282_v16  ;;  %v3283_v40 = vadd.f32 1.0, %v5776_v44 }
 0x142   : > { %v5780_v27 = vpop.eup %5779  ;;  %5805 = vrcp.f32 %v3284_v19  ;;  %v3285_v32 = vadd.f32 1.0, %v5778_v24  ;;  %v8302_v45 = vpop.f32.mrf.mxu0  ;;  %5052 = vmatmul.mubr.msk.f32.gmra.mxu0 %vm257_vm0, %v7943_v49  ;;  %5086 = vmatmul.mubr.msk.f32.gmra.mxu1 %vm257_vm0, %v7943_v49  ;;  %v5290_v19 = vmul.f32 -1.442695, %v8224_v39  ;;  %v5292_v24 = vmul.f32 -1.442695, %v8226_v13 }
 0x143   : > { %v8304_v53 = vpop.f32.mrf.mxu1  ;;  %v5782_v54 = vpop.eup %5781  ;;  %4471 = vst [vmem:[%s8164_s30 + $0x180] sm:$0xff] %v5780_v27  ;;  %5807 = vrcp.f32 %v3283_v40  ;;  %1148 = vmatprep.mubr.f32.mxu0 %v9388_v0  ;;  %1417 = vmatprep.mubr.f32.mxu1 %v9388_v0  ;;  %v5291_v39 = vmul.f32 -1.442695, %v8238_v17  ;;  %v5293_v27 = vmul.f32 -1.442695, %v8240_v18 }
 0x144   : > { %v5784_v31 = vpop.eup %5783  ;;  %4473 = vst [vmem:[%s8164_s30 + $0x190] sm:$0xff] %v5782_v54  ;;  %5809 = vrcp.f32 %v3285_v32  ;;  %v8316_v55 = vpop.f32.mrf.mxu0 }
 0x145   : > { %v8318_v57 = vpop.f32.mrf.mxu1  ;;  %v5786_v49 = vpop.eup %5785  ;;  %4472 = vst [vmem:[%s8164_s30 + $0x188] sm:$0xff] %v5784_v31  ;;  %5811 = vpow2.f32 %v5254_v48  ;;  %v7315_v31 = vld [vmem:[%s7655_s27] sm:$0xff] }
 0x146   : > { %v5788_v33 = vpop.eup %5787  ;;  %4474 = vst [vmem:[%s8164_s30 + $0x198] sm:$0xff] %v5786_v49  ;;  %5813 = vpow2.f32 %v5256_v29  ;;  %v8324_v46 = vpop.f32.mrf.mxu0  ;;  %5053 = vmatmul.mubr.msk.f32.gmra.mxu0 %vm257_vm0, %v7952_v50  ;;  %5087 = vmatmul.mubr.msk.f32.gmra.mxu1 %vm257_vm0, %v7952_v50 }
 0x147   : > { %v8326_v2 = vpop.f32.mrf.mxu1  ;;  %v5790_v34 = vpop.eup %5789  ;;  %4483 = vst [vmem:[%s8164_s30 + $0x1e0] sm:$0xff] %v5788_v33  ;;  %5815 = vpow2.f32 %v5255_v28  ;;  %1154 = vmatprep.mubr.f32.mxu0 %v9388_v0  ;;  %1423 = vmatprep.mubr.f32.mxu1 %v9388_v0 }
 0x148   : > { %v5792_v58 = vpop.eup %5791  ;;  %4485 = vst [vmem:[%s8164_s30 + $0x1f0] sm:$0xff] %v5790_v34  ;;  %5817 = vpow2.f32 %v5257_v35  ;;  %v8338_v4 = vpop.f32.mrf.mxu0 }
 0x149   : > { %v8340_v5 = vpop.f32.mrf.mxu1  ;;  %v5794_v50 = vpop.eup %5793  ;;  %4484 = vst [vmem:[%s8164_s30 + $0x1e8] sm:$0xff] %v5792_v58  ;;  %5819 = vpow2.f32 %v5266_v59 }
 0x14a   : > { %v5796_v60 = vpop.eup %5795  ;;  %4486 = vst [vmem:[%s8164_s30 + $0x1f8] sm:$0xff] %v5794_v50  ;;  %5821 = vpow2.f32 %v5268_v42  ;;  %v8346_v12 = vpop.f32.mrf.mxu0  ;;  %5054 = vmatmul.mubr.msk.f32.gmra.mxu0 %vm257_vm0, %v7961_v51  ;;  %5088 = vmatmul.mubr.msk.f32.gmra.mxu1 %vm257_vm0, %v7961_v51 }
 0x14b   : > { %v8348_v47 = vpop.f32.mrf.mxu1  ;;  %v5798_v61 = vpop.eup %5797  ;;  %4495 = vst [vmem:[%s8164_s30 + $0x240] sm:$0xff] %v5796_v60  ;;  %5823 = vpow2.f32 %v5267_v37  ;;  %1160 = vmatprep.mubr.f32.mxu0 %v9388_v0  ;;  %1429 = vmatprep.mubr.f32.mxu1 %v9388_v0  ;;  %v7316_v60 = vld [vmem:[%s7655_s27 + $0x8] sm:$0xff] }
 0x14c   : > { %v5800_v3 = vpop.eup %5799  ;;  %4497 = vst [vmem:[%s8164_s30 + $0x250] sm:$0xff] %v5798_v61  ;;  %5825 = vpow2.f32 %v5269_v63  ;;  %v8360_v16 = vpop.f32.mrf.mxu0 }
 0x14d   : > { %v8362_v44 = vpop.f32.mrf.mxu1  ;;  %v5802_v51 = vpop.eup %5801  ;;  %4496 = vst [vmem:[%s8164_s30 + $0x248] sm:$0xff] %v5800_v3  ;;  %5827 = vpow2.f32 %v5278_v9 }
 0x14e   : > { %v5804_v7 = vpop.eup %5803  ;;  %4498 = vst [vmem:[%s8164_s30 + $0x258] sm:$0xff] %v5802_v51  ;;  %5829 = vpow2.f32 %v5280_v10  ;;  %v8368_v40 = vpop.f32.mrf.mxu0  ;;  %5055 = vmatmul.mubr.msk.f32.gmra.mxu0 %vm257_vm0, %v7970_v52  ;;  %5089 = vmatmul.mubr.msk.f32.gmra.mxu1 %vm257_vm0, %v7970_v52 }
 0x14f   : > { %v8370_v48 = vpop.f32.mrf.mxu1  ;;  %v5806_v8 = vpop.eup %5805  ;;  %4507 = vst [vmem:[%s8164_s30 + $0x2a0] sm:$0xff] %v5804_v7  ;;  %5831 = vpow2.f32 %v5279_v38  ;;  %1500 = vmatprep.mubr.f32.mxu0 %v9388_v0  ;;  %1769 = vmatprep.mubr.f32.mxu1 %v9388_v0 }
 0x150   : > { %v5808_v13 = vpop.eup %5807  ;;  %4509 = vst [vmem:[%s8164_s30 + $0x2b0] sm:$0xff] %v5806_v8  ;;  %5833 = vpow2.f32 %v5281_v15  ;;  %v8382_v32 = vpop.f32.mrf.mxu0 }
 0x151   : > { %v8384_v29 = vpop.f32.mrf.mxu1  ;;  %v5810_v52 = vpop.eup %5809  ;;  %4508 = vst [vmem:[%s8164_s30 + $0x2a8] sm:$0xff] %v5808_v13  ;;  %5835 = vpow2.f32 %v5290_v19 }
 0x152   : > { %v5812_v54 = vpop.eup %5811  ;;  %4510 = vst [vmem:[%s8164_s30 + $0x2b8] sm:$0xff] %v5810_v52  ;;  %5837 = vpow2.f32 %v5292_v24  ;;  %v8388_v17 = vpop.f32.mrf.mxu0  ;;  %5090 = vmatmul.mubr.msk.f32.vlgmr.msra.gmra.mxu0 %vm257_vm0, %v7315_v31  ;;  %5124 = vmatmul.mubr.msk.f32.vlgmr.msra.gmra.mxu1 %vm257_vm0, %v7315_v31 }
 0x153   : > { %v8390_v28 = vpop.f32.mrf.mxu1  ;;  %v5814_v18 = vpop.eup %5813  ;;  %v3294_v35 = vadd.f32 1.0, %v5812_v54  ;;  %5839 = vpow2.f32 %v5291_v39  ;;  %1506 = vmatprep.mubr.f32.mxu0 %v9388_v0  ;;  %1775 = vmatprep.mubr.f32.mxu1 %v9388_v0 }
 0x154   : > { %v5816_v49 = vpop.eup %5815  ;;  %v3296_v59 = vadd.f32 1.0, %v5814_v18  ;;  %5841 = vpow2.f32 %v5293_v27  ;;  %v8397_v33 = vpop.f32.mrf.mxu0  ;;  %v7317_v27 = vld [vmem:[%s7655_s27 + $0x10] sm:$0xff] }
 0x155   : > { %v8399_v42 = vpop.f32.mrf.mxu1  ;;  %v5818_v34 = vpop.eup %5817  ;;  %5843 = vrcp.f32 %v3294_v35  ;;  %v3295_v37 = vadd.f32 1.0, %v5816_v49 }
 0x156   : > { %v5820_v58 = vpop.eup %5819  ;;  %5845 = vrcp.f32 %v3296_v59  ;;  %v3297_v63 = vadd.f32 1.0, %v5818_v34  ;;  %v8401_v50 = vpop.f32.mrf.mxu0  ;;  %5091 = vmatmul.mubr.msk.f32.gmra.mxu0 %vm257_vm0, %v7316_v60  ;;  %5125 = vmatmul.mubr.msk.f32.gmra.mxu1 %vm257_vm0, %v7316_v60 }
 0x157   : > { %v8403_v9 = vpop.f32.mrf.mxu1  ;;  %v5822_v10 = vpop.eup %5821  ;;  %5847 = vrcp.f32 %v3295_v37  ;;  %v3306_v61 = vadd.f32 1.0, %v5820_v58  ;;  %1512 = vmatprep.mubr.f32.mxu0 %v9388_v0  ;;  %1781 = vmatprep.mubr.f32.mxu1 %v9388_v0 }
 0x158   : > { %v5824_v38 = vpop.eup %5823  ;;  %5849 = vrcp.f32 %v3297_v63  ;;  %v3308_v3 = vadd.f32 1.0, %v5822_v10  ;;  %v8410_v15 = vpop.f32.mrf.mxu0  ;;  %v7318_v10 = vld [vmem:[%s7655_s27 + $0x18] sm:$0xff] }
 0x159   : > { %v8412_v51 = vpop.f32.mrf.mxu1  ;;  %v5826_v19 = vpop.eup %5825  ;;  %5851 = vrcp.f32 %v3306_v61  ;;  %v3307_v7 = vadd.f32 1.0, %v5824_v38 }
 0x15a   : > { %v5828_v24 = vpop.eup %5827  ;;  %5853 = vrcp.f32 %v3308_v3  ;;  %v3309_v8 = vadd.f32 1.0, %v5826_v19  ;;  %v8414_v39 = vpop.f32.mrf.mxu0  ;;  %5092 = vmatmul.mubr.msk.f32.gmra.mxu0 %vm257_vm0, %v7317_v27  ;;  %5126 = vmatmul.mubr.msk.f32.gmra.mxu1 %vm257_vm0, %v7317_v27 }
 0x15b   : > { %v8416_v13 = vpop.f32.mrf.mxu1  ;;  %v5830_v52 = vpop.eup %5829  ;;  %5855 = vrcp.f32 %v3307_v7  ;;  %v3318_v54 = vadd.f32 1.0, %v5828_v24  ;;  %1518 = vmatprep.mubr.f32.mxu0 %v9388_v0  ;;  %1787 = vmatprep.mubr.f32.mxu1 %v9388_v0 }
 0x15c   : > { %v5832_v31 = vpop.eup %5831  ;;  %5857 = vrcp.f32 %v3309_v8  ;;  %v3320_v18 = vadd.f32 1.0, %v5830_v52  ;;  %v8423_v35 = vpop.f32.mrf.mxu0  ;;  %v5302_v52 = vmul.f32 -1.442695, %v8244_v20  ;;  %v5303_v20 = vmul.f32 -1.442695, %v8254_v25 }
 0x15d   : > { %v8425_v49 = vpop.f32.mrf.mxu1  ;;  %v5834_v59 = vpop.eup %5833  ;;  %5859 = vrcp.f32 %v3318_v54  ;;  %v3319_v34 = vadd.f32 1.0, %v5832_v31  ;;  %v5314_v25 = vmul.f32 -1.442695, %v8258_v30  ;;  %v5315_v30 = vmul.f32 -1.442695, %v8268_v36 }
 0x15e   : > { %v5836_v37 = vpop.eup %5835  ;;  %5861 = vrcp.f32 %v3320_v18  ;;  %v3321_v58 = vadd.f32 1.0, %v5834_v59  ;;  %v8427_v63 = vpop.f32.mrf.mxu0  ;;  %5093 = vmatmul.mubr.msk.f32.gmra.mxu0 %vm257_vm0, %v7318_v10  ;;  %5127 = vmatmul.mubr.msk.f32.gmra.mxu1 %vm257_vm0, %v7318_v10  ;;  %v5304_v18 = vmul.f32 -1.442695, %v8246_v21  ;;  %v5305_v10 = vmul.f32 -1.442695, %v8256_v26  ;;  %v7320_v26 = vld [vmem:[%s7655_s27 + $0x28] sm:$0xff] }
 0x15f   : > { %v8429_v60 = vpop.f32.mrf.mxu1  ;;  %v5838_v61 = vpop.eup %5837  ;;  %5863 = vrcp.f32 %v3319_v34  ;;  %v3330_v38 = vadd.f32 1.0, %v5836_v37  ;;  %1524 = vmatprep.mubr.f32.mxu0 %v9388_v0  ;;  %1793 = vmatprep.mubr.f32.mxu1 %v9388_v0  ;;  %v7319_v37 = vld [vmem:[%s7655_s27 + $0x20] sm:$0xff]  ;;  %v5326_v36 = vmul.f32 -1.442695, %v8272_v1  ;;  %v5327_v1 = vmul.f32 -1.442695, %v8282_v6 }
 0x160   : > { %v5840_v3 = vpop.eup %5839  ;;  %5865 = vrcp.f32 %v3321_v58  ;;  %v3332_v19 = vadd.f32 1.0, %v5838_v61  ;;  %v8436_v7 = vpop.f32.mrf.mxu0  ;;  %v5338_v6 = vmul.f32 -1.442695, %v8286_v11  ;;  %v5339_v11 = vmul.f32 -1.442695, %v8296_v22 }
 0x161   : > { %v8438_v24 = vpop.f32.mrf.mxu1  ;;  %v5842_v8 = vpop.eup %5841  ;;  %5867 = vrcp.f32 %v3330_v38  ;;  %v3331_v27 = vadd.f32 1.0, %v5840_v3 }
 0x162   : > { %v5844_v54 = vpop.eup %5843  ;;  %5869 = vrcp.f32 %v3332_v19  ;;  %v3333_v31 = vadd.f32 1.0, %v5842_v8  ;;  %v8442_v59 = vpop.f32.mrf.mxu0  ;;  %5094 = vmatmul.mubr.msk.f32.gmra.mxu0 %vm257_vm0, %v7319_v37  ;;  %5128 = vmatmul.mubr.msk.f32.gmra.mxu1 %vm257_vm0, %v7319_v37  ;;  %v5316_v8 = vmul.f32 -1.442695, %v8260_v41 }
 0x163   : > { %v8444_v34 = vpop.f32.mrf.mxu1  ;;  %v5846_v58 = vpop.eup %5845  ;;  %4519 = vst [vmem:[%s8164_s30 + $0x300] sm:$0xff] %v5844_v54  ;;  %5871 = vrcp.f32 %v3331_v27  ;;  %1530 = vmatprep.mubr.f32.mxu0 %v9388_v0  ;;  %1799 = vmatprep.mubr.f32.mxu1 %v9388_v0 }
 0x164   : > { %v5848_v21 = vpop.eup %5847  ;;  %4521 = vst [vmem:[%s8164_s30 + $0x310] sm:$0xff] %v5846_v58  ;;  %5873 = vrcp.f32 %v3333_v31  ;;  %v8455_v61 = vpop.f32.mrf.mxu0 }
 0x165   : > { %v8457_v38 = vpop.f32.mrf.mxu1  ;;  %v5850_v3 = vpop.eup %5849  ;;  %4520 = vst [vmem:[%s8164_s30 + $0x308] sm:$0xff] %v5848_v21  ;;  %5875 = vpow2.f32 %v5302_v52  ;;  %v5317_v52 = vmul.f32 -1.442695, %v8270_v56  ;;  %v5328_v21 = vmul.f32 -1.442695, %v8274_v62  ;;  %v7321_v56 = vld [vmem:[%s7655_s27 + $0x30] sm:$0xff] }
 0x166   : > { %v5852_v19 = vpop.eup %5851  ;;  %4522 = vst [vmem:[%s8164_s30 + $0x318] sm:$0xff] %v5850_v3  ;;  %5877 = vpow2.f32 %v5304_v18  ;;  %v8463_v27 = vpop.f32.mrf.mxu0  ;;  %5095 = vmatmul.mubr.msk.f32.gmra.mxu0 %vm257_vm0, %v7320_v26  ;;  %5129 = vmatmul.mubr.msk.f32.gmra.mxu1 %vm257_vm0, %v7320_v26 }
 0x167   : > { %v8465_v54 = vpop.f32.mrf.mxu1  ;;  %v5854_v31 = vpop.eup %5853  ;;  %4531 = vst [vmem:[%s8164_s30 + $0x360] sm:$0xff] %v5852_v19  ;;  %5879 = vpow2.f32 %v5303_v20  ;;  %1536 = vmatprep.mubr.f32.mxu0 %v9388_v0  ;;  %1805 = vmatprep.mubr.f32.mxu1 %v9388_v0 }
 0x168   : > { %v5856_v41 = vpop.eup %5855  ;;  %4533 = vst [vmem:[%s8164_s30 + $0x370] sm:$0xff] %v5854_v31  ;;  %5881 = vpow2.f32 %v5305_v10  ;;  %v8476_v18 = vpop.f32.mrf.mxu0 }
 0x169   : > { %v8478_v37 = vpop.f32.mrf.mxu1  ;;  %v5858_v58 = vpop.eup %5857  ;;  %4532 = vst [vmem:[%s8164_s30 + $0x368] sm:$0xff] %v5856_v41  ;;  %5883 = vpow2.f32 %v5314_v25  ;;  %v5329_v25 = vmul.f32 -1.442695, %v8284_v43  ;;  %v5340_v41 = vmul.f32 -1.442695, %v8288_v14  ;;  %v7322_v43 = vld [vmem:[%s7655_s27 + $0x38] sm:$0xff] }
 0x16a   : > { %v5860_v20 = vpop.eup %5859  ;;  %4534 = vst [vmem:[%s8164_s30 + $0x378] sm:$0xff] %v5858_v58  ;;  %5885 = vpow2.f32 %v5316_v8  ;;  %v8484_v3 = vpop.f32.mrf.mxu0  ;;  %5096 = vmatmul.mubr.msk.f32.gmra.mxu0 %vm257_vm0, %v7321_v56  ;;  %5130 = vmatmul.mubr.msk.f32.gmra.mxu1 %vm257_vm0, %v7321_v56 }
 0x16b   : > { %v8486_v10 = vpop.f32.mrf.mxu1  ;;  %v5862_v19 = vpop.eup %5861  ;;  %4543 = vst [vmem:[%s8164_s30 + $0x3c0] sm:$0xff] %v5860_v20  ;;  %5887 = vpow2.f32 %v5315_v30  ;;  %1542 = vmatprep.mubr.f32.mxu0 %v9388_v0  ;;  %1811 = vmatprep.mubr.f32.mxu1 %v9388_v0 }
 0x16c   : > { %v5864_v62 = vpop.eup %5863  ;;  %4545 = vst [vmem:[%s8164_s30 + $0x3d0] sm:$0xff] %v5862_v19  ;;  %5889 = vpow2.f32 %v5317_v52  ;;  %v8497_v8 = vpop.f32.mrf.mxu0 }
 0x16d   : > { %v8499_v26 = vpop.f32.mrf.mxu1  ;;  %v5866_v31 = vpop.eup %5865  ;;  %4544 = vst [vmem:[%s8164_s30 + $0x3c8] sm:$0xff] %v5864_v62  ;;  %5891 = vpow2.f32 %v5326_v36  ;;  %v5341_v36 = vmul.f32 -1.442695, %v8298_v23 }
 0x16e   : > { %v5868_v30 = vpop.eup %5867  ;;  %4546 = vst [vmem:[%s8164_s30 + $0x3d8] sm:$0xff] %v5866_v31  ;;  %5893 = vpow2.f32 %v5328_v21  ;;  %v8505_v58 = vpop.f32.mrf.mxu0  ;;  %5097 = vmatmul.mubr.msk.f32.gmra.mxu0 %vm257_vm0, %v7322_v43  ;;  %5131 = vmatmul.mubr.msk.f32.gmra.mxu1 %vm257_vm0, %v7322_v43  ;;  %v7323_v31 = vld [vmem:[%s7655_s27 + $0x40] sm:$0xff] }
 0x16f   : > { %v8507_v52 = vpop.f32.mrf.mxu1  ;;  %v5870_v20 = vpop.eup %5869  ;;  %4555 = vst [vmem:[%s8164_s30 + $0x420] sm:$0xff] %v5868_v30  ;;  %5895 = vpow2.f32 %v5327_v1  ;;  %1548 = vmatprep.mubr.f32.mxu0 %v9388_v0  ;;  %1817 = vmatprep.mubr.f32.mxu1 %v9388_v0 }
 0x170   : > { %v5872_v14 = vpop.eup %5871  ;;  %4557 = vst [vmem:[%s8164_s30 + $0x430] sm:$0xff] %v5870_v20  ;;  %5897 = vpow2.f32 %v5329_v25  ;;  %v8518_v21 = vpop.f32.mrf.mxu0 }
 0x171   : > { %v8520_v56 = vpop.f32.mrf.mxu1  ;;  %v5874_v19 = vpop.eup %5873  ;;  %4556 = vst [vmem:[%s8164_s30 + $0x428] sm:$0xff] %v5872_v14  ;;  %5899 = vpow2.f32 %v5338_v6 }
 0x172   : > { %v5876_v1 = vpop.eup %5875  ;;  %4558 = vst [vmem:[%s8164_s30 + $0x438] sm:$0xff] %v5874_v19  ;;  %5901 = vpow2.f32 %v5340_v41  ;;  %v8524_v22 = vpop.f32.mrf.mxu0  ;;  %5098 = vmatmul.mubr.msk.f32.gmra.mxu0 %vm257_vm0, %v7323_v31  ;;  %5132 = vmatmul.mubr.msk.f32.gmra.mxu1 %vm257_vm0, %v7323_v31 }
 0x173   : > { %v8526_v62 = vpop.f32.mrf.mxu1  ;;  %v5878_v23 = vpop.eup %5877  ;;  %v3342_v25 = vadd.f32 1.0, %v5876_v1  ;;  %5903 = vpow2.f32 %v5339_v11  ;;  %1554 = vmatprep.mubr.f32.mxu0 %v9388_v0  ;;  %1823 = vmatprep.mubr.f32.mxu1 %v9388_v0 }
 0x174   : > { %9398 = vst [vmem:[#allocation11_spill] sm:$0xff] %v8526_v62  ;;  %v5880_v6 = vpop.eup %5879  ;;  %v3344_v30 = vadd.f32 1.0, %v5878_v23  ;;  %5905 = vpow2.f32 %v5341_v36  ;;  %v8533_v41 = vpop.f32.mrf.mxu0  ;;  %v7324_v62 = vld [vmem:[%s7655_s27 + $0x48] sm:$0xff] }
 0x175   : > { %9399 = vst [vmem:[#allocation12_spill] sm:$0xff] %v8533_v41  ;;  %v8535_v43 = vpop.f32.mrf.mxu1  ;;  %v5882_v20 = vpop.eup %5881  ;;  %5907 = vrcp.f32 %v3342_v25  ;;  %v3343_v14 = vadd.f32 1.0, %v5880_v6  ;;  %v7325_v41 = vld [vmem:[%s7655_s27 + $0x50] sm:$0xff] }
 0x176   : > { %9400 = vst [vmem:[#allocation13_spill] sm:$0xff] %v8535_v43  ;;  %v5884_v19 = vpop.eup %5883  ;;  %5909 = vrcp.f32 %v3344_v30  ;;  %v3345_v31 = vadd.f32 1.0, %v5882_v20  ;;  %v8537_v1 = vpop.f32.mrf.mxu0  ;;  %5099 = vmatmul.mubr.msk.f32.gmra.mxu0 %vm257_vm0, %v7324_v62  ;;  %5133 = vmatmul.mubr.msk.f32.gmra.mxu1 %vm257_vm0, %v7324_v62 }
 0x177   : > { %9401 = vst [vmem:[#allocation14_spill] sm:$0xff] %v8537_v1  ;;  %v8539_v11 = vpop.f32.mrf.mxu1  ;;  %v5886_v36 = vpop.eup %5885  ;;  %5911 = vrcp.f32 %v3343_v14  ;;  %v3354_v23 = vadd.f32 1.0, %v5884_v19  ;;  %1560 = vmatprep.mubr.f32.mxu0 %v9388_v0  ;;  %1829 = vmatprep.mubr.f32.mxu1 %v9388_v0 }
 0x178   : > { %9402 = vst [vmem:[#allocation15_spill] sm:$0xff] %v8539_v11  ;;  %v5888_v25 = vpop.eup %5887  ;;  %5913 = vrcp.f32 %v3345_v31  ;;  %v3356_v6 = vadd.f32 1.0, %v5886_v36  ;;  %v8546_v30 = vpop.f32.mrf.mxu0 }
 0x179   : > { %9403 = vst [vmem:[#allocation16_spill] sm:$0xff] %v8546_v30  ;;  %v8548_v20 = vpop.f32.mrf.mxu1  ;;  %v5890_v11 = vpop.eup %5889  ;;  %5915 = vrcp.f32 %v3354_v23  ;;  %v3355_v1 = vadd.f32 1.0, %v5888_v25  ;;  %v7326_v30 = vld [vmem:[%s7655_s27 + $0x58] sm:$0xff] }
 0x17a   : > { %9404 = vst [vmem:[#allocation17_spill] sm:$0xff] %v8548_v20  ;;  %v5892_v43 = vpop.eup %5891  ;;  %5917 = vrcp.f32 %v3356_v6  ;;  %v3357_v62 = vadd.f32 1.0, %v5890_v11  ;;  %v8550_v14 = vpop.f32.mrf.mxu0  ;;  %5100 = vmatmul.mubr.msk.f32.gmra.mxu0 %vm257_vm0, %v7325_v41  ;;  %5134 = vmatmul.mubr.msk.f32.gmra.mxu1 %vm257_vm0, %v7325_v41 }
 0x17b   : > { %9405 = vst [vmem:[#allocation18_spill] sm:$0xff] %v8550_v14  ;;  %v8552_v19 = vpop.f32.mrf.mxu1  ;;  %v5894_v31 = vpop.eup %5893  ;;  %5919 = vrcp.f32 %v3355_v1  ;;  %v3366_v36 = vadd.f32 1.0, %v5892_v43  ;;  %1566 = vmatprep.mubr.f32.mxu0 %v9388_v0  ;;  %1835 = vmatprep.mubr.f32.mxu1 %v9388_v0 }
 0x17c   : > { %9406 = vst [vmem:[#allocation19_spill] sm:$0xff] %v8552_v19  ;;  %v5896_v23 = vpop.eup %5895  ;;  %5921 = vrcp.f32 %v3357_v62  ;;  %v3368_v11 = vadd.f32 1.0, %v5894_v31  ;;  %v8559_v25 = vpop.f32.mrf.mxu0 }
 0x17d   : > { %v8561_v6 = vpop.f32.mrf.mxu1  ;;  %v5898_v19 = vpop.eup %5897  ;;  %5923 = vrcp.f32 %v3366_v36  ;;  %v3367_v14 = vadd.f32 1.0, %v5896_v23 }
 0x17e   : > { %9407 = vst [vmem:[#allocation20_spill] sm:$0xff] %v8561_v6  ;;  %v5900_v20 = vpop.eup %5899  ;;  %5925 = vrcp.f32 %v3368_v11  ;;  %v3369_v41 = vadd.f32 1.0, %v5898_v19  ;;  %v8563_v1 = vpop.f32.mrf.mxu0  ;;  %5101 = vmatmul.mubr.msk.f32.gmra.mxu0 %vm257_vm0, %v7326_v30  ;;  %5135 = vmatmul.mubr.msk.f32.gmra.mxu1 %vm257_vm0, %v7326_v30  ;;  %v5350_v30 = vmul.f32 -1.442695, %v8302_v45  ;;  %v5351_v45 = vmul.f32 -1.442695, %v8316_v55 }
 0x17f   : > { %9408 = vst [vmem:[#allocation21_spill] sm:$0xff] %v8563_v1  ;;  %v8565_v43 = vpop.f32.mrf.mxu1  ;;  %v5902_v62 = vpop.eup %5901  ;;  %5927 = vrcp.f32 %v3367_v14  ;;  %v3378_v31 = vadd.f32 1.0, %v5900_v20  ;;  %1572 = vmatprep.mubr.f32.mxu0 %v9388_v0  ;;  %1841 = vmatprep.mubr.f32.mxu1 %v9388_v0  ;;  %v5352_v0 = vmul.f32 -1.442695, %v8304_v53 }
 0x180   : > { %9409 = vst [vmem:[#allocation22_spill] sm:$0xff] %v8565_v43  ;;  %v5904_v36 = vpop.eup %5903  ;;  %5929 = vrcp.f32 %v3369_v41  ;;  %v3380_v19 = vadd.f32 1.0, %v5902_v62  ;;  %v8572_v23 = vpop.f32.mrf.mxu0  ;;  %v7327_v62 = vld [vmem:[%s7655_s27 + $0x60] sm:$0xff] }
 0x181   : > { %v8574_v11 = vpop.f32.mrf.mxu1  ;;  %v5906_v43 = vpop.eup %5905  ;;  %5931 = vrcp.f32 %v3378_v31  ;;  %v3379_v1 = vadd.f32 1.0, %v5904_v36  ;;  %v9411_v36 = vmov 0.0  }
 0x182   : > { %v5908_v14 = vpop.eup %5907  ;;  %5933 = vrcp.f32 %v3380_v19  ;;  %v3381_v20 = vadd.f32 1.0, %v5906_v43  ;;  %v8578_v6 = vpop.f32.mrf.mxu0  ;;  %5102 = vmatmul.mubr.msk.f32.gmra.mxu0 %vm257_vm0, %v7327_v62  ;;  %5136 = vmatmul.mubr.msk.f32.gmra.mxu1 %vm257_vm0, %v7327_v62  ;;  %v5353_v43 = vmul.f32 -1.442695, %v8318_v57  ;;  %v5362_v62 = vmul.f32 -1.442695, %v8324_v46 }
 0x183   : > { %v8580_v41 = vpop.f32.mrf.mxu1  ;;  %v5910_v31 = vpop.eup %5909  ;;  %4567 = vst [vmem:[%s8164_s30 + $0x480] sm:$0xff] %v5908_v14  ;;  %5935 = vrcp.f32 %v3379_v1  ;;  %1578 = vmatprep.mubr.f32.mxu0 %v9411_v36  ;;  %1847 = vmatprep.mubr.f32.mxu1 %v9411_v36  ;;  %v5364_v1 = vmul.f32 -1.442695, %v8326_v2  ;;  %v5363_v46 = vmul.f32 -1.442695, %v8338_v4 }
 0x184   : > { %9410 = vst [vmem:[#allocation23_spill] sm:$0xff] %v8580_v41  ;;  %v5912_v53 = vpop.eup %5911  ;;  %4569 = vst [vmem:[%s8164_s30 + $0x490] sm:$0xff] %v5910_v31  ;;  %5937 = vrcp.f32 %v3381_v20  ;;  %v8593_v14 = vpop.f32.mrf.mxu0  ;;  %v7328_v20 = vld [vmem:[%s7655_s27 + $0x68] sm:$0xff]  ;;  %v5365_v2 = vmul.f32 -1.442695, %v8340_v5 }
 0x185   : > { %v5914_v19 = vpop.eup %5913  ;;  %4568 = vst [vmem:[%s8164_s30 + $0x488] sm:$0xff] %v5912_v53  ;;  %5939 = vpow2.f32 %v5350_v30  ;;  %v8597_v41 = vpop.f32.mrf.mxu1  ;;  %v5374_v31 = vmul.f32 -1.442695, %v8346_v12  ;;  %v5375_v12 = vmul.f32 -1.442695, %v8360_v16 }
 0x186   : > { %v5916_v55 = vpop.eup %5915  ;;  %4570 = vst [vmem:[%s8164_s30 + $0x498] sm:$0xff] %v5914_v19  ;;  %5941 = vpow2.f32 %v5352_v0  ;;  %5103 = vmatmul.mubr.msk.f32.gmra.mxu0 %vm257_vm0, %v7328_v20  ;;  %5137 = vmatmul.mubr.msk.f32.gmra.mxu1 %vm257_vm0, %v7328_v20  ;;  %v8610_v53 = vpop.f32.mrf.mxu0 }
 0x187   : > { %v5918_v57 = vpop.eup %5917  ;;  %4579 = vst [vmem:[%s8164_s30 + $0x4e0] sm:$0xff] %v5916_v55  ;;  %5943 = vpow2.f32 %v5351_v45  ;;  %1584 = vmatprep.mubr.f32.mxu0 %v9411_v36  ;;  %1853 = vmatprep.mubr.f32.mxu1 %v9411_v36  ;;  %v5376_v45 = vmul.f32 -1.442695, %v8348_v47  ;;  %v8614_v19 = vpop.f32.mrf.mxu1 }
 0x188   : > { %v5920_v0 = vpop.eup %5919  ;;  %4581 = vst [vmem:[%s8164_s30 + $0x4f0] sm:$0xff] %v5918_v57  ;;  %5945 = vpow2.f32 %v5353_v43  ;;  %v7329_v43 = vld [vmem:[%s7655_s27 + $0x70] sm:$0xff]  ;;  %v8627_v20 = vpop.f32.mrf.mxu0  ;;  %v5388_v57 = vmul.f32 -1.442695, %v8370_v48 }
 0x189   : > { %v5922_v30 = vpop.eup %5921  ;;  %4580 = vst [vmem:[%s8164_s30 + $0x4e8] sm:$0xff] %v5920_v0  ;;  %5947 = vpow2.f32 %v5362_v62  ;;  %v5377_v62 = vmul.f32 -1.442695, %v8362_v44  ;;  %v7330_v0 = vld [vmem:[%s7655_s27 + $0x78] sm:$0xff] }
 0x18a   : > { %v5924_v4 = vpop.eup %5923  ;;  %4582 = vst [vmem:[%s8164_s30 + $0x4f8] sm:$0xff] %v5922_v30  ;;  %5949 = vpow2.f32 %v5364_v1  ;;  %5104 = vmatmul.mubr.msk.f32.gmra.mxu0 %vm257_vm0, %v7329_v43  ;;  %5138 = vmatmul.mubr.msk.f32.gmra.mxu1 %vm257_vm0, %v7329_v43  ;;  %v5386_v1 = vmul.f32 -1.442695, %v8368_v40  ;;  %v5387_v40 = vmul.f32 -1.442695, %v8382_v32  ;;  %v7331_v32 = vld [vmem:[%s7655_s27 + $0x80] sm:$0xff] }
 0x18b   : > { %v5926_v5 = vpop.eup %5925  ;;  %4591 = vst [vmem:[%s8164_s30 + $0x540] sm:$0xff] %v5924_v4  ;;  %5951 = vpow2.f32 %v5363_v46  ;;  %1590 = vmatprep.mubr.f32.mxu0 %v9411_v36  ;;  %1859 = vmatprep.mubr.f32.mxu1 %v9411_v36  ;;  %v8631_v46 = vpop.f32.mrf.mxu1 }
 0x18c   : > { %v5928_v47 = vpop.eup %5927  ;;  %4593 = vst [vmem:[%s8164_s30 + $0x550] sm:$0xff] %v5926_v5  ;;  %5953 = vpow2.f32 %v5365_v2  ;;  %v5389_v2 = vmul.f32 -1.442695, %v8384_v29 }
 0x18d   : > { %v5930_v55 = vpop.eup %5929  ;;  %4592 = vst [vmem:[%s8164_s30 + $0x548] sm:$0xff] %v5928_v47  ;;  %5955 = vpow2.f32 %v5374_v31  ;;  %v8643_v31 = vpop.f32.mrf.mxu0 }
 0x18e   : > { %v5932_v16 = vpop.eup %5931  ;;  %4594 = vst [vmem:[%s8164_s30 + $0x558] sm:$0xff] %v5930_v55  ;;  %5957 = vpow2.f32 %v5376_v45  ;;  %5105 = vmatmul.mubr.msk.f32.gmra.mxu0 %vm257_vm0, %v7330_v0  ;;  %5139 = vmatmul.mubr.msk.f32.gmra.mxu1 %vm257_vm0, %v7330_v0  ;;  %v8646_v45 = vpop.f32.mrf.mxu1  ;;  %v7332_v0 = vld [vmem:[%s7655_s27 + $0x88] sm:$0xff] }
 0x18f   : > { %v5934_v44 = vpop.eup %5933  ;;  %4603 = vst [vmem:[%s8164_s30 + $0x5a0] sm:$0xff] %v5932_v16  ;;  %5959 = vpow2.f32 %v5375_v12  ;;  %1596 = vmatprep.mubr.f32.mxu0 %v9411_v36  ;;  %1865 = vmatprep.mubr.f32.mxu1 %v9411_v36  ;;  %v8653_v55 = vpop.f32.mrf.mxu0 }
 0x190   : > { %v5936_v48 = vpop.eup %5935  ;;  %4605 = vst [vmem:[%s8164_s30 + $0x5b0] sm:$0xff] %v5934_v44  ;;  %5961 = vpow2.f32 %v5377_v62 }
 0x191   : > { %v5938_v30 = vpop.eup %5937  ;;  %4604 = vst [vmem:[%s8164_s30 + $0x5a8] sm:$0xff] %v5936_v48  ;;  %5963 = vpow2.f32 %v5386_v1 }
 0x192   : > { %v5940_v4 = vpop.eup %5939  ;;  %4606 = vst [vmem:[%s8164_s30 + $0x5b8] sm:$0xff] %v5938_v30  ;;  %5965 = vpow2.f32 %v5388_v57  ;;  %5106 = vmatmul.mubr.msk.f32.gmra.mxu0 %vm257_vm0, %v7331_v32  ;;  %5140 = vmatmul.mubr.msk.f32.gmra.mxu1 %vm257_vm0, %v7331_v32  ;;  %v8655_v57 = vpop.f32.mrf.mxu1 }
 0x193   : > { %v5942_v43 = vpop.eup %5941  ;;  %v3390_v5 = vadd.f32 1.0, %v5940_v4  ;;  %5967 = vpow2.f32 %v5387_v40  ;;  %1602 = vmatprep.mubr.f32.mxu0 %v9411_v36  ;;  %1871 = vmatprep.mubr.f32.mxu1 %v9411_v36  ;;  %v8662_v32 = vpop.f32.mrf.mxu0 }
 0x194   : > { %v5944_v29 = vpop.eup %5943  ;;  %v3392_v12 = vadd.f32 1.0, %v5942_v43  ;;  %5969 = vpow2.f32 %v5389_v2 }
 0x195   : > { %v5946_v47 = vpop.eup %5945  ;;  %5971 = vrcp.f32 %v3390_v5  ;;  %v3391_v62 = vadd.f32 1.0, %v5944_v29  ;;  %v8664_v29 = vpop.f32.mrf.mxu1 }
 0x196   : > { %v5948_v1 = vpop.eup %5947  ;;  %5973 = vrcp.f32 %v3392_v12  ;;  %v3393_v16 = vadd.f32 1.0, %v5946_v47  ;;  %5107 = vmatmul.mubr.msk.f32.gmra.mxu0 %vm257_vm0, %v7332_v0  ;;  %5141 = vmatmul.mubr.msk.f32.gmra.mxu1 %vm257_vm0, %v7332_v0  ;;  %v7333_v12 = vld [vmem:[%s7655_s27 + $0x90] sm:$0xff] }
 0x197   : > { %v5950_v44 = vpop.eup %5949  ;;  %5975 = vrcp.f32 %v3391_v62  ;;  %v3402_v40 = vadd.f32 1.0, %v5948_v1  ;;  %1608 = vmatprep.mubr.f32.mxu0 %v9411_v36  ;;  %1877 = vmatprep.mubr.f32.mxu1 %v9411_v36 }
 0x198   : > { %v5952_v48 = vpop.eup %5951  ;;  %5977 = vrcp.f32 %v3393_v16  ;;  %v3404_v2 = vadd.f32 1.0, %v5950_v44 }
 0x199   : > { %v5954_v30 = vpop.eup %5953  ;;  %5979 = vrcp.f32 %v3402_v40  ;;  %v3403_v4 = vadd.f32 1.0, %v5952_v48  ;;  %v8671_v40 = vpop.f32.mrf.mxu0 }
 0x19a   : > { %v5956_v43 = vpop.eup %5955  ;;  %5981 = vrcp.f32 %v3404_v2  ;;  %v3405_v5 = vadd.f32 1.0, %v5954_v30  ;;  %5108 = vmatmul.mubr.msk.f32.gmra.mxu0 %vm257_vm0, %v7333_v12  ;;  %5142 = vmatmul.mubr.msk.f32.gmra.mxu1 %vm257_vm0, %v7333_v12  ;;  %9412 = vst [vmem:[#allocation24_spill] sm:$0xff] %v8671_v40  ;;  %v8673_v30 = vpop.f32.mrf.mxu1  ;;  %v7334_v12 = vld [vmem:[%s7655_s27 + $0x98] sm:$0xff]  ;;  %v7335_v40 = vld [vmem:[%s7655_s27 + $0xa0] sm:$0xff] }
 0x19b   : > { %v5958_v47 = vpop.eup %5957  ;;  %5983 = vrcp.f32 %v3403_v4  ;;  %v3414_v62 = vadd.f32 1.0, %v5956_v43  ;;  %1614 = vmatprep.mubr.f32.mxu0 %v9411_v36  ;;  %1883 = vmatprep.mubr.f32.mxu1 %v9411_v36  ;;  %9413 = vst [vmem:[#allocation25_spill] sm:$0xff] %v8673_v30 }
 0x19c   : > { %v5960_v1 = vpop.eup %5959  ;;  %5985 = vrcp.f32 %v3405_v5  ;;  %v3416_v16 = vadd.f32 1.0, %v5958_v47  ;;  %v8684_v30 = vpop.f32.mrf.mxu1 }
 0x19d   : > { %v5962_v0 = vpop.eup %5961  ;;  %5987 = vrcp.f32 %v3414_v62  ;;  %v3415_v44 = vadd.f32 1.0, %v5960_v1 }
 0x19e   : > { %v5964_v48 = vpop.eup %5963  ;;  %5989 = vrcp.f32 %v3416_v16  ;;  %v3417_v2 = vadd.f32 1.0, %v5962_v0  ;;  %5109 = vmatmul.mubr.msk.f32.gmra.mxu0 %vm257_vm0, %v7334_v12  ;;  %5143 = vmatmul.mubr.msk.f32.gmra.mxu1 %vm257_vm0, %v7334_v12  ;;  %v5398_v16 = vmul.f32 -1.442695, %v8388_v17  ;;  %v8681_v0 = vpop.f32.mrf.mxu0  ;;  %v5399_v17 = vmul.f32 -1.442695, %v8397_v33 }
 0x19f   : > { %v5966_v4 = vpop.eup %5965  ;;  %5991 = vrcp.f32 %v3415_v44  ;;  %v3426_v43 = vadd.f32 1.0, %v5964_v48  ;;  %1620 = vmatprep.mubr.f32.mxu0 %v9411_v36  ;;  %1889 = vmatprep.mubr.f32.mxu1 %v9411_v36  ;;  %v5400_v48 = vmul.f32 -1.442695, %v8390_v28 }
 0x1a0   : > { %v5968_v5 = vpop.eup %5967  ;;  %5993 = vrcp.f32 %v3417_v2  ;;  %v3428_v47 = vadd.f32 1.0, %v5966_v4  ;;  %v5401_v4 = vmul.f32 -1.442695, %v8399_v42 }
 0x1a1   : > { %v5970_v62 = vpop.eup %5969  ;;  %5995 = vrcp.f32 %v3426_v43  ;;  %v3427_v1 = vadd.f32 1.0, %v5968_v5  ;;  %v8697_v5 = vpop.f32.mrf.mxu0 }
 0x1a2   : > { %v5972_v12 = vpop.eup %5971  ;;  %5997 = vrcp.f32 %v3428_v47  ;;  %v3429_v44 = vadd.f32 1.0, %v5970_v62  ;;  %5110 = vmatmul.mubr.msk.f32.gmra.mxu0 %vm257_vm0, %v7335_v40  ;;  %5144 = vmatmul.mubr.msk.f32.gmra.mxu1 %vm257_vm0, %v7335_v40  ;;  %v5410_v40 = vmul.f32 -1.442695, %v8401_v50  ;;  %v5412_v47 = vmul.f32 -1.442695, %v8403_v9  ;;  %v8701_v62 = vpop.f32.mrf.mxu1 }
 0x1a3   : > { %v5974_v2 = vpop.eup %5973  ;;  %4615 = vst [vmem:[%s8164_s30 + $0x600] sm:$0xff] %v5972_v12  ;;  %5999 = vrcp.f32 %v3427_v1  ;;  %1626 = vmatprep.mubr.f32.mxu0 %v9411_v36  ;;  %1895 = vmatprep.mubr.f32.mxu1 %v9411_v36  ;;  %v7336_v1 = vld [vmem:[%s7655_s27 + $0xa8] sm:$0xff]  ;;  %v5411_v50 = vmul.f32 -1.442695, %v8410_v15 }
 0x1a4   : > { %v5976_v28 = vpop.eup %5975  ;;  %4617 = vst [vmem:[%s8164_s30 + $0x610] sm:$0xff] %v5974_v2  ;;  %6001 = vrcp.f32 %v3429_v44  ;;  %v5422_v44 = vmul.f32 -1.442695, %v8414_v39  ;;  %v5424_v2 = vmul.f32 -1.442695, %v8416_v13 }
 0x1a5   : > { %v5978_v43 = vpop.eup %5977  ;;  %4616 = vst [vmem:[%s8164_s30 + $0x608] sm:$0xff] %v5976_v28  ;;  %6003 = vpow2.f32 %v5398_v16  ;;  %v5413_v16 = vmul.f32 -1.442695, %v8412_v51  ;;  %v7337_v28 = vld [vmem:[%s7655_s27 + $0xb0] sm:$0xff]  ;;  %v5423_v39 = vmul.f32 -1.442695, %v8423_v35 }
 0x1a6   : > { %v5980_v33 = vpop.eup %5979  ;;  %4618 = vst [vmem:[%s8164_s30 + $0x618] sm:$0xff] %v5978_v43  ;;  %6005 = vpow2.f32 %v5400_v48  ;;  %5111 = vmatmul.mubr.msk.f32.gmra.mxu0 %vm257_vm0, %v7336_v1  ;;  %5145 = vmatmul.mubr.msk.f32.gmra.mxu1 %vm257_vm0, %v7336_v1  ;;  %v8714_v48 = vpop.f32.mrf.mxu0 }
 0x1a7   : > { %v5982_v42 = vpop.eup %5981  ;;  %4627 = vst [vmem:[%s8164_s30 + $0x660] sm:$0xff] %v5980_v33  ;;  %6007 = vpow2.f32 %v5399_v17  ;;  %1632 = vmatprep.mubr.f32.mxu0 %v9411_v36  ;;  %1901 = vmatprep.mubr.f32.mxu1 %v9411_v36  ;;  %v8718_v17 = vpop.f32.mrf.mxu1 }
 0x1a8   : > { %v5984_v9 = vpop.eup %5983  ;;  %4629 = vst [vmem:[%s8164_s30 + $0x670] sm:$0xff] %v5982_v42  ;;  %6009 = vpow2.f32 %v5401_v4  ;;  %v5425_v4 = vmul.f32 -1.442695, %v8425_v49  ;;  %v8731_v33 = vpop.f32.mrf.mxu0  ;;  %v7338_v42 = vld [vmem:[%s7655_s27 + $0xb8] sm:$0xff] }
 0x1a9   : > { %v5986_v12 = vpop.eup %5985  ;;  %4628 = vst [vmem:[%s8164_s30 + $0x668] sm:$0xff] %v5984_v9  ;;  %6011 = vpow2.f32 %v5410_v40  ;;  %v5434_v40 = vmul.f32 -1.442695, %v8427_v63  ;;  %v8735_v1 = vpop.f32.mrf.mxu1  ;;  %v5435_v63 = vmul.f32 -1.442695, %v8436_v7  ;;  %v7339_v7 = vld [vmem:[%s7655_s27 + $0xc0] sm:$0xff] }
 0x1aa   : > { %v5988_v15 = vpop.eup %5987  ;;  %4630 = vst [vmem:[%s8164_s30 + $0x678] sm:$0xff] %v5986_v12  ;;  %6013 = vpow2.f32 %v5412_v47  ;;  %5112 = vmatmul.mubr.msk.f32.gmra.mxu0 %vm257_vm0, %v7337_v28  ;;  %5146 = vmatmul.mubr.msk.f32.gmra.mxu1 %vm257_vm0, %v7337_v28  ;;  %v5436_v47 = vmul.f32 -1.442695, %v8429_v60 }
 0x1ab   : > { %v5990_v51 = vpop.eup %5989  ;;  %4639 = vst [vmem:[%s8164_s30 + $0x6c0] sm:$0xff] %v5988_v15  ;;  %6015 = vpow2.f32 %v5411_v50  ;;  %1638 = vmatprep.mubr.f32.mxu0 %v9411_v36  ;;  %1907 = vmatprep.mubr.f32.mxu1 %v9411_v36  ;;  %v5437_v50 = vmul.f32 -1.442695, %v8438_v24 }
 0x1ac   : > { %v5992_v13 = vpop.eup %5991  ;;  %4641 = vst [vmem:[%s8164_s30 + $0x6d0] sm:$0xff] %v5990_v51  ;;  %6017 = vpow2.f32 %v5413_v16  ;;  %v8747_v16 = vpop.f32.mrf.mxu0 }
 0x1ad   : > { %v5994_v43 = vpop.eup %5993  ;;  %4640 = vst [vmem:[%s8164_s30 + $0x6c8] sm:$0xff] %v5992_v13  ;;  %6019 = vpow2.f32 %v5422_v44  ;;  %v8750_v44 = vpop.f32.mrf.mxu1 }
 0x1ae   : > { %v5996_v35 = vpop.eup %5995  ;;  %4642 = vst [vmem:[%s8164_s30 + $0x6d8] sm:$0xff] %v5994_v43  ;;  %6021 = vpow2.f32 %v5424_v2  ;;  %5113 = vmatmul.mubr.msk.f32.gmra.mxu0 %vm257_vm0, %v7338_v42  ;;  %5147 = vmatmul.mubr.msk.f32.gmra.mxu1 %vm257_vm0, %v7338_v42  ;;  %v8757_v13 = vpop.f32.mrf.mxu0 }
 0x1af   : > { %v5998_v49 = vpop.eup %5997  ;;  %4651 = vst [vmem:[%s8164_s30 + $0x720] sm:$0xff] %v5996_v35  ;;  %6023 = vpow2.f32 %v5423_v39  ;;  %1644 = vmatprep.mubr.f32.mxu0 %v9411_v36  ;;  %1913 = vmatprep.mubr.f32.mxu1 %v9411_v36  ;;  %v7340_v35 = vld [vmem:[%s7655_s27 + $0xc8] sm:$0xff] }
 0x1b0   : > { %v6000_v60 = vpop.eup %5999  ;;  %4653 = vst [vmem:[%s8164_s30 + $0x730] sm:$0xff] %v5998_v49  ;;  %6025 = vpow2.f32 %v5425_v4 }
 0x1b1   : > { %v6002_v9 = vpop.eup %6001  ;;  %4652 = vst [vmem:[%s8164_s30 + $0x728] sm:$0xff] %v6000_v60  ;;  %6027 = vpow2.f32 %v5434_v40  ;;  %v8759_v40 = vpop.f32.mrf.mxu1 }
 0x1b2   : > { %v6004_v12 = vpop.eup %6003  ;;  %4654 = vst [vmem:[%s8164_s30 + $0x738] sm:$0xff] %v6002_v9  ;;  %6029 = vpow2.f32 %v5436_v47  ;;  %5114 = vmatmul.mubr.msk.f32.gmra.mxu0 %vm257_vm0, %v7339_v7  ;;  %5148 = vmatmul.mubr.msk.f32.gmra.mxu1 %vm257_vm0, %v7339_v7  ;;  %v8766_v9 = vpop.f32.mrf.mxu0 }
 0x1b3   : > { %v6006_v15 = vpop.eup %6005  ;;  %v3438_v2 = vadd.f32 1.0, %v6004_v12  ;;  %6031 = vpow2.f32 %v5435_v63  ;;  %1650 = vmatprep.mubr.f32.mxu0 %v9411_v36  ;;  %1919 = vmatprep.mubr.f32.mxu1 %v9411_v36 }
 0x1b4   : > { %v6008_v24 = vpop.eup %6007  ;;  %v3440_v28 = vadd.f32 1.0, %v6006_v15  ;;  %6033 = vpow2.f32 %v5437_v50  ;;  %v8768_v15 = vpop.f32.mrf.mxu1 }
 0x1b5   : > { %v6010_v51 = vpop.eup %6009  ;;  %6035 = vrcp.f32 %v3438_v2  ;;  %v3439_v39 = vadd.f32 1.0, %v6008_v24  ;;  %v7341_v2 = vld [vmem:[%s7655_s27 + $0xd0] sm:$0xff] }
 0x1b6   : > { %v6012_v4 = vpop.eup %6011  ;;  %6037 = vrcp.f32 %v3440_v28  ;;  %v3441_v43 = vadd.f32 1.0, %v6010_v51  ;;  %5115 = vmatmul.mubr.msk.f32.gmra.mxu0 %vm257_vm0, %v7340_v35  ;;  %5149 = vmatmul.mubr.msk.f32.gmra.mxu1 %vm257_vm0, %v7340_v35  ;;  %v8775_v35 = vpop.f32.mrf.mxu0 }
 0x1b7   : > { %v6014_v47 = vpop.eup %6013  ;;  %6039 = vrcp.f32 %v3439_v39  ;;  %v3450_v42 = vadd.f32 1.0, %v6012_v4  ;;  %1656 = vmatprep.mubr.f32.mxu0 %v9411_v36  ;;  %1925 = vmatprep.mubr.f32.mxu1 %v9411_v36 }
 0x1b8   : > { %v6016_v49 = vpop.eup %6015  ;;  %6041 = vrcp.f32 %v3441_v43  ;;  %v3452_v63 = vadd.f32 1.0, %v6014_v47 }
 0x1b9   : > { %v6018_v60 = vpop.eup %6017  ;;  %6043 = vrcp.f32 %v3450_v42  ;;  %v3451_v50 = vadd.f32 1.0, %v6016_v49  ;;  %v8777_v49 = vpop.f32.mrf.mxu1 }
 0x1ba   : > { %v6020_v12 = vpop.eup %6019  ;;  %6045 = vrcp.f32 %v3452_v63  ;;  %v3453_v7 = vadd.f32 1.0, %v6018_v60  ;;  %5116 = vmatmul.mubr.msk.f32.gmra.mxu0 %vm257_vm0, %v7341_v2  ;;  %5150 = vmatmul.mubr.msk.f32.gmra.mxu1 %vm257_vm0, %v7341_v2  ;;  %v7342_v63 = vld [vmem:[%s7655_s27 + $0xd8] sm:$0xff] }
 0x1bb   : > { %v6022_v24 = vpop.eup %6021  ;;  %6047 = vrcp.f32 %v3451_v50  ;;  %v3462_v28 = vadd.f32 1.0, %v6020_v12  ;;  %1662 = vmatprep.mubr.f32.mxu0 %v9411_v36  ;;  %1931 = vmatprep.mubr.f32.mxu1 %v9411_v36 }
 0x1bc   : > { %v6024_v51 = vpop.eup %6023  ;;  %6049 = vrcp.f32 %v3453_v7  ;;  %v3464_v39 = vadd.f32 1.0, %v6022_v24 }
 0x1bd   : > { %v6026_v4 = vpop.eup %6025  ;;  %6051 = vrcp.f32 %v3462_v28  ;;  %v3463_v43 = vadd.f32 1.0, %v6024_v51  ;;  %v5446_v28 = vmul.f32 -1.442695, %v8442_v59  ;;  %v8785_v51 = vpop.f32.mrf.mxu0  ;;  %v5449_v59 = vmul.f32 -1.442695, %v8457_v38 }
 0x1be   : > { %v6028_v47 = vpop.eup %6027  ;;  %6053 = vrcp.f32 %v3464_v39  ;;  %v3465_v42 = vadd.f32 1.0, %v6026_v4  ;;  %5117 = vmatmul.mubr.msk.f32.gmra.mxu0 %vm257_vm0, %v7342_v63  ;;  %5151 = vmatmul.mubr.msk.f32.gmra.mxu1 %vm257_vm0, %v7342_v63  ;;  %v5460_v38 = vmul.f32 -1.442695, %v8465_v54  ;;  %v5461_v54 = vmul.f32 -1.442695, %v8478_v37 }
 0x1bf   : > { %v6030_v60 = vpop.eup %6029  ;;  %6055 = vrcp.f32 %v3463_v43  ;;  %v3474_v50 = vadd.f32 1.0, %v6028_v47  ;;  %1668 = vmatprep.mubr.f32.mxu0 %v9411_v36  ;;  %1937 = vmatprep.mubr.f32.mxu1 %v9411_v36  ;;  %v5448_v43 = vmul.f32 -1.442695, %v8444_v34  ;;  %v8788_v47 = vpop.f32.mrf.mxu1  ;;  %v5458_v34 = vmul.f32 -1.442695, %v8463_v27 }
 0x1c0   : > { %v6032_v12 = vpop.eup %6031  ;;  %6057 = vrcp.f32 %v3465_v42  ;;  %v3476_v7 = vadd.f32 1.0, %v6030_v60  ;;  %v5447_v42 = vmul.f32 -1.442695, %v8455_v61  ;;  %v5472_v37 = vmul.f32 -1.442695, %v8486_v10 }
 0x1c1   : > { %v6034_v2 = vpop.eup %6033  ;;  %6059 = vrcp.f32 %v3474_v50  ;;  %v3475_v24 = vadd.f32 1.0, %v6032_v12  ;;  %v8796_v12 = vpop.f32.mrf.mxu0  ;;  %v5473_v10 = vmul.f32 -1.442695, %v8499_v26  ;;  %v5484_v26 = vmul.f32 -1.442695, %v8507_v52 }
 0x1c2   : > { %v6036_v39 = vpop.eup %6035  ;;  %6061 = vrcp.f32 %v3476_v7  ;;  %v3477_v4 = vadd.f32 1.0, %v6034_v2  ;;  %v8798_v7 = vpop.f32.mrf.mxu1  ;;  %v7343_v2 = vld [vmem:[%s7655_s27 + $0xe0] sm:$0xff]  ;;  %v5485_v52 = vmul.f32 -1.442695, %v8520_v56 }
 0x1c3   : > { %v6038_v63 = vpop.eup %6037  ;;  %4663 = vst [vmem:[%s8164_s30 + $0x780] sm:$0xff] %v6036_v39  ;;  %6063 = vrcp.f32 %v3475_v24  ;;  %5118 = vmatmul.mubr.msk.f32.gmra.mxu0 %vm257_vm0, %v7343_v2  ;;  %5152 = vmatmul.mubr.msk.f32.gmra.mxu1 %vm257_vm0, %v7343_v2  ;;  %v5459_v24 = vmul.f32 -1.442695, %v8476_v18  ;;  %v7344_v18 = vld [vmem:[%s7655_s27 + $0xe8] sm:$0xff] }
 0x1c4   : > { %v6040_v60 = vpop.eup %6039  ;;  %4665 = vst [vmem:[%s8164_s30 + $0x790] sm:$0xff] %v6038_v63  ;;  %6065 = vrcp.f32 %v3477_v4  ;;  %1674 = vmatprep.mubr.f32.mxu0 %v9411_v36  ;;  %1943 = vmatprep.mubr.f32.mxu1 %v9411_v36  ;;  %v8811_v39 = vpop.f32.mrf.mxu1  ;;  %v5470_v63 = vmul.f32 -1.442695, %v8484_v3 }
 0x1c5   : > { %v6042_v50 = vpop.eup %6041  ;;  %4664 = vst [vmem:[%s8164_s30 + $0x788] sm:$0xff] %v6040_v60  ;;  %6067 = vpow2.f32 %v5446_v28  ;;  %v8809_v28 = vpop.f32.mrf.mxu0 }
 0x1c6   : > { %v6044_v61 = vpop.eup %6043  ;;  %4666 = vst [vmem:[%s8164_s30 + $0x798] sm:$0xff] %v6042_v50  ;;  %6069 = vpow2.f32 %v5448_v43 }
 0x1c7   : > { %v6046_v27 = vpop.eup %6045  ;;  %4675 = vst [vmem:[%s8164_s30 + $0x7e0] sm:$0xff] %v6044_v61  ;;  %6071 = vpow2.f32 %v5447_v42  ;;  %v8817_v60 = vpop.f32.mrf.mxu0  ;;  %5119 = vmatmul.mubr.msk.f32.gmra.mxu0 %vm257_vm0, %v7344_v18 }
 0x1c8   : > { %v6048_v4 = vpop.eup %6047  ;;  %4677 = vst [vmem:[%s8164_s30 + $0x7f0] sm:$0xff] %v6046_v27  ;;  %6073 = vpow2.f32 %v5449_v59  ;;  %v8819_v42 = vpop.f32.mrf.mxu1  ;;  %5153 = vmatmul.mubr.msk.f32.gmra.mxu1 %vm257_vm0, %v7344_v18  ;;  %1680 = vmatprep.mubr.f32.mxu0 %v9411_v36  ;;  %v5471_v59 = vmul.f32 -1.442695, %v8497_v8  ;;  %v5482_v27 = vmul.f32 -1.442695, %v8505_v58  ;;  %v7345_v8 = vld [vmem:[%s7655_s27 + $0xf0] sm:$0xff] }
 0x1c9   : > { %v6050_v43 = vpop.eup %6049  ;;  %4676 = vst [vmem:[%s8164_s30 + $0x7e8] sm:$0xff] %v6048_v4  ;;  %6075 = vpow2.f32 %v5458_v34  ;;  %1949 = vmatprep.mubr.f32.mxu1 %v9411_v36  ;;  %v8830_v34 = vpop.f32.mrf.mxu0 }
 0x1ca   : > { %v6052_v50 = vpop.eup %6051  ;;  %4678 = vst [vmem:[%s8164_s30 + $0x7f8] sm:$0xff] %v6050_v43  ;;  %6077 = vpow2.f32 %v5460_v38  ;;  %v8832_v2 = vpop.f32.mrf.mxu1 }
 0x1cb   : > { %v6054_v3 = vpop.eup %6053  ;;  %4687 = vst [vmem:[%s8164_s30 + $0x840] sm:$0xff] %v6052_v50  ;;  %6079 = vpow2.f32 %v5459_v24  ;;  %v8838_v4 = vpop.f32.mrf.mxu0  ;;  %5120 = vmatmul.mubr.msk.f32.gmra.mxu0 %vm257_vm0, %v7345_v8 }
 0x1cc   : > { %v6056_v61 = vpop.eup %6055  ;;  %4689 = vst [vmem:[%s8164_s30 + $0x850] sm:$0xff] %v6054_v3  ;;  %6081 = vpow2.f32 %v5461_v54  ;;  %v8840_v24 = vpop.f32.mrf.mxu1  ;;  %5154 = vmatmul.mubr.msk.f32.gmra.mxu1 %vm257_vm0, %v7345_v8  ;;  %1686 = vmatprep.mubr.f32.mxu0 %v9411_v36  ;;  %v5483_v54 = vmul.f32 -1.442695, %v8518_v21 }
 0x1cd   : > { %v6058_v38 = vpop.eup %6057  ;;  %4688 = vst [vmem:[%s8164_s30 + $0x848] sm:$0xff] %v6056_v61  ;;  %6083 = vpow2.f32 %v5470_v63  ;;  %1955 = vmatprep.mubr.f32.mxu1 %v9411_v36  ;;  %v8851_v63 = vpop.f32.mrf.mxu0 }
 0x1ce   : > { %v6060_v43 = vpop.eup %6059  ;;  %4690 = vst [vmem:[%s8164_s30 + $0x858] sm:$0xff] %v6058_v38  ;;  %6085 = vpow2.f32 %v5472_v37  ;;  %v8853_v18 = vpop.f32.mrf.mxu1 }
 0x1cf   : > { %v6062_v58 = vpop.eup %6061  ;;  %4699 = vst [vmem:[%s8164_s30 + $0x8a0] sm:$0xff] %v6060_v43  ;;  %6087 = vpow2.f32 %v5471_v59  ;;  %9414 = vst [vmem:[#allocation26_spill] sm:$0xff] %v8853_v18  ;;  %v8858_v3 = vpop.f32.mrf.mxu0  ;;  %v7346_v59 = vld [vmem:[%s7655_s27 + $0xf8] sm:$0xff] }
 0x1d0   : > { %v6064_v50 = vpop.eup %6063  ;;  %4701 = vst [vmem:[%s8164_s30 + $0x8b0] sm:$0xff] %v6062_v58  ;;  %6089 = vpow2.f32 %v5473_v10  ;;  %9415 = vst [vmem:[#allocation27_spill] sm:$0xff] %v8858_v3  ;;  %v8860_v61 = vpop.f32.mrf.mxu1  ;;  %5121 = vmatmul.mubr.msk.f32.gmra.mxu0 %vm257_vm0, %v7346_v59  ;;  %5155 = vmatmul.mubr.msk.f32.gmra.mxu1 %vm257_vm0, %v7346_v59 }
 0x1d1   : > { %v6066_v37 = vpop.eup %6065  ;;  %4700 = vst [vmem:[%s8164_s30 + $0x8a8] sm:$0xff] %v6064_v50  ;;  %6091 = vpow2.f32 %v5482_v27  ;;  %9416 = vst [vmem:[#allocation28_spill] sm:$0xff] %v8860_v61  ;;  %1692 = vmatprep.mubr.f32.mxu0 %v9411_v36  ;;  %1961 = vmatprep.mubr.f32.mxu1 %v9411_v36 }
 0x1d2   : > { %v6068_v21 = vpop.eup %6067  ;;  %4702 = vst [vmem:[%s8164_s30 + $0x8b8] sm:$0xff] %v6066_v37  ;;  %6093 = vpow2.f32 %v5484_v26 }
 0x1d3   : > { %v6070_v56 = vpop.eup %6069  ;;  %v3486_v10 = vadd.f32 1.0, %v6068_v21  ;;  %6095 = vpow2.f32 %v5483_v54 }
 0x1d4   : > { %v6072_v38 = vpop.eup %6071  ;;  %v3488_v27 = vadd.f32 1.0, %v6070_v56  ;;  %6097 = vpow2.f32 %v5485_v52 }
 0x1d5   : > { %v6074_v8 = vpop.eup %6073  ;;  %6099 = vrcp.f32 %v3486_v10  ;;  %v3487_v43 = vadd.f32 1.0, %v6072_v38 }
 0x1d6   : > { %v6076_v58 = vpop.eup %6075  ;;  %6101 = vrcp.f32 %v3488_v27  ;;  %v3489_v50 = vadd.f32 1.0, %v6074_v8 }
 0x1d7   : > { %v6078_v59 = vpop.eup %6077  ;;  %6103 = vrcp.f32 %v3487_v43  ;;  %v3498_v37 = vadd.f32 1.0, %v6076_v58 }
 0x1d8   : > { %v6080_v26 = vpop.eup %6079  ;;  %6105 = vrcp.f32 %v3489_v50  ;;  %v3500_v61 = vadd.f32 1.0, %v6078_v59 }
 0x1d9   : > { %v6082_v3 = vpop.eup %6081  ;;  %6107 = vrcp.f32 %v3498_v37  ;;  %v3499_v18 = vadd.f32 1.0, %v6080_v26  ;;  %v5494_v26 = vmul.f32 -1.442695, %v8524_v22  ;;  %v9419_v22 = vld [vmem:[#allocation13_spill] sm:$0xff] }
 0x1da   : > { %v6084_v21 = vpop.eup %6083  ;;  %6109 = vrcp.f32 %v3500_v61  ;;  %v3501_v54 = vadd.f32 1.0, %v6082_v3 }
 0x1db   : > { %v6086_v56 = vpop.eup %6085  ;;  %6111 = vrcp.f32 %v3499_v18  ;;  %v3510_v52 = vadd.f32 1.0, %v6084_v21  ;;  %v8869_v21 = vpop.f32.mrf.mxu0 }
 0x1dc   : > { %v6088_v10 = vpop.eup %6087  ;;  %6113 = vrcp.f32 %v3501_v54  ;;  %v3512_v38 = vadd.f32 1.0, %v6086_v56 }
 0x1dd   : > { %v6090_v27 = vpop.eup %6089  ;;  %6115 = vrcp.f32 %v3510_v52  ;;  %v3511_v8 = vadd.f32 1.0, %v6088_v10  ;;  %v9417_v52 = vld [vmem:[#allocation11_spill] sm:$0xff] }
 0x1de   : > { %v6092_v43 = vpop.eup %6091  ;;  %6117 = vrcp.f32 %v3512_v38  ;;  %v3513_v58 = vadd.f32 1.0, %v6090_v27  ;;  %v5496_v10 = vmul.f32 -1.442695, %v9417_v52  ;;  %v8872_v38 = vpop.f32.mrf.mxu1 }
 0x1df   : > { %v6094_v50 = vpop.eup %6093  ;;  %6119 = vrcp.f32 %v3511_v8  ;;  %v3522_v59 = vadd.f32 1.0, %v6092_v43  ;;  %v9418_v8 = vld [vmem:[#allocation12_spill] sm:$0xff] }
 0x1e0   : > { %v6096_v37 = vpop.eup %6095  ;;  %6121 = vrcp.f32 %v3513_v58  ;;  %v3524_v61 = vadd.f32 1.0, %v6094_v50  ;;  %v5495_v43 = vmul.f32 -1.442695, %v9418_v8  ;;  %v5497_v50 = vmul.f32 -1.442695, %v9419_v22  ;;  %v8882_v52 = vpop.f32.mrf.mxu1  ;;  %v9422_v8 = vld [vmem:[#allocation16_spill] sm:$0xff] }
 0x1e1   : > { %v6098_v3 = vpop.eup %6097  ;;  %6123 = vrcp.f32 %v3522_v59  ;;  %v3523_v18 = vadd.f32 1.0, %v6096_v37  ;;  %v9420_v37 = vld [vmem:[#allocation14_spill] sm:$0xff] }
 0x1e2   : > { %v6100_v54 = vpop.eup %6099  ;;  %6125 = vrcp.f32 %v3524_v61  ;;  %v3525_v56 = vadd.f32 1.0, %v6098_v3  ;;  %v5506_v61 = vmul.f32 -1.442695, %v9420_v37  ;;  %v8880_v3 = vpop.f32.mrf.mxu0 }
 0x1e3   : > { %v6102_v27 = vpop.eup %6101  ;;  %4711 = vst [vmem:[%s8164_s30 + $0x900] sm:$0xff] %v6100_v54  ;;  %6127 = vrcp.f32 %v3523_v18  ;;  %v7347_v54 = vld [vmem:[%s7655_s27 + $0x100] sm:$0xff]  ;;  %v8895_v37 = vpop.f32.mrf.mxu1 }
 0x1e4   : > { %v6104_v58 = vpop.eup %6103  ;;  %4713 = vst [vmem:[%s8164_s30 + $0x910] sm:$0xff] %v6102_v27  ;;  %6129 = vrcp.f32 %v3525_v56  ;;  %5122 = vmatmul.mubr.msk.f32.gmra.mxu0 %vm257_vm0, %v7347_v54  ;;  %5156 = vmatmul.mubr.msk.f32.gmra.mxu1 %vm257_vm0, %v7347_v54  ;;  %v9421_v56 = vld [vmem:[#allocation15_spill] sm:$0xff]  ;;  %v8893_v22 = vpop.f32.mrf.mxu0  ;;  %9424 = vst [vmem:[#allocation12_spill] sm:$0xff] %v8895_v37 }
 0x1e5   : > { %v6106_v59 = vpop.eup %6105  ;;  %4712 = vst [vmem:[%s8164_s30 + $0x908] sm:$0xff] %v6104_v58  ;;  %6131 = vpow2.f32 %v5494_v26  ;;  %v5508_v27 = vmul.f32 -1.442695, %v9421_v56  ;;  %1698 = vmatprep.mubr.f32.mxu0 %v9411_v36  ;;  %1967 = vmatprep.mubr.f32.mxu1 %v9411_v36  ;;  %v5507_v58 = vmul.f32 -1.442695, %v9422_v8  ;;  %9423 = vst [vmem:[#allocation11_spill] sm:$0xff] %v8893_v22  ;;  %v8903_v8 = vpop.f32.mrf.mxu1 }
 0x1e6   : > { %v6108_v18 = vpop.eup %6107  ;;  %4714 = vst [vmem:[%s8164_s30 + $0x918] sm:$0xff] %v6106_v59  ;;  %6133 = vpow2.f32 %v5496_v10  ;;  %v9425_v10 = vld [vmem:[#allocation17_spill] sm:$0xff]  ;;  %v9426_v36 = vld [vmem:[#allocation18_spill] sm:$0xff]  ;;  %9428 = vst [vmem:[#allocation14_spill] sm:$0xff] %v8903_v8 }
 0x1e7   : > { %v6110_v26 = vpop.eup %6109  ;;  %4723 = vst [vmem:[%s8164_s30 + $0x960] sm:$0xff] %v6108_v18  ;;  %6135 = vpow2.f32 %v5495_v43  ;;  %v5509_v54 = vmul.f32 -1.442695, %v9425_v10  ;;  %v5518_v18 = vmul.f32 -1.442695, %v9426_v36  ;;  %v8901_v43 = vpop.f32.mrf.mxu0  ;;  %v7348_v22 = vld [vmem:[%s7655_s27 + $0x108] sm:$0xff] }
 0x1e8   : > { %v6112_v59 = vpop.eup %6111  ;;  %4725 = vst [vmem:[%s8164_s30 + $0x970] sm:$0xff] %v6110_v26  ;;  %6137 = vpow2.f32 %v5497_v50  ;;  %9427 = vst [vmem:[#allocation13_spill] sm:$0xff] %v8901_v43  ;;  %5123 = vmatmul.mubr.msk.f32.gmra.mxu0 %vm257_vm0, %v7348_v22  ;;  %5157 = vmatmul.mubr.msk.f32.gmra.mxu1 %vm257_vm0, %v7348_v22  ;;  %v9429_v26 = vld [vmem:[#allocation19_spill] sm:$0xff]  ;;  %v5519_v10 = vmul.f32 -1.442695, %v8559_v25  ;;  %v9430_v8 = vld [vmem:[#allocation20_spill] sm:$0xff] }
 0x1e9   : > { %v6114_v56 = vpop.eup %6113  ;;  %4724 = vst [vmem:[%s8164_s30 + $0x968] sm:$0xff] %v6112_v59  ;;  %6139 = vpow2.f32 %v5506_v61  ;;  %v5520_v59 = vmul.f32 -1.442695, %v9429_v26  ;;  %v5521_v43 = vmul.f32 -1.442695, %v9430_v8  ;;  %v9431_v22 = vld [vmem:[#allocation21_spill] sm:$0xff] }
 0x1ea   : > { %v6116_v50 = vpop.eup %6115  ;;  %4726 = vst [vmem:[%s8164_s30 + $0x978] sm:$0xff] %v6114_v56  ;;  %6141 = vpow2.f32 %v5508_v27  ;;  %v5530_v27 = vmul.f32 -1.442695, %v9431_v22  ;;  %v5531_v25 = vmul.f32 -1.442695, %v8572_v23 }
 0x1eb   : > { %v6118_v61 = vpop.eup %6117  ;;  %4735 = vst [vmem:[%s8164_s30 + $0x9c0] sm:$0xff] %v6116_v50  ;;  %6143 = vpow2.f32 %v5507_v58  ;;  %v9432_v50 = vld [vmem:[#allocation22_spill] sm:$0xff]  ;;  %v5533_v8 = vmul.f32 -1.442695, %v8574_v11 }
 0x1ec   : > { %v6120_v36 = vpop.eup %6119  ;;  %4737 = vst [vmem:[%s8164_s30 + $0x9d0] sm:$0xff] %v6118_v61  ;;  %6145 = vpow2.f32 %v5509_v54  ;;  %v5532_v58 = vmul.f32 -1.442695, %v9432_v50 }
 0x1ed   : > { %v6122_v37 = vpop.eup %6121  ;;  %4736 = vst [vmem:[%s8164_s30 + $0x9c8] sm:$0xff] %v6120_v36  ;;  %6147 = vpow2.f32 %v5518_v18 }
 0x1ee   : > { %v6124_v56 = vpop.eup %6123  ;;  %4738 = vst [vmem:[%s8164_s30 + $0x9d8] sm:$0xff] %v6122_v37  ;;  %6149 = vpow2.f32 %v5520_v59 }
 0x1ef   : > { %v6126_v26 = vpop.eup %6125  ;;  %4747 = vst [vmem:[%s8164_s30 + $0xa20] sm:$0xff] %v6124_v56  ;;  %6151 = vpow2.f32 %v5519_v10 }
 0x1f0   : > { %v6128_v54 = vpop.eup %6127  ;;  %4749 = vst [vmem:[%s8164_s30 + $0xa30] sm:$0xff] %v6126_v26  ;;  %6153 = vpow2.f32 %v5521_v43 }
 0x1f1   : > { %v6130_v61 = vpop.eup %6129  ;;  %4748 = vst [vmem:[%s8164_s30 + $0xa28] sm:$0xff] %v6128_v54  ;;  %6155 = vpow2.f32 %v5530_v27 }
 0x1f2   : > { %v6132_v18 = vpop.eup %6131  ;;  %4750 = vst [vmem:[%s8164_s30 + $0xa38] sm:$0xff] %v6130_v61  ;;  %6157 = vpow2.f32 %v5532_v58 }
 0x1f3   : > { %v6134_v37 = vpop.eup %6133  ;;  %v3534_v59 = vadd.f32 1.0, %v6132_v18  ;;  %6159 = vpow2.f32 %v5531_v25 }
 0x1f4   : > { %v6136_v36 = vpop.eup %6135  ;;  %v3536_v22 = vadd.f32 1.0, %v6134_v37  ;;  %6161 = vpow2.f32 %v5533_v8 }
 0x1f5   : > { %v6138_v10 = vpop.eup %6137  ;;  %6163 = vrcp.f32 %v3534_v59  ;;  %v3535_v23 = vadd.f32 1.0, %v6136_v36 }
 0x1f6   : > { %v6140_v56 = vpop.eup %6139  ;;  %6165 = vrcp.f32 %v3536_v22  ;;  %v3537_v43 = vadd.f32 1.0, %v6138_v10 }
 0x1f7   : > { %v6142_v50 = vpop.eup %6141  ;;  %6167 = vrcp.f32 %v3535_v23  ;;  %v3546_v11 = vadd.f32 1.0, %v6140_v56 }
 0x1f8   : > { %v6144_v26 = vpop.eup %6143  ;;  %6169 = vrcp.f32 %v3537_v43  ;;  %v3548_v27 = vadd.f32 1.0, %v6142_v50 }
 0x1f9   : > { %v6146_v54 = vpop.eup %6145  ;;  %6171 = vrcp.f32 %v3546_v11  ;;  %v3547_v58 = vadd.f32 1.0, %v6144_v26 }
 0x1fa   : > { %v6148_v61 = vpop.eup %6147  ;;  %6173 = vrcp.f32 %v3548_v27  ;;  %v3549_v25 = vadd.f32 1.0, %v6146_v54  ;;  %v5542_v54 = vmul.f32 -1.442695, %v8578_v6  ;;  %v5554_v6 = vmul.f32 -1.442695, %v8610_v53 }
 0x1fb   : > { %v6150_v18 = vpop.eup %6149  ;;  %6175 = vrcp.f32 %v3547_v58  ;;  %v3558_v8 = vadd.f32 1.0, %v6148_v61  ;;  %v5162_v53 = vmul.f32 -1.442695, %v8643_v31  ;;  %v5174_v31 = vmul.f32 -1.442695, %v8662_v32 }
 0x1fc   : > { %v6152_v37 = vpop.eup %6151  ;;  %6177 = vrcp.f32 %v3549_v25  ;;  %v3560_v59 = vadd.f32 1.0, %v6150_v18  ;;  %v9433_v25 = vld [vmem:[#allocation23_spill] sm:$0xff] }
 0x1fd   : > { %v6154_v36 = vpop.eup %6153  ;;  %6179 = vrcp.f32 %v3558_v8  ;;  %v3559_v22 = vadd.f32 1.0, %v6152_v37  ;;  %v5544_v18 = vmul.f32 -1.442695, %v9433_v25  ;;  %v5543_v37 = vmul.f32 -1.442695, %v8593_v14 }
 0x1fe   : > { %v6156_v10 = vpop.eup %6155  ;;  %6181 = vrcp.f32 %v3560_v59  ;;  %v3561_v23 = vadd.f32 1.0, %v6154_v36  ;;  %v5545_v36 = vmul.f32 -1.442695, %v8597_v41  ;;  %v5555_v14 = vmul.f32 -1.442695, %v8627_v20 }
 0x1ff   : > { %v6158_v56 = vpop.eup %6157  ;;  %6183 = vrcp.f32 %v3559_v22  ;;  %v3570_v43 = vadd.f32 1.0, %v6156_v10  ;;  %v5557_v41 = vmul.f32 -1.442695, %v8631_v46  ;;  %v5163_v20 = vmul.f32 -1.442695, %v8653_v55  ;;  %v9434_v55 = vld [vmem:[#allocation24_spill] sm:$0xff] }
 0x200   : > { %v6160_v50 = vpop.eup %6159  ;;  %6185 = vrcp.f32 %v3561_v23  ;;  %v3572_v11 = vadd.f32 1.0, %v6158_v56  ;;  %v5556_v23 = vmul.f32 -1.442695, %v8614_v19  ;;  %v5164_v19 = vmul.f32 -1.442695, %v8646_v45 }
 0x201   : > { %v6162_v26 = vpop.eup %6161  ;;  %6187 = vrcp.f32 %v3570_v43  ;;  %v3571_v27 = vadd.f32 1.0, %v6160_v50  ;;  %v5165_v46 = vmul.f32 -1.442695, %v8655_v57  ;;  %v5176_v45 = vmul.f32 -1.442695, %v8664_v29  ;;  %v9435_v57 = vld [vmem:[#allocation25_spill] sm:$0xff] }
 0x202   : > { %v6164_v58 = vpop.eup %6163  ;;  %6189 = vrcp.f32 %v3572_v11  ;;  %v3573_v61 = vadd.f32 1.0, %v6162_v26  ;;  %v5175_v25 = vmul.f32 -1.442695, %v9434_v55 }
 0x203   : > { %v6166_v8 = vpop.eup %6165  ;;  %4759 = vst [vmem:[%s8164_s30 + $0xa80] sm:$0xff] %v6164_v58  ;;  %6191 = vrcp.f32 %v3571_v27 }
 0x204   : > { %v6168_v59 = vpop.eup %6167  ;;  %4761 = vst [vmem:[%s8164_s30 + $0xa90] sm:$0xff] %v6166_v8  ;;  %6193 = vrcp.f32 %v3573_v61  ;;  %v5177_v8 = vmul.f32 -1.442695, %v9435_v57 }
 0x205   : > { %v6170_v22 = vpop.eup %6169  ;;  %4760 = vst [vmem:[%s8164_s30 + $0xa88] sm:$0xff] %v6168_v59  ;;  %6195 = vpow2.f32 %v5542_v54 }
 0x206   : > { %v6172_v10 = vpop.eup %6171  ;;  %4762 = vst [vmem:[%s8164_s30 + $0xa98] sm:$0xff] %v6170_v22  ;;  %6197 = vpow2.f32 %v5544_v18 }
 0x207   : > { %v6174_v56 = vpop.eup %6173  ;;  %4771 = vst [vmem:[%s8164_s30 + $0xae0] sm:$0xff] %v6172_v10  ;;  %6199 = vpow2.f32 %v5543_v37 }
 0x208   : > { %v6176_v43 = vpop.eup %6175  ;;  %4773 = vst [vmem:[%s8164_s30 + $0xaf0] sm:$0xff] %v6174_v56  ;;  %6201 = vpow2.f32 %v5545_v36 }
 0x209   : > { %v6178_v50 = vpop.eup %6177  ;;  %4772 = vst [vmem:[%s8164_s30 + $0xae8] sm:$0xff] %v6176_v43  ;;  %6203 = vpow2.f32 %v5554_v6 }
 0x20a   : > { %v6180_v11 = vpop.eup %6179  ;;  %4774 = vst [vmem:[%s8164_s30 + $0xaf8] sm:$0xff] %v6178_v50  ;;  %6205 = vpow2.f32 %v5556_v23 }
 0x20b   : > { %v6182_v26 = vpop.eup %6181  ;;  %4783 = vst [vmem:[%s8164_s30 + $0xb40] sm:$0xff] %v6180_v11  ;;  %6207 = vpow2.f32 %v5555_v14 }
 0x20c   : > { %v6184_v27 = vpop.eup %6183  ;;  %4785 = vst [vmem:[%s8164_s30 + $0xb50] sm:$0xff] %v6182_v26  ;;  %6209 = vpow2.f32 %v5557_v41 }
 0x20d   : > { %v6186_v54 = vpop.eup %6185  ;;  %4784 = vst [vmem:[%s8164_s30 + $0xb48] sm:$0xff] %v6184_v27  ;;  %6211 = vpow2.f32 %v5162_v53 }
 0x20e   : > { %v6188_v58 = vpop.eup %6187  ;;  %4786 = vst [vmem:[%s8164_s30 + $0xb58] sm:$0xff] %v6186_v54  ;;  %6213 = vpow2.f32 %v5164_v19 }
 0x20f   : > { %v6190_v61 = vpop.eup %6189  ;;  %4795 = vst [vmem:[%s8164_s30 + $0xba0] sm:$0xff] %v6188_v58  ;;  %6215 = vpow2.f32 %v5163_v20 }
 0x210   : > { %v6192_v18 = vpop.eup %6191  ;;  %4797 = vst [vmem:[%s8164_s30 + $0xbb0] sm:$0xff] %v6190_v61  ;;  %6217 = vpow2.f32 %v5165_v46 }
 0x211   : > { %v6194_v37 = vpop.eup %6193  ;;  %4796 = vst [vmem:[%s8164_s30 + $0xba8] sm:$0xff] %v6192_v18  ;;  %6219 = vpow2.f32 %v5174_v31 }
 0x212   : > { %v6196_v32 = vpop.eup %6195  ;;  %4798 = vst [vmem:[%s8164_s30 + $0xbb8] sm:$0xff] %v6194_v37  ;;  %6221 = vpow2.f32 %v5176_v45 }
 0x213   : > { %v6198_v59 = vpop.eup %6197  ;;  %v3582_v36 = vadd.f32 1.0, %v6196_v32  ;;  %6223 = vpow2.f32 %v5175_v25  ;;  %v5186_v32 = vmul.f32 -1.442695, %v8681_v0  ;;  %v5198_v0 = vmul.f32 -1.442695, %v8714_v48 }
 0x214   : > { %v6200_v29 = vpop.eup %6199  ;;  %v3584_v22 = vadd.f32 1.0, %v6198_v59  ;;  %6225 = vpow2.f32 %v5177_v8  ;;  %v5210_v48 = vmul.f32 -1.442695, %v8747_v16  ;;  %v5222_v16 = vmul.f32 -1.442695, %v8766_v9 }
 0x215   : > { %v6202_v6 = vpop.eup %6201  ;;  %6227 = vrcp.f32 %v3582_v36  ;;  %v3583_v10 = vadd.f32 1.0, %v6200_v29  ;;  %v5188_v29 = vmul.f32 -1.442695, %v8684_v30  ;;  %v5200_v30 = vmul.f32 -1.442695, %v8718_v17 }
 0x216   : > { %v6204_v23 = vpop.eup %6203  ;;  %6229 = vrcp.f32 %v3584_v22  ;;  %v3585_v56 = vadd.f32 1.0, %v6202_v6  ;;  %v5187_v6 = vmul.f32 -1.442695, %v8697_v5  ;;  %v5199_v5 = vmul.f32 -1.442695, %v8731_v33 }
 0x217   : > { %v6206_v14 = vpop.eup %6205  ;;  %6231 = vrcp.f32 %v3583_v10  ;;  %v3594_v43 = vadd.f32 1.0, %v6204_v23  ;;  %v5189_v23 = vmul.f32 -1.442695, %v8701_v62  ;;  %v5201_v62 = vmul.f32 -1.442695, %v8735_v1 }
 0x218   : > { %v6208_v41 = vpop.eup %6207  ;;  %6233 = vrcp.f32 %v3585_v56  ;;  %v3596_v50 = vadd.f32 1.0, %v6206_v14  ;;  %v5212_v17 = vmul.f32 -1.442695, %v8750_v44  ;;  %v5211_v33 = vmul.f32 -1.442695, %v8757_v13 }
 0x219   : > { %v6210_v53 = vpop.eup %6209  ;;  %6235 = vrcp.f32 %v3594_v43  ;;  %v3595_v11 = vadd.f32 1.0, %v6208_v41  ;;  %v5213_v1 = vmul.f32 -1.442695, %v8759_v40  ;;  %v5224_v44 = vmul.f32 -1.442695, %v8768_v15 }
 0x21a   : > { %v6212_v19 = vpop.eup %6211  ;;  %6237 = vrcp.f32 %v3596_v50  ;;  %v3597_v26 = vadd.f32 1.0, %v6210_v53  ;;  %v5223_v13 = vmul.f32 -1.442695, %v8775_v35  ;;  %v5225_v40 = vmul.f32 -1.442695, %v8777_v49 }
 0x21b   : > { %v6214_v20 = vpop.eup %6213  ;;  %6239 = vrcp.f32 %v3595_v11  ;;  %v3202_v27 = vadd.f32 1.0, %v6212_v19 }
 0x21c   : > { %v6216_v46 = vpop.eup %6215  ;;  %6241 = vrcp.f32 %v3597_v26  ;;  %v3204_v54 = vadd.f32 1.0, %v6214_v20 }
 0x21d   : > { %v6218_v31 = vpop.eup %6217  ;;  %6243 = vrcp.f32 %v3202_v27  ;;  %v3203_v58 = vadd.f32 1.0, %v6216_v46 }
 0x21e   : > { %v6220_v45 = vpop.eup %6219  ;;  %6245 = vrcp.f32 %v3204_v54  ;;  %v3205_v61 = vadd.f32 1.0, %v6218_v31 }
 0x21f   : > { %v6222_v55 = vpop.eup %6221  ;;  %6247 = vrcp.f32 %v3203_v58  ;;  %v3214_v25 = vadd.f32 1.0, %v6220_v45 }
 0x220   : > { %v6224_v18 = vpop.eup %6223  ;;  %6249 = vrcp.f32 %v3205_v61  ;;  %v3216_v57 = vadd.f32 1.0, %v6222_v55 }
 0x221   : > { %v6226_v8 = vpop.eup %6225  ;;  %6251 = vrcp.f32 %v3214_v25  ;;  %v3215_v37 = vadd.f32 1.0, %v6224_v18 }
 0x222   : > { %v6228_v59 = vpop.eup %6227  ;;  %6253 = vrcp.f32 %v3216_v57  ;;  %v3217_v36 = vadd.f32 1.0, %v6226_v8 }
 0x223   : > { %v6230_v22 = vpop.eup %6229  ;;  %4807 = vst [vmem:[%s8164_s30 + $0xc00] sm:$0xff] %v6228_v59  ;;  %6255 = vrcp.f32 %v3215_v37 }
 0x224   : > { %v6232_v10 = vpop.eup %6231  ;;  %4809 = vst [vmem:[%s8164_s30 + $0xc10] sm:$0xff] %v6230_v22  ;;  %6257 = vrcp.f32 %v3217_v36 }
 0x225   : > { %v6234_v56 = vpop.eup %6233  ;;  %4808 = vst [vmem:[%s8164_s30 + $0xc08] sm:$0xff] %v6232_v10  ;;  %6259 = vpow2.f32 %v5186_v32 }
 0x226   : > { %v6236_v14 = vpop.eup %6235  ;;  %4810 = vst [vmem:[%s8164_s30 + $0xc18] sm:$0xff] %v6234_v56  ;;  %6261 = vpow2.f32 %v5188_v29 }
 0x227   : > { %v6238_v43 = vpop.eup %6237  ;;  %4819 = vst [vmem:[%s8164_s30 + $0xc60] sm:$0xff] %v6236_v14  ;;  %6263 = vpow2.f32 %v5187_v6 }
 0x228   : > { %v6240_v41 = vpop.eup %6239  ;;  %4821 = vst [vmem:[%s8164_s30 + $0xc70] sm:$0xff] %v6238_v43  ;;  %6265 = vpow2.f32 %v5189_v23 }
 0x229   : > { %v6242_v50 = vpop.eup %6241  ;;  %4820 = vst [vmem:[%s8164_s30 + $0xc68] sm:$0xff] %v6240_v41  ;;  %6267 = vpow2.f32 %v5198_v0 }
 0x22a   : > { %v6244_v53 = vpop.eup %6243  ;;  %4822 = vst [vmem:[%s8164_s30 + $0xc78] sm:$0xff] %v6242_v50  ;;  %6269 = vpow2.f32 %v5200_v30 }
 0x22b   : > { %v6246_v11 = vpop.eup %6245  ;;  %4426 = vst [vmem:[%s8164_s30 + $0x20] sm:$0xff] %v6244_v53  ;;  %6271 = vpow2.f32 %v5199_v5 }
 0x22c   : > { %v6248_v19 = vpop.eup %6247  ;;  %4428 = vst [vmem:[%s8164_s30 + $0x30] sm:$0xff] %v6246_v11  ;;  %6273 = vpow2.f32 %v5201_v62  ;;  %v5236_v11 = vmul.f32 -1.442695, %v8788_v47  ;;  %v5248_v47 = vmul.f32 -1.442695, %v8811_v39 }
 0x22d   : > { %v6250_v26 = vpop.eup %6249  ;;  %4427 = vst [vmem:[%s8164_s30 + $0x28] sm:$0xff] %v6248_v19  ;;  %6275 = vpow2.f32 %v5210_v48  ;;  %v5234_v48 = vmul.f32 -1.442695, %v8785_v51  ;;  %v5235_v19 = vmul.f32 -1.442695, %v8796_v12 }
 0x22e   : > { %v6252_v20 = vpop.eup %6251  ;;  %4429 = vst [vmem:[%s8164_s30 + $0x38] sm:$0xff] %v6250_v26  ;;  %6277 = vpow2.f32 %v5212_v17  ;;  %v5237_v26 = vmul.f32 -1.442695, %v8798_v7  ;;  %v5246_v51 = vmul.f32 -1.442695, %v8809_v28 }
 0x22f   : > { %v6254_v27 = vpop.eup %6253  ;;  %4439 = vst [vmem:[%s8164_s30 + $0x80] sm:$0xff] %v6252_v20  ;;  %6279 = vpow2.f32 %v5211_v33  ;;  %v5247_v12 = vmul.f32 -1.442695, %v8817_v60  ;;  %v5249_v7 = vmul.f32 -1.442695, %v8819_v42 }
 0x230   : > { %v6256_v46 = vpop.eup %6255  ;;  %4441 = vst [vmem:[%s8164_s30 + $0x90] sm:$0xff] %v6254_v27  ;;  %6281 = vpow2.f32 %v5213_v1  ;;  %v5258_v28 = vmul.f32 -1.442695, %v8830_v34  ;;  %v5260_v39 = vmul.f32 -1.442695, %v8832_v2  ;;  %v9436_v2 = vld [vmem:[#allocation26_spill] sm:$0xff] }
 0x231   : > { %v6258_v54 = vpop.eup %6257  ;;  %4440 = vst [vmem:[%s8164_s30 + $0x88] sm:$0xff] %v6256_v46  ;;  %6283 = vpow2.f32 %v5222_v16  ;;  %v5259_v60 = vmul.f32 -1.442695, %v8838_v4  ;;  %v5261_v42 = vmul.f32 -1.442695, %v8840_v24  ;;  %v9437_v4 = vld [vmem:[#allocation27_spill] sm:$0xff] }
 0x232   : > { %v6260_v9 = vpop.eup %6259  ;;  %4442 = vst [vmem:[%s8164_s30 + $0x98] sm:$0xff] %v6258_v54  ;;  %6285 = vpow2.f32 %v5224_v44  ;;  %v5270_v34 = vmul.f32 -1.442695, %v8851_v63  ;;  %v9438_v24 = vld [vmem:[#allocation28_spill] sm:$0xff] }
 0x233   : > { %v6262_v31 = vpop.eup %6261  ;;  %v3226_v58 = vadd.f32 1.0, %v6260_v9  ;;  %6287 = vpow2.f32 %v5223_v13 }
 0x234   : > { %v6264_v15 = vpop.eup %6263  ;;  %v3228_v45 = vadd.f32 1.0, %v6262_v31  ;;  %6289 = vpow2.f32 %v5225_v40 }
 0x235   : > { %v6266_v61 = vpop.eup %6265  ;;  %6291 = vrcp.f32 %v3226_v58  ;;  %v3227_v35 = vadd.f32 1.0, %v6264_v15  ;;  %v5272_v58 = vmul.f32 -1.442695, %v9436_v2 }
 0x236   : > { %v6268_v55 = vpop.eup %6267  ;;  %6293 = vrcp.f32 %v3228_v45  ;;  %v3229_v25 = vadd.f32 1.0, %v6266_v61  ;;  %v5271_v45 = vmul.f32 -1.442695, %v9437_v4 }
 0x237   : > { %v6270_v18 = vpop.eup %6269  ;;  %6295 = vrcp.f32 %v3227_v35  ;;  %v3238_v49 = vadd.f32 1.0, %v6268_v55  ;;  %v5273_v35 = vmul.f32 -1.442695, %v9438_v24 }
 0x238   : > { %v6272_v57 = vpop.eup %6271  ;;  %6297 = vrcp.f32 %v3229_v25  ;;  %v3240_v8 = vadd.f32 1.0, %v6270_v18 }
 0x239   : > { %v6274_v37 = vpop.eup %6273  ;;  %6299 = vrcp.f32 %v3238_v49  ;;  %v3239_v32 = vadd.f32 1.0, %v6272_v57 }
 0x23a   : > { %v6276_v59 = vpop.eup %6275  ;;  %6301 = vrcp.f32 %v3240_v8  ;;  %v3241_v36 = vadd.f32 1.0, %v6274_v37 }
 0x23b   : > { %v6278_v29 = vpop.eup %6277  ;;  %6303 = vrcp.f32 %v3239_v32  ;;  %v3250_v22 = vadd.f32 1.0, %v6276_v59 }
 0x23c   : > { %v6280_v6 = vpop.eup %6279  ;;  %6305 = vrcp.f32 %v3241_v36  ;;  %v3252_v10 = vadd.f32 1.0, %v6278_v29 }
 0x23d   : > { %v6282_v23 = vpop.eup %6281  ;;  %6307 = vrcp.f32 %v3250_v22  ;;  %v3251_v56 = vadd.f32 1.0, %v6280_v6 }
 0x23e   : > { %v6284_v0 = vpop.eup %6283  ;;  %6309 = vrcp.f32 %v3252_v10  ;;  %v3253_v14 = vadd.f32 1.0, %v6282_v23 }
 0x23f   : > { %v6286_v30 = vpop.eup %6285  ;;  %6311 = vrcp.f32 %v3251_v56  ;;  %v3262_v43 = vadd.f32 1.0, %v6284_v0 }
 0x240   : > { %v6288_v5 = vpop.eup %6287  ;;  %6313 = vrcp.f32 %v3253_v14  ;;  %v3264_v41 = vadd.f32 1.0, %v6286_v30 }
 0x241   : > { %v6290_v62 = vpop.eup %6289  ;;  %6315 = vrcp.f32 %v3262_v43  ;;  %v3263_v50 = vadd.f32 1.0, %v6288_v5 }
 0x242   : > { %v6292_v53 = vpop.eup %6291  ;;  %6317 = vrcp.f32 %v3264_v41  ;;  %v3265_v17 = vadd.f32 1.0, %v6290_v62 }
 0x243   : > { %v6294_v33 = vpop.eup %6293  ;;  %4451 = vst [vmem:[%s8164_s30 + $0xe0] sm:$0xff] %v6292_v53  ;;  %6319 = vrcp.f32 %v3263_v50 }
 0x244   : > { %v6296_v1 = vpop.eup %6295  ;;  %4453 = vst [vmem:[%s8164_s30 + $0xf0] sm:$0xff] %v6294_v33  ;;  %6321 = vrcp.f32 %v3265_v17 }
 0x245   : > { %v6298_v16 = vpop.eup %6297  ;;  %4452 = vst [vmem:[%s8164_s30 + $0xe8] sm:$0xff] %v6296_v1  ;;  %6323 = vpow2.f32 %v5234_v48 }
 0x246   : > { %v6300_v20 = vpop.eup %6299  ;;  %4454 = vst [vmem:[%s8164_s30 + $0xf8] sm:$0xff] %v6298_v16  ;;  %6325 = vpow2.f32 %v5236_v11  ;;  %v5282_v16 = vmul.f32 -1.442695, %v8869_v21 }
 0x247   : > { %v6302_v44 = vpop.eup %6301  ;;  %4463 = vst [vmem:[%s8164_s30 + $0x140] sm:$0xff] %v6300_v20  ;;  %6327 = vpow2.f32 %v5235_v19  ;;  %v1036_v19 = vpop.f32.mrf.mxu0 }
 0x248   : > { %v6304_v27 = vpop.eup %6303  ;;  %4465 = vst [vmem:[%s8164_s30 + $0x150] sm:$0xff] %v6302_v44  ;;  %6329 = vpow2.f32 %v5237_v26  ;;  %v5284_v44 = vmul.f32 -1.442695, %v8872_v38 }
 0x249   : > { %v6306_v13 = vpop.eup %6305  ;;  %4464 = vst [vmem:[%s8164_s30 + $0x148] sm:$0xff] %v6304_v27  ;;  %6331 = vpow2.f32 %v5246_v51  ;;  %v1305_v51 = vpop.f32.mrf.mxu1  ;;  %v5283_v27 = vmul.f32 -1.442695, %v8880_v3 }
 0x24a   : > { %v6308_v46 = vpop.eup %6307  ;;  %4466 = vst [vmem:[%s8164_s30 + $0x158] sm:$0xff] %v6306_v13  ;;  %6333 = vpow2.f32 %v5248_v47  ;;  %v5285_v13 = vmul.f32 -1.442695, %v8882_v52  ;;  %v1038_v21 = vpop.f32.mrf.mxu0 }
 0x24b   : > { %v6310_v40 = vpop.eup %6309  ;;  %4475 = vst [vmem:[%s8164_s30 + $0x1a0] sm:$0xff] %v6308_v46  ;;  %6335 = vpow2.f32 %v5247_v12  ;;  %v9439_v46 = vld [vmem:[#allocation11_spill] sm:$0xff]  ;;  %v1307_v38 = vpop.f32.mrf.mxu1 }
 0x24c   : > { %v6312_v54 = vpop.eup %6311  ;;  %4477 = vst [vmem:[%s8164_s30 + $0x1b0] sm:$0xff] %v6310_v40  ;;  %6337 = vpow2.f32 %v5249_v7  ;;  %v1042_v2 = vpop.f32.mrf.mxu0 }
 0x24d   : > { %v6314_v9 = vpop.eup %6313  ;;  %4476 = vst [vmem:[%s8164_s30 + $0x1a8] sm:$0xff] %v6312_v54  ;;  %6339 = vpow2.f32 %v5258_v28  ;;  %v1311_v4 = vpop.f32.mrf.mxu1 }
 0x24e   : > { %v6316_v31 = vpop.eup %6315  ;;  %4478 = vst [vmem:[%s8164_s30 + $0x1b8] sm:$0xff] %v6314_v9  ;;  %6341 = vpow2.f32 %v5260_v39  ;;  %v5294_v39 = vmul.f32 -1.442695, %v9439_v46 }
 0x24f   : > { %v6318_v15 = vpop.eup %6317  ;;  %4487 = vst [vmem:[%s8164_s30 + $0x200] sm:$0xff] %v6316_v31  ;;  %6343 = vpow2.f32 %v5259_v60  ;;  %v9440_v60 = vld [vmem:[#allocation12_spill] sm:$0xff] }
 0x250   : > { %v6320_v61 = vpop.eup %6319  ;;  %4489 = vst [vmem:[%s8164_s30 + $0x210] sm:$0xff] %v6318_v15  ;;  %6345 = vpow2.f32 %v5261_v42  ;;  %v5296_v3 = vmul.f32 -1.442695, %v9440_v60  ;;  %v9441_v42 = vld [vmem:[#allocation13_spill] sm:$0xff]  ;;  %v5306_v15 = vmul.f32 -1.442695, %v1036_v19 }
 0x251   : > { %v6322_v55 = vpop.eup %6321  ;;  %4488 = vst [vmem:[%s8164_s30 + $0x208] sm:$0xff] %v6320_v61  ;;  %6347 = vpow2.f32 %v5270_v34  ;;  %v5295_v52 = vmul.f32 -1.442695, %v9441_v42  ;;  %v9442_v34 = vld [vmem:[#allocation14_spill] sm:$0xff]  ;;  %v5308_v61 = vmul.f32 -1.442695, %v1305_v51 }
 0x252   : > { %v6324_v63 = vpop.eup %6323  ;;  %4490 = vst [vmem:[%s8164_s30 + $0x218] sm:$0xff] %v6322_v55  ;;  %6349 = vpow2.f32 %v5272_v58  ;;  %v5297_v31 = vmul.f32 -1.442695, %v9442_v34 }
 0x253   : > { %v6326_v25 = vpop.eup %6325  ;;  %v3274_v18 = vadd.f32 1.0, %v6324_v63  ;;  %6351 = vpow2.f32 %v5271_v45  ;;  %v5309_v63 = vmul.f32 -1.442695, %v1307_v38 }
 0x254   : > { %v6328_v49 = vpop.eup %6327  ;;  %v3276_v57 = vadd.f32 1.0, %v6326_v25  ;;  %6353 = vpow2.f32 %v5273_v35  ;;  %v5307_v35 = vmul.f32 -1.442695, %v1038_v21  ;;  %v1044_v25 = vpop.f32.mrf.mxu0 }
 0x255   : > { %v6330_v8 = vpop.eup %6329  ;;  %6355 = vrcp.f32 %v3274_v18  ;;  %v3275_v37 = vadd.f32 1.0, %v6328_v49  ;;  %v5318_v49 = vmul.f32 -1.442695, %v1042_v2 }
 0x256   : > { %v6332_v32 = vpop.eup %6331  ;;  %6357 = vrcp.f32 %v3276_v57  ;;  %v3277_v59 = vadd.f32 1.0, %v6330_v8  ;;  %v1313_v57 = vpop.f32.mrf.mxu1 }
 0x257   : > { %v6334_v36 = vpop.eup %6333  ;;  %6359 = vrcp.f32 %v3275_v37  ;;  %v3286_v29 = vadd.f32 1.0, %v6332_v32  ;;  %v5320_v37 = vmul.f32 -1.442695, %v1311_v4 }
 0x258   : > { %v6336_v22 = vpop.eup %6335  ;;  %6361 = vrcp.f32 %v3277_v59  ;;  %v3288_v6 = vadd.f32 1.0, %v6334_v36  ;;  %v5319_v59 = vmul.f32 -1.442695, %v1044_v25 }
 0x259   : > { %v6338_v10 = vpop.eup %6337  ;;  %6363 = vrcp.f32 %v3286_v29  ;;  %v3287_v23 = vadd.f32 1.0, %v6336_v22  ;;  %v5321_v29 = vmul.f32 -1.442695, %v1313_v57  ;;  %v1048_v22 = vpop.f32.mrf.mxu0 }
 0x25a   : > { %v6340_v56 = vpop.eup %6339  ;;  %6365 = vrcp.f32 %v3288_v6  ;;  %v3289_v0 = vadd.f32 1.0, %v6338_v10  ;;  %v1317_v10 = vpop.f32.mrf.mxu1 }
 0x25b   : > { %v6342_v14 = vpop.eup %6341  ;;  %6367 = vrcp.f32 %v3287_v23  ;;  %v3298_v30 = vadd.f32 1.0, %v6340_v56 }
 0x25c   : > { %v6344_v43 = vpop.eup %6343  ;;  %6369 = vrcp.f32 %v3289_v0  ;;  %v3300_v5 = vadd.f32 1.0, %v6342_v14 }
 0x25d   : > { %v6346_v41 = vpop.eup %6345  ;;  %6371 = vrcp.f32 %v3298_v30  ;;  %v3299_v62 = vadd.f32 1.0, %v6344_v43  ;;  %v1050_v43 = vpop.f32.mrf.mxu0 }
 0x25e   : > { %v6348_v50 = vpop.eup %6347  ;;  %6373 = vrcp.f32 %v3300_v5  ;;  %v3301_v48 = vadd.f32 1.0, %v6346_v41  ;;  %v5331_v4 = vmul.f32 -1.442695, %v1050_v43 }
 0x25f   : > { %v6350_v53 = vpop.eup %6349  ;;  %6375 = vrcp.f32 %v3299_v62  ;;  %v3310_v17 = vadd.f32 1.0, %v6348_v50  ;;  %v1319_v62 = vpop.f32.mrf.mxu1 }
 0x260   : > { %v6352_v11 = vpop.eup %6351  ;;  %6377 = vrcp.f32 %v3301_v48  ;;  %v3312_v33 = vadd.f32 1.0, %v6350_v53  ;;  %v1054_v19 = vpop.f32.mrf.mxu0 }
 0x261   : > { %v6354_v1 = vpop.eup %6353  ;;  %6379 = vrcp.f32 %v3310_v17  ;;  %v3311_v26 = vadd.f32 1.0, %v6352_v11 }
 0x262   : > { %v6356_v20 = vpop.eup %6355  ;;  %6381 = vrcp.f32 %v3312_v33  ;;  %v3313_v47 = vadd.f32 1.0, %v6354_v1 }
 0x263   : > { %v6358_v12 = vpop.eup %6357  ;;  %4499 = vst [vmem:[%s8164_s30 + $0x260] sm:$0xff] %v6356_v20  ;;  %6383 = vrcp.f32 %v3311_v26 }
 0x264   : > { %v6360_v7 = vpop.eup %6359  ;;  %4501 = vst [vmem:[%s8164_s30 + $0x270] sm:$0xff] %v6358_v12  ;;  %6385 = vrcp.f32 %v3313_v47 }
 0x265   : > { %v6362_v28 = vpop.eup %6361  ;;  %4500 = vst [vmem:[%s8164_s30 + $0x268] sm:$0xff] %v6360_v7  ;;  %6387 = vpow2.f32 %v5282_v16  ;;  %v1323_v16 = vpop.f32.mrf.mxu1 }
 0x266   : > { %v6364_v40 = vpop.eup %6363  ;;  %4502 = vst [vmem:[%s8164_s30 + $0x278] sm:$0xff] %v6362_v28  ;;  %6389 = vpow2.f32 %v5284_v44  ;;  %v1056_v7 = vpop.f32.mrf.mxu0 }
 0x267   : > { %v6366_v54 = vpop.eup %6365  ;;  %4511 = vst [vmem:[%s8164_s30 + $0x2c0] sm:$0xff] %v6364_v40  ;;  %6391 = vpow2.f32 %v5283_v27  ;;  %v1325_v28 = vpop.f32.mrf.mxu1  ;;  %v5343_v57 = vmul.f32 -1.442695, %v1056_v7 }
 0x268   : > { %v6368_v9 = vpop.eup %6367  ;;  %4513 = vst [vmem:[%s8164_s30 + $0x2d0] sm:$0xff] %v6366_v54  ;;  %6393 = vpow2.f32 %v5285_v13  ;;  %v1060_v54 = vpop.f32.mrf.mxu0 }
 0x269   : > { %v6370_v58 = vpop.eup %6369  ;;  %4512 = vst [vmem:[%s8164_s30 + $0x2c8] sm:$0xff] %v6368_v9  ;;  %6395 = vpow2.f32 %v5294_v39  ;;  %v5330_v9 = vmul.f32 -1.442695, %v1048_v22  ;;  %v1329_v34 = vpop.f32.mrf.mxu1 }
 0x26a   : > { %v6372_v45 = vpop.eup %6371  ;;  %4514 = vst [vmem:[%s8164_s30 + $0x2d8] sm:$0xff] %v6370_v58  ;;  %6397 = vpow2.f32 %v5296_v3  ;;  %v5332_v58 = vmul.f32 -1.442695, %v1317_v10 }
 0x26b   : > { %v6374_v24 = vpop.eup %6373  ;;  %4523 = vst [vmem:[%s8164_s30 + $0x320] sm:$0xff] %v6372_v45  ;;  %6399 = vpow2.f32 %v5295_v52 }
 0x26c   : > { %v6376_v55 = vpop.eup %6375  ;;  %4525 = vst [vmem:[%s8164_s30 + $0x330] sm:$0xff] %v6374_v24  ;;  %6401 = vpow2.f32 %v5297_v31  ;;  %v1062_v24 = vpop.f32.mrf.mxu0 }
 0x26d   : > { %v6378_v18 = vpop.eup %6377  ;;  %4524 = vst [vmem:[%s8164_s30 + $0x328] sm:$0xff] %v6376_v55  ;;  %6403 = vpow2.f32 %v5306_v15  ;;  %v5342_v55 = vmul.f32 -1.442695, %v1054_v19 }
 0x26e   : > { %v6380_v8 = vpop.eup %6379  ;;  %4526 = vst [vmem:[%s8164_s30 + $0x338] sm:$0xff] %v6378_v18  ;;  %6405 = vpow2.f32 %v5308_v61  ;;  %v5333_v61 = vmul.f32 -1.442695, %v1319_v62  ;;  %v5344_v18 = vmul.f32 -1.442695, %v1323_v16 }
 0x26f   : > { %v6382_v32 = vpop.eup %6381  ;;  %4535 = vst [vmem:[%s8164_s30 + $0x380] sm:$0xff] %v6380_v8  ;;  %6407 = vpow2.f32 %v5307_v35 }
 0x270   : > { %v6384_v36 = vpop.eup %6383  ;;  %4537 = vst [vmem:[%s8164_s30 + $0x390] sm:$0xff] %v6382_v32  ;;  %6409 = vpow2.f32 %v5309_v63  ;;  %v1331_v63 = vpop.f32.mrf.mxu1 }
 0x271   : > { %v6386_v6 = vpop.eup %6385  ;;  %4536 = vst [vmem:[%s8164_s30 + $0x388] sm:$0xff] %v6384_v36  ;;  %6411 = vpow2.f32 %v5318_v49  ;;  %v1066_v32 = vpop.f32.mrf.mxu0  ;;  %v5354_v36 = vmul.f32 -1.442695, %v1060_v54 }
 0x272   : > { %v6388_v23 = vpop.eup %6387  ;;  %4538 = vst [vmem:[%s8164_s30 + $0x398] sm:$0xff] %v6386_v6  ;;  %6413 = vpow2.f32 %v5320_v37  ;;  %v5345_v37 = vmul.f32 -1.442695, %v1325_v28  ;;  %v5356_v6 = vmul.f32 -1.442695, %v1329_v34 }
 0x273   : > { %v6390_v56 = vpop.eup %6389  ;;  %v3322_v0 = vadd.f32 1.0, %v6388_v23  ;;  %6415 = vpow2.f32 %v5319_v59  ;;  %v5355_v23 = vmul.f32 -1.442695, %v1062_v24  ;;  %v5366_v43 = vmul.f32 -1.442695, %v1066_v32 }
 0x274   : > { %v6392_v14 = vpop.eup %6391  ;;  %v3324_v30 = vadd.f32 1.0, %v6390_v56  ;;  %6417 = vpow2.f32 %v5321_v29  ;;  %v1335_v29 = vpop.f32.mrf.mxu1 }
 0x275   : > { %v6394_v5 = vpop.eup %6393  ;;  %6419 = vrcp.f32 %v3322_v0  ;;  %v3323_v41 = vadd.f32 1.0, %v6392_v14  ;;  %v5357_v0 = vmul.f32 -1.442695, %v1331_v63  ;;  %v1068_v14 = vpop.f32.mrf.mxu0  ;;  %v5368_v62 = vmul.f32 -1.442695, %v1335_v29 }
 0x276   : > { %v6396_v50 = vpop.eup %6395  ;;  %6421 = vrcp.f32 %v3324_v30  ;;  %v3325_v48 = vadd.f32 1.0, %v6394_v5  ;;  %v1337_v5 = vpop.f32.mrf.mxu1 }
 0x277   : > { %v6398_v53 = vpop.eup %6397  ;;  %6423 = vrcp.f32 %v3323_v41  ;;  %v3334_v17 = vadd.f32 1.0, %v6396_v50 }
 0x278   : > { %v6400_v11 = vpop.eup %6399  ;;  %6425 = vrcp.f32 %v3325_v48  ;;  %v3336_v33 = vadd.f32 1.0, %v6398_v53  ;;  %v5367_v48 = vmul.f32 -1.442695, %v1068_v14  ;;  %v1341_v19 = vpop.f32.mrf.mxu1 }
 0x279   : > { %v6402_v1 = vpop.eup %6401  ;;  %6427 = vrcp.f32 %v3334_v17  ;;  %v3335_v26 = vadd.f32 1.0, %v6400_v11  ;;  %v5369_v17 = vmul.f32 -1.442695, %v1337_v5  ;;  %v1072_v11 = vpop.f32.mrf.mxu0 }
 0x27a   : > { %v6404_v51 = vpop.eup %6403  ;;  %6429 = vrcp.f32 %v3336_v33  ;;  %v3337_v20 = vadd.f32 1.0, %v6402_v1 }
 0x27b   : > { %v6406_v47 = vpop.eup %6405  ;;  %6431 = vrcp.f32 %v3335_v26  ;;  %v3346_v44 = vadd.f32 1.0, %v6404_v51 }
 0x27c   : > { %v6408_v12 = vpop.eup %6407  ;;  %6433 = vrcp.f32 %v3337_v20  ;;  %v3348_v27 = vadd.f32 1.0, %v6406_v47  ;;  %v1074_v47 = vpop.f32.mrf.mxu0 }
 0x27d   : > { %v6410_v13 = vpop.eup %6409  ;;  %6435 = vrcp.f32 %v3346_v44  ;;  %v3347_v21 = vadd.f32 1.0, %v6408_v12  ;;  %v5379_v29 = vmul.f32 -1.442695, %v1074_v47 }
 0x27e   : > { %v6412_v46 = vpop.eup %6411  ;;  %6437 = vrcp.f32 %v3348_v27  ;;  %v3349_v39 = vadd.f32 1.0, %v6410_v13  ;;  %v1343_v27 = vpop.f32.mrf.mxu1 }
 0x27f   : > { %v6414_v38 = vpop.eup %6413  ;;  %6439 = vrcp.f32 %v3347_v21  ;;  %v3358_v40 = vadd.f32 1.0, %v6412_v46 }
 0x280   : > { %v6416_v60 = vpop.eup %6415  ;;  %6441 = vrcp.f32 %v3349_v39  ;;  %v3360_v3 = vadd.f32 1.0, %v6414_v38  ;;  %v1078_v38 = vpop.f32.mrf.mxu0 }
 0x281   : > { %v6418_v42 = vpop.eup %6417  ;;  %6443 = vrcp.f32 %v3358_v40  ;;  %v3359_v52 = vadd.f32 1.0, %v6416_v60 }
 0x282   : > { %v6420_v31 = vpop.eup %6419  ;;  %6445 = vrcp.f32 %v3360_v3  ;;  %v3361_v2 = vadd.f32 1.0, %v6418_v42  ;;  %v1347_v3 = vpop.f32.mrf.mxu1 }
 0x283   : > { %v6422_v15 = vpop.eup %6421  ;;  %4547 = vst [vmem:[%s8164_s30 + $0x3e0] sm:$0xff] %v6420_v31  ;;  %6447 = vrcp.f32 %v3359_v52 }
 0x284   : > { %v6424_v45 = vpop.eup %6423  ;;  %4549 = vst [vmem:[%s8164_s30 + $0x3f0] sm:$0xff] %v6422_v15  ;;  %6449 = vrcp.f32 %v3361_v2  ;;  %v1080_v2 = vpop.f32.mrf.mxu0 }
 0x285   : > { %v6426_v35 = vpop.eup %6425  ;;  %4548 = vst [vmem:[%s8164_s30 + $0x3e8] sm:$0xff] %v6424_v45  ;;  %6451 = vpow2.f32 %v5330_v9  ;;  %v5391_v5 = vmul.f32 -1.442695, %v1080_v2 }
 0x286   : > { %v6428_v25 = vpop.eup %6427  ;;  %4550 = vst [vmem:[%s8164_s30 + $0x3f8] sm:$0xff] %v6426_v35  ;;  %6453 = vpow2.f32 %v5332_v58 }
 0x287   : > { %v6430_v49 = vpop.eup %6429  ;;  %4559 = vst [vmem:[%s8164_s30 + $0x440] sm:$0xff] %v6428_v25  ;;  %6455 = vpow2.f32 %v5331_v4  ;;  %v1349_v4 = vpop.f32.mrf.mxu1 }
 0x288   : > { %v6432_v8 = vpop.eup %6431  ;;  %4561 = vst [vmem:[%s8164_s30 + $0x450] sm:$0xff] %v6430_v49  ;;  %6457 = vpow2.f32 %v5333_v61  ;;  %v1084_v25 = vpop.f32.mrf.mxu0 }
 0x289   : > { %v6434_v59 = vpop.eup %6433  ;;  %4560 = vst [vmem:[%s8164_s30 + $0x448] sm:$0xff] %v6432_v8  ;;  %6459 = vpow2.f32 %v5342_v55  ;;  %v1353_v8 = vpop.f32.mrf.mxu1 }
 0x28a   : > { %v6436_v22 = vpop.eup %6435  ;;  %4562 = vst [vmem:[%s8164_s30 + $0x458] sm:$0xff] %v6434_v59  ;;  %6461 = vpow2.f32 %v5344_v18  ;;  %v5380_v59 = vmul.f32 -1.442695, %v1341_v19 }
 0x28b   : > { %v6438_v10 = vpop.eup %6437  ;;  %4571 = vst [vmem:[%s8164_s30 + $0x4a0] sm:$0xff] %v6436_v22  ;;  %6463 = vpow2.f32 %v5343_v57  ;;  %v5378_v57 = vmul.f32 -1.442695, %v1072_v11 }
 0x28c   : > { %v6440_v56 = vpop.eup %6439  ;;  %4573 = vst [vmem:[%s8164_s30 + $0x4b0] sm:$0xff] %v6438_v10  ;;  %6465 = vpow2.f32 %v5345_v37  ;;  %v1086_v10 = vpop.f32.mrf.mxu0 }
 0x28d   : > { %v6442_v30 = vpop.eup %6441  ;;  %4572 = vst [vmem:[%s8164_s30 + $0x4a8] sm:$0xff] %v6440_v56  ;;  %6467 = vpow2.f32 %v5354_v36  ;;  %v5390_v56 = vmul.f32 -1.442695, %v1078_v38 }
 0x28e   : > { %v6444_v41 = vpop.eup %6443  ;;  %4574 = vst [vmem:[%s8164_s30 + $0x4b8] sm:$0xff] %v6442_v30  ;;  %6469 = vpow2.f32 %v5356_v6  ;;  %v5381_v6 = vmul.f32 -1.442695, %v1343_v27  ;;  %v5392_v30 = vmul.f32 -1.442695, %v1347_v3 }
 0x28f   : > { %v6446_v50 = vpop.eup %6445  ;;  %4583 = vst [vmem:[%s8164_s30 + $0x500] sm:$0xff] %v6444_v41  ;;  %6471 = vpow2.f32 %v5355_v23 }
 0x290   : > { %v6448_v53 = vpop.eup %6447  ;;  %4585 = vst [vmem:[%s8164_s30 + $0x510] sm:$0xff] %v6446_v50  ;;  %6473 = vpow2.f32 %v5357_v0  ;;  %v1355_v0 = vpop.f32.mrf.mxu1 }
 0x291   : > { %v6450_v33 = vpop.eup %6449  ;;  %4584 = vst [vmem:[%s8164_s30 + $0x508] sm:$0xff] %v6448_v53  ;;  %6475 = vpow2.f32 %v5366_v43  ;;  %v1090_v50 = vpop.f32.mrf.mxu0  ;;  %v5402_v53 = vmul.f32 -1.442695, %v1084_v25 }
 0x292   : > { %v6452_v1 = vpop.eup %6451  ;;  %4586 = vst [vmem:[%s8164_s30 + $0x518] sm:$0xff] %v6450_v33  ;;  %6477 = vpow2.f32 %v5368_v62  ;;  %v5393_v62 = vmul.f32 -1.442695, %v1349_v4  ;;  %v5404_v33 = vmul.f32 -1.442695, %v1353_v8 }
 0x293   : > { %v6454_v26 = vpop.eup %6453  ;;  %v3370_v16 = vadd.f32 1.0, %v6452_v1  ;;  %6479 = vpow2.f32 %v5367_v48  ;;  %v5403_v1 = vmul.f32 -1.442695, %v1086_v10  ;;  %v5414_v47 = vmul.f32 -1.442695, %v1090_v50 }
 0x294   : > { %v6456_v51 = vpop.eup %6455  ;;  %v3372_v20 = vadd.f32 1.0, %v6454_v26  ;;  %6481 = vpow2.f32 %v5369_v17  ;;  %v1359_v17 = vpop.f32.mrf.mxu1 }
 0x295   : > { %v6458_v44 = vpop.eup %6457  ;;  %6483 = vrcp.f32 %v3370_v16  ;;  %v3371_v12 = vadd.f32 1.0, %v6456_v51  ;;  %v5405_v16 = vmul.f32 -1.442695, %v1355_v0  ;;  %v1092_v51 = vpop.f32.mrf.mxu0  ;;  %v5416_v27 = vmul.f32 -1.442695, %v1359_v17 }
 0x296   : > { %v6460_v7 = vpop.eup %6459  ;;  %6485 = vrcp.f32 %v3372_v20  ;;  %v3373_v13 = vadd.f32 1.0, %v6458_v44  ;;  %v1361_v44 = vpop.f32.mrf.mxu1 }
 0x297   : > { %v6462_v21 = vpop.eup %6461  ;;  %6487 = vrcp.f32 %v3371_v12  ;;  %v3382_v28 = vadd.f32 1.0, %v6460_v7 }
 0x298   : > { %v6464_v46 = vpop.eup %6463  ;;  %6489 = vrcp.f32 %v3373_v13  ;;  %v3384_v39 = vadd.f32 1.0, %v6462_v21  ;;  %v5415_v13 = vmul.f32 -1.442695, %v1092_v51  ;;  %v1365_v38 = vpop.f32.mrf.mxu1 }
 0x299   : > { %v6466_v40 = vpop.eup %6465  ;;  %6491 = vrcp.f32 %v3382_v28  ;;  %v3383_v60 = vadd.f32 1.0, %v6464_v46  ;;  %v5417_v28 = vmul.f32 -1.442695, %v1361_v44  ;;  %v1096_v46 = vpop.f32.mrf.mxu0 }
 0x29a   : > { %v6468_v54 = vpop.eup %6467  ;;  %6493 = vrcp.f32 %v3384_v39  ;;  %v3385_v42 = vadd.f32 1.0, %v6466_v40 }
 0x29b   : > { %v6470_v52 = vpop.eup %6469  ;;  %6495 = vrcp.f32 %v3383_v60  ;;  %v3394_v9 = vadd.f32 1.0, %v6468_v54 }
 0x29c   : > { %v6472_v34 = vpop.eup %6471  ;;  %6497 = vrcp.f32 %v3385_v42  ;;  %v3396_v31 = vadd.f32 1.0, %v6470_v52  ;;  %v1098_v52 = vpop.f32.mrf.mxu0 }
 0x29d   : > { %v6474_v58 = vpop.eup %6473  ;;  %6499 = vrcp.f32 %v3394_v9  ;;  %v3395_v15 = vadd.f32 1.0, %v6472_v34  ;;  %v5427_v17 = vmul.f32 -1.442695, %v1098_v52 }
 0x29e   : > { %v6476_v45 = vpop.eup %6475  ;;  %6501 = vrcp.f32 %v3396_v31  ;;  %v3397_v61 = vadd.f32 1.0, %v6474_v58  ;;  %v1367_v31 = vpop.f32.mrf.mxu1 }
 0x29f   : > { %v6478_v24 = vpop.eup %6477  ;;  %6503 = vrcp.f32 %v3395_v15  ;;  %v3406_v35 = vadd.f32 1.0, %v6476_v45 }
 0x2a0   : > { %v6480_v55 = vpop.eup %6479  ;;  %6505 = vrcp.f32 %v3397_v61  ;;  %v3408_v63 = vadd.f32 1.0, %v6478_v24  ;;  %v1102_v24 = vpop.f32.mrf.mxu0 }
 0x2a1   : > { %v6482_v18 = vpop.eup %6481  ;;  %6507 = vrcp.f32 %v3406_v35  ;;  %v3407_v49 = vadd.f32 1.0, %v6480_v55 }
 0x2a2   : > { %v6484_v37 = vpop.eup %6483  ;;  %6509 = vrcp.f32 %v3408_v63  ;;  %v3409_v32 = vadd.f32 1.0, %v6482_v18  ;;  %v1371_v63 = vpop.f32.mrf.mxu1 }
 0x2a3   : > { %v6486_v36 = vpop.eup %6485  ;;  %4595 = vst [vmem:[%s8164_s30 + $0x560] sm:$0xff] %v6484_v37  ;;  %6511 = vrcp.f32 %v3407_v49 }
 0x2a4   : > { %v6488_v22 = vpop.eup %6487  ;;  %4597 = vst [vmem:[%s8164_s30 + $0x570] sm:$0xff] %v6486_v36  ;;  %6513 = vrcp.f32 %v3409_v32  ;;  %v1104_v32 = vpop.f32.mrf.mxu0 }
 0x2a5   : > { %v6490_v23 = vpop.eup %6489  ;;  %4596 = vst [vmem:[%s8164_s30 + $0x568] sm:$0xff] %v6488_v22  ;;  %6515 = vpow2.f32 %v5378_v57  ;;  %v5439_v44 = vmul.f32 -1.442695, %v1104_v32 }
 0x2a6   : > { %v6492_v14 = vpop.eup %6491  ;;  %4598 = vst [vmem:[%s8164_s30 + $0x578] sm:$0xff] %v6490_v23  ;;  %6517 = vpow2.f32 %v5380_v59 }
 0x2a7   : > { %v6494_v43 = vpop.eup %6493  ;;  %4607 = vst [vmem:[%s8164_s30 + $0x5c0] sm:$0xff] %v6492_v14  ;;  %6519 = vpow2.f32 %v5379_v29  ;;  %v1373_v29 = vpop.f32.mrf.mxu1 }
 0x2a8   : > { %v6496_v41 = vpop.eup %6495  ;;  %4609 = vst [vmem:[%s8164_s30 + $0x5d0] sm:$0xff] %v6494_v43  ;;  %6521 = vpow2.f32 %v5381_v6  ;;  %v1108_v14 = vpop.f32.mrf.mxu0 }
 0x2a9   : > { %v6498_v48 = vpop.eup %6497  ;;  %4608 = vst [vmem:[%s8164_s30 + $0x5c8] sm:$0xff] %v6496_v41  ;;  %6523 = vpow2.f32 %v5390_v56  ;;  %v1377_v41 = vpop.f32.mrf.mxu1 }
 0x2aa   : > { %v6500_v11 = vpop.eup %6499  ;;  %4610 = vst [vmem:[%s8164_s30 + $0x5d8] sm:$0xff] %v6498_v48  ;;  %6525 = vpow2.f32 %v5392_v30  ;;  %v5428_v48 = vmul.f32 -1.442695, %v1365_v38 }
 0x2ab   : > { %v6502_v19 = vpop.eup %6501  ;;  %4619 = vst [vmem:[%s8164_s30 + $0x620] sm:$0xff] %v6500_v11  ;;  %6527 = vpow2.f32 %v5391_v5  ;;  %v5426_v5 = vmul.f32 -1.442695, %v1096_v46 }
 0x2ac   : > { %v6504_v26 = vpop.eup %6503  ;;  %4621 = vst [vmem:[%s8164_s30 + $0x630] sm:$0xff] %v6502_v19  ;;  %6529 = vpow2.f32 %v5393_v62  ;;  %v1110_v19 = vpop.f32.mrf.mxu0 }
 0x2ad   : > { %v6506_v20 = vpop.eup %6505  ;;  %4620 = vst [vmem:[%s8164_s30 + $0x628] sm:$0xff] %v6504_v26  ;;  %6531 = vpow2.f32 %v5402_v53  ;;  %v5438_v26 = vmul.f32 -1.442695, %v1102_v24 }
 0x2ae   : > { %v6508_v12 = vpop.eup %6507  ;;  %4622 = vst [vmem:[%s8164_s30 + $0x638] sm:$0xff] %v6506_v20  ;;  %6533 = vpow2.f32 %v5404_v33  ;;  %v5429_v33 = vmul.f32 -1.442695, %v1367_v31  ;;  %v5440_v20 = vmul.f32 -1.442695, %v1371_v63 }
 0x2af   : > { %v6510_v7 = vpop.eup %6509  ;;  %4631 = vst [vmem:[%s8164_s30 + $0x680] sm:$0xff] %v6508_v12  ;;  %6535 = vpow2.f32 %v5403_v1 }
 0x2b0   : > { %v6512_v21 = vpop.eup %6511  ;;  %4633 = vst [vmem:[%s8164_s30 + $0x690] sm:$0xff] %v6510_v7  ;;  %6537 = vpow2.f32 %v5405_v16  ;;  %v1379_v16 = vpop.f32.mrf.mxu1 }
 0x2b1   : > { %v6514_v39 = vpop.eup %6513  ;;  %4632 = vst [vmem:[%s8164_s30 + $0x688] sm:$0xff] %v6512_v21  ;;  %6539 = vpow2.f32 %v5414_v47  ;;  %v1114_v7 = vpop.f32.mrf.mxu0  ;;  %v5450_v21 = vmul.f32 -1.442695, %v1108_v14 }
 0x2b2   : > { %v6516_v40 = vpop.eup %6515  ;;  %4634 = vst [vmem:[%s8164_s30 + $0x698] sm:$0xff] %v6514_v39  ;;  %6541 = vpow2.f32 %v5416_v27  ;;  %v5441_v27 = vmul.f32 -1.442695, %v1373_v29  ;;  %v5452_v39 = vmul.f32 -1.442695, %v1377_v41 }
 0x2b3   : > { %v6518_v60 = vpop.eup %6517  ;;  %v3418_v3 = vadd.f32 1.0, %v6516_v40  ;;  %6543 = vpow2.f32 %v5415_v13  ;;  %v5451_v40 = vmul.f32 -1.442695, %v1110_v19  ;;  %v5462_v52 = vmul.f32 -1.442695, %v1114_v7 }
 0x2b4   : > { %v6520_v54 = vpop.eup %6519  ;;  %v3420_v42 = vadd.f32 1.0, %v6518_v60  ;;  %6545 = vpow2.f32 %v5417_v28  ;;  %v1383_v28 = vpop.f32.mrf.mxu1 }
 0x2b5   : > { %v6522_v9 = vpop.eup %6521  ;;  %6547 = vrcp.f32 %v3418_v3  ;;  %v3419_v34 = vadd.f32 1.0, %v6520_v54  ;;  %v5453_v3 = vmul.f32 -1.442695, %v1379_v16  ;;  %v1116_v54 = vpop.f32.mrf.mxu0  ;;  %v5464_v31 = vmul.f32 -1.442695, %v1383_v28 }
 0x2b6   : > { %v6524_v2 = vpop.eup %6523  ;;  %6549 = vrcp.f32 %v3420_v42  ;;  %v3421_v58 = vadd.f32 1.0, %v6522_v9  ;;  %v1385_v9 = vpop.f32.mrf.mxu1 }
 0x2b7   : > { %v6526_v15 = vpop.eup %6525  ;;  %6551 = vrcp.f32 %v3419_v34  ;;  %v3430_v4 = vadd.f32 1.0, %v6524_v2 }
 0x2b8   : > { %v6528_v45 = vpop.eup %6527  ;;  %6553 = vrcp.f32 %v3421_v58  ;;  %v3432_v61 = vadd.f32 1.0, %v6526_v15  ;;  %v5463_v58 = vmul.f32 -1.442695, %v1116_v54  ;;  %v1389_v24 = vpop.f32.mrf.mxu1 }
 0x2b9   : > { %v6530_v35 = vpop.eup %6529  ;;  %6555 = vrcp.f32 %v3430_v4  ;;  %v3431_v55 = vadd.f32 1.0, %v6528_v45  ;;  %v5465_v4 = vmul.f32 -1.442695, %v1385_v9  ;;  %v1120_v45 = vpop.f32.mrf.mxu0 }
 0x2ba   : > { %v6532_v25 = vpop.eup %6531  ;;  %6557 = vrcp.f32 %v3432_v61  ;;  %v3433_v18 = vadd.f32 1.0, %v6530_v35 }
 0x2bb   : > { %v6534_v49 = vpop.eup %6533  ;;  %6559 = vrcp.f32 %v3431_v55  ;;  %v3442_v57 = vadd.f32 1.0, %v6532_v25 }
 0x2bc   : > { %v6536_v8 = vpop.eup %6535  ;;  %6561 = vrcp.f32 %v3433_v18  ;;  %v3444_v37 = vadd.f32 1.0, %v6534_v49  ;;  %v1122_v49 = vpop.f32.mrf.mxu0 }
 0x2bd   : > { %v6538_v59 = vpop.eup %6537  ;;  %6563 = vrcp.f32 %v3442_v57  ;;  %v3443_v36 = vadd.f32 1.0, %v6536_v8  ;;  %v5475_v28 = vmul.f32 -1.442695, %v1122_v49 }
 0x2be   : > { %v6540_v22 = vpop.eup %6539  ;;  %6565 = vrcp.f32 %v3444_v37  ;;  %v3445_v6 = vadd.f32 1.0, %v6538_v59  ;;  %v1391_v37 = vpop.f32.mrf.mxu1 }
 0x2bf   : > { %v6542_v10 = vpop.eup %6541  ;;  %6567 = vrcp.f32 %v3443_v36  ;;  %v3454_v23 = vadd.f32 1.0, %v6540_v22 }
 0x2c0   : > { %v6544_v56 = vpop.eup %6543  ;;  %6569 = vrcp.f32 %v3445_v6  ;;  %v3456_v0 = vadd.f32 1.0, %v6542_v10  ;;  %v1126_v10 = vpop.f32.mrf.mxu0 }
 0x2c1   : > { %v6546_v30 = vpop.eup %6545  ;;  %6571 = vrcp.f32 %v3454_v23  ;;  %v3455_v43 = vadd.f32 1.0, %v6544_v56 }
 0x2c2   : > { %v6548_v62 = vpop.eup %6547  ;;  %6573 = vrcp.f32 %v3456_v0  ;;  %v3457_v50 = vadd.f32 1.0, %v6546_v30  ;;  %v1395_v0 = vpop.f32.mrf.mxu1 }
 0x2c3   : > { %v6550_v53 = vpop.eup %6549  ;;  %4643 = vst [vmem:[%s8164_s30 + $0x6e0] sm:$0xff] %v6548_v62  ;;  %6575 = vrcp.f32 %v3455_v43 }
 0x2c4   : > { %v6552_v11 = vpop.eup %6551  ;;  %4645 = vst [vmem:[%s8164_s30 + $0x6f0] sm:$0xff] %v6550_v53  ;;  %6577 = vrcp.f32 %v3457_v50  ;;  %v1128_v50 = vpop.f32.mrf.mxu0 }
 0x2c5   : > { %v6554_v1 = vpop.eup %6553  ;;  %4644 = vst [vmem:[%s8164_s30 + $0x6e8] sm:$0xff] %v6552_v11  ;;  %6579 = vpow2.f32 %v5426_v5  ;;  %v5487_v9 = vmul.f32 -1.442695, %v1128_v50 }
 0x2c6   : > { %v6556_v51 = vpop.eup %6555  ;;  %4646 = vst [vmem:[%s8164_s30 + $0x6f8] sm:$0xff] %v6554_v1  ;;  %6581 = vpow2.f32 %v5428_v48 }
 0x2c7   : > { %v6558_v47 = vpop.eup %6557  ;;  %4655 = vst [vmem:[%s8164_s30 + $0x740] sm:$0xff] %v6556_v51  ;;  %6583 = vpow2.f32 %v5427_v17  ;;  %v1397_v17 = vpop.f32.mrf.mxu1 }
 0x2c8   : > { %v6560_v12 = vpop.eup %6559  ;;  %4657 = vst [vmem:[%s8164_s30 + $0x750] sm:$0xff] %v6558_v47  ;;  %6585 = vpow2.f32 %v5429_v33  ;;  %v1132_v51 = vpop.f32.mrf.mxu0 }
 0x2c9   : > { %v6562_v13 = vpop.eup %6561  ;;  %4656 = vst [vmem:[%s8164_s30 + $0x748] sm:$0xff] %v6560_v12  ;;  %6587 = vpow2.f32 %v5438_v26  ;;  %v1401_v12 = vpop.f32.mrf.mxu1 }
 0x2ca   : > { %v6564_v46 = vpop.eup %6563  ;;  %4658 = vst [vmem:[%s8164_s30 + $0x758] sm:$0xff] %v6562_v13  ;;  %6589 = vpow2.f32 %v5440_v20  ;;  %v5476_v13 = vmul.f32 -1.442695, %v1389_v24 }
 0x2cb   : > { %v6566_v38 = vpop.eup %6565  ;;  %4667 = vst [vmem:[%s8164_s30 + $0x7a0] sm:$0xff] %v6564_v46  ;;  %6591 = vpow2.f32 %v5439_v44  ;;  %v5474_v44 = vmul.f32 -1.442695, %v1120_v45 }
 0x2cc   : > { %v6568_v60 = vpop.eup %6567  ;;  %4669 = vst [vmem:[%s8164_s30 + $0x7b0] sm:$0xff] %v6566_v38  ;;  %6593 = vpow2.f32 %v5441_v27  ;;  %v1134_v38 = vpop.f32.mrf.mxu0 }
 0x2cd   : > { %v6570_v42 = vpop.eup %6569  ;;  %4668 = vst [vmem:[%s8164_s30 + $0x7a8] sm:$0xff] %v6568_v60  ;;  %6595 = vpow2.f32 %v5450_v21  ;;  %v5486_v60 = vmul.f32 -1.442695, %v1126_v10 }
 0x2ce   : > { %v6572_v34 = vpop.eup %6571  ;;  %4670 = vst [vmem:[%s8164_s30 + $0x7b8] sm:$0xff] %v6570_v42  ;;  %6597 = vpow2.f32 %v5452_v39  ;;  %v5477_v39 = vmul.f32 -1.442695, %v1391_v37  ;;  %v5488_v42 = vmul.f32 -1.442695, %v1395_v0 }
 0x2cf   : > { %v6574_v2 = vpop.eup %6573  ;;  %4679 = vst [vmem:[%s8164_s30 + $0x800] sm:$0xff] %v6572_v34  ;;  %6599 = vpow2.f32 %v5451_v40 }
 0x2d0   : > { %v6576_v15 = vpop.eup %6575  ;;  %4681 = vst [vmem:[%s8164_s30 + $0x810] sm:$0xff] %v6574_v2  ;;  %6601 = vpow2.f32 %v5453_v3  ;;  %v1403_v3 = vpop.f32.mrf.mxu1 }
 0x2d1   : > { %v6578_v61 = vpop.eup %6577  ;;  %4680 = vst [vmem:[%s8164_s30 + $0x808] sm:$0xff] %v6576_v15  ;;  %6603 = vpow2.f32 %v5462_v52  ;;  %v1138_v2 = vpop.f32.mrf.mxu0  ;;  %v5498_v15 = vmul.f32 -1.442695, %v1132_v51 }
 0x2d2   : > { %v6580_v35 = vpop.eup %6579  ;;  %4682 = vst [vmem:[%s8164_s30 + $0x818] sm:$0xff] %v6578_v61  ;;  %6605 = vpow2.f32 %v5464_v31  ;;  %v5489_v31 = vmul.f32 -1.442695, %v1397_v17  ;;  %v5500_v61 = vmul.f32 -1.442695, %v1401_v12 }
 0x2d3   : > { %v6582_v55 = vpop.eup %6581  ;;  %v3466_v63 = vadd.f32 1.0, %v6580_v35  ;;  %6607 = vpow2.f32 %v5463_v58  ;;  %v5499_v35 = vmul.f32 -1.442695, %v1134_v38  ;;  %v5510_v49 = vmul.f32 -1.442695, %v1138_v2 }
 0x2d4   : > { %v6584_v25 = vpop.eup %6583  ;;  %v3468_v18 = vadd.f32 1.0, %v6582_v55  ;;  %6609 = vpow2.f32 %v5465_v4  ;;  %v1407_v4 = vpop.f32.mrf.mxu1 }
 0x2d5   : > { %v6586_v57 = vpop.eup %6585  ;;  %6611 = vrcp.f32 %v3466_v63  ;;  %v3467_v8 = vadd.f32 1.0, %v6584_v25  ;;  %v5501_v63 = vmul.f32 -1.442695, %v1403_v3  ;;  %v1140_v25 = vpop.f32.mrf.mxu0  ;;  %v5512_v37 = vmul.f32 -1.442695, %v1407_v4 }
 0x2d6   : > { %v6588_v32 = vpop.eup %6587  ;;  %6613 = vrcp.f32 %v3468_v18  ;;  %v3469_v59 = vadd.f32 1.0, %v6586_v57  ;;  %v1409_v57 = vpop.f32.mrf.mxu1 }
 0x2d7   : > { %v6590_v36 = vpop.eup %6589  ;;  %6615 = vrcp.f32 %v3467_v8  ;;  %v3478_v29 = vadd.f32 1.0, %v6588_v32 }
 0x2d8   : > { %v6592_v22 = vpop.eup %6591  ;;  %6617 = vrcp.f32 %v3469_v59  ;;  %v3480_v6 = vadd.f32 1.0, %v6590_v36  ;;  %v5511_v59 = vmul.f32 -1.442695, %v1140_v25  ;;  %v1413_v10 = vpop.f32.mrf.mxu1 }
 0x2d9   : > { %v6594_v23 = vpop.eup %6593  ;;  %6619 = vrcp.f32 %v3478_v29  ;;  %v3479_v56 = vadd.f32 1.0, %v6592_v22  ;;  %v5513_v29 = vmul.f32 -1.442695, %v1409_v57  ;;  %v1144_v22 = vpop.f32.mrf.mxu0 }
 0x2da   : > { %v6596_v14 = vpop.eup %6595  ;;  %6621 = vrcp.f32 %v3480_v6  ;;  %v3481_v30 = vadd.f32 1.0, %v6594_v23 }
 0x2db   : > { %v6598_v43 = vpop.eup %6597  ;;  %6623 = vrcp.f32 %v3479_v56  ;;  %v3490_v5 = vadd.f32 1.0, %v6596_v14 }
 0x2dc   : > { %v6600_v41 = vpop.eup %6599  ;;  %6625 = vrcp.f32 %v3481_v30  ;;  %v3492_v62 = vadd.f32 1.0, %v6598_v43  ;;  %v1146_v43 = vpop.f32.mrf.mxu0 }
 0x2dd   : > { %v6602_v48 = vpop.eup %6601  ;;  %6627 = vrcp.f32 %v3490_v5  ;;  %v3491_v53 = vadd.f32 1.0, %v6600_v41  ;;  %v5523_v4 = vmul.f32 -1.442695, %v1146_v43 }
 0x2de   : > { %v6604_v11 = vpop.eup %6603  ;;  %6629 = vrcp.f32 %v3492_v62  ;;  %v3493_v33 = vadd.f32 1.0, %v6602_v48  ;;  %v1415_v62 = vpop.f32.mrf.mxu1 }
 0x2df   : > { %v6606_v19 = vpop.eup %6605  ;;  %6631 = vrcp.f32 %v3491_v53  ;;  %v3502_v1 = vadd.f32 1.0, %v6604_v11 }
 0x2e0   : > { %v6608_v26 = vpop.eup %6607  ;;  %6633 = vrcp.f32 %v3493_v33  ;;  %v3504_v16 = vadd.f32 1.0, %v6606_v19  ;;  %v1150_v19 = vpop.f32.mrf.mxu0 }
 0x2e1   : > { %v6610_v20 = vpop.eup %6609  ;;  %6635 = vrcp.f32 %v3502_v1  ;;  %v3503_v47 = vadd.f32 1.0, %v6608_v26 }
 0x2e2   : > { %v6612_v27 = vpop.eup %6611  ;;  %6637 = vrcp.f32 %v3504_v16  ;;  %v3505_v7 = vadd.f32 1.0, %v6610_v20  ;;  %v1419_v16 = vpop.f32.mrf.mxu1 }
 0x2e3   : > { %v6614_v21 = vpop.eup %6613  ;;  %4691 = vst [vmem:[%s8164_s30 + $0x860] sm:$0xff] %v6612_v27  ;;  %6639 = vrcp.f32 %v3503_v47 }
 0x2e4   : > { %v6616_v46 = vpop.eup %6615  ;;  %4693 = vst [vmem:[%s8164_s30 + $0x870] sm:$0xff] %v6614_v21  ;;  %6641 = vrcp.f32 %v3505_v7  ;;  %v1152_v7 = vpop.f32.mrf.mxu0 }
 0x2e5   : > { %v6618_v40 = vpop.eup %6617  ;;  %4692 = vst [vmem:[%s8164_s30 + $0x868] sm:$0xff] %v6616_v46  ;;  %6643 = vpow2.f32 %v5474_v44  ;;  %v5535_v57 = vmul.f32 -1.442695, %v1152_v7 }
 0x2e6   : > { %v6620_v54 = vpop.eup %6619  ;;  %4694 = vst [vmem:[%s8164_s30 + $0x878] sm:$0xff] %v6618_v40  ;;  %6645 = vpow2.f32 %v5476_v13 }
 0x2e7   : > { %v6622_v52 = vpop.eup %6621  ;;  %4703 = vst [vmem:[%s8164_s30 + $0x8c0] sm:$0xff] %v6620_v54  ;;  %6647 = vpow2.f32 %v5475_v28  ;;  %v1421_v28 = vpop.f32.mrf.mxu1 }
 0x2e8   : > { %v6624_v34 = vpop.eup %6623  ;;  %4705 = vst [vmem:[%s8164_s30 + $0x8d0] sm:$0xff] %v6622_v52  ;;  %6649 = vpow2.f32 %v5477_v39  ;;  %v1156_v54 = vpop.f32.mrf.mxu0 }
 0x2e9   : > { %v6626_v58 = vpop.eup %6625  ;;  %4704 = vst [vmem:[%s8164_s30 + $0x8c8] sm:$0xff] %v6624_v34  ;;  %6651 = vpow2.f32 %v5486_v60  ;;  %v1425_v34 = vpop.f32.mrf.mxu1 }
 0x2ea   : > { %v6628_v45 = vpop.eup %6627  ;;  %4706 = vst [vmem:[%s8164_s30 + $0x8d8] sm:$0xff] %v6626_v58  ;;  %6653 = vpow2.f32 %v5488_v42  ;;  %v5524_v58 = vmul.f32 -1.442695, %v1413_v10 }
 0x2eb   : > { %v6630_v24 = vpop.eup %6629  ;;  %4715 = vst [vmem:[%s8164_s30 + $0x920] sm:$0xff] %v6628_v45  ;;  %6655 = vpow2.f32 %v5487_v9  ;;  %v5522_v9 = vmul.f32 -1.442695, %v1144_v22 }
 0x2ec   : > { %v6632_v55 = vpop.eup %6631  ;;  %4717 = vst [vmem:[%s8164_s30 + $0x930] sm:$0xff] %v6630_v24  ;;  %6657 = vpow2.f32 %v5489_v31  ;;  %v1158_v24 = vpop.f32.mrf.mxu0 }
 0x2ed   : > { %v6634_v18 = vpop.eup %6633  ;;  %4716 = vst [vmem:[%s8164_s30 + $0x928] sm:$0xff] %v6632_v55  ;;  %6659 = vpow2.f32 %v5498_v15  ;;  %v5534_v55 = vmul.f32 -1.442695, %v1150_v19 }
 0x2ee   : > { %v6636_v8 = vpop.eup %6635  ;;  %4718 = vst [vmem:[%s8164_s30 + $0x938] sm:$0xff] %v6634_v18  ;;  %6661 = vpow2.f32 %v5500_v61  ;;  %v5525_v61 = vmul.f32 -1.442695, %v1415_v62  ;;  %v5536_v18 = vmul.f32 -1.442695, %v1419_v16 }
 0x2ef   : > { %v6638_v32 = vpop.eup %6637  ;;  %4727 = vst [vmem:[%s8164_s30 + $0x980] sm:$0xff] %v6636_v8  ;;  %6663 = vpow2.f32 %v5499_v35 }
 0x2f0   : > { %v6640_v36 = vpop.eup %6639  ;;  %4729 = vst [vmem:[%s8164_s30 + $0x990] sm:$0xff] %v6638_v32  ;;  %6665 = vpow2.f32 %v5501_v63  ;;  %v1427_v63 = vpop.f32.mrf.mxu1 }
 0x2f1   : > { %v6642_v6 = vpop.eup %6641  ;;  %4728 = vst [vmem:[%s8164_s30 + $0x988] sm:$0xff] %v6640_v36  ;;  %6667 = vpow2.f32 %v5510_v49  ;;  %v1162_v32 = vpop.f32.mrf.mxu0  ;;  %v5546_v36 = vmul.f32 -1.442695, %v1156_v54 }
 0x2f2   : > { %v6644_v23 = vpop.eup %6643  ;;  %4730 = vst [vmem:[%s8164_s30 + $0x998] sm:$0xff] %v6642_v6  ;;  %6669 = vpow2.f32 %v5512_v37  ;;  %v5537_v37 = vmul.f32 -1.442695, %v1421_v28  ;;  %v5548_v6 = vmul.f32 -1.442695, %v1425_v34 }
 0x2f3   : > { %v6646_v56 = vpop.eup %6645  ;;  %v3514_v0 = vadd.f32 1.0, %v6644_v23  ;;  %6671 = vpow2.f32 %v5511_v59  ;;  %v5547_v23 = vmul.f32 -1.442695, %v1158_v24  ;;  %v5558_v43 = vmul.f32 -1.442695, %v1162_v32 }
 0x2f4   : > { %v6648_v14 = vpop.eup %6647  ;;  %v3516_v30 = vadd.f32 1.0, %v6646_v56  ;;  %6673 = vpow2.f32 %v5513_v29  ;;  %v1431_v29 = vpop.f32.mrf.mxu1 }
 0x2f5   : > { %v6650_v5 = vpop.eup %6649  ;;  %6675 = vrcp.f32 %v3514_v0  ;;  %v3515_v41 = vadd.f32 1.0, %v6648_v14  ;;  %v5549_v0 = vmul.f32 -1.442695, %v1427_v63  ;;  %v1164_v14 = vpop.f32.mrf.mxu0  ;;  %v5560_v62 = vmul.f32 -1.442695, %v1431_v29 }
 0x2f6   : > { %v6652_v50 = vpop.eup %6651  ;;  %6677 = vrcp.f32 %v3516_v30  ;;  %v3517_v48 = vadd.f32 1.0, %v6650_v5  ;;  %v1433_v5 = vpop.f32.mrf.mxu1 }
 0x2f7   : > { %v6654_v53 = vpop.eup %6653  ;;  %6679 = vrcp.f32 %v3515_v41  ;;  %v3526_v17 = vadd.f32 1.0, %v6652_v50 }
 0x2f8   : > { %v6656_v11 = vpop.eup %6655  ;;  %6681 = vrcp.f32 %v3517_v48  ;;  %v3528_v33 = vadd.f32 1.0, %v6654_v53  ;;  %v5559_v48 = vmul.f32 -1.442695, %v1164_v14  ;;  %v1771_v19 = vpop.f32.mrf.mxu1 }
 0x2f9   : > { %v6658_v1 = vpop.eup %6657  ;;  %6683 = vrcp.f32 %v3526_v17  ;;  %v3527_v26 = vadd.f32 1.0, %v6656_v11  ;;  %v5561_v17 = vmul.f32 -1.442695, %v1433_v5  ;;  %v1502_v11 = vpop.f32.mrf.mxu0 }
 0x2fa   : > { %v6660_v51 = vpop.eup %6659  ;;  %6685 = vrcp.f32 %v3528_v33  ;;  %v3529_v20 = vadd.f32 1.0, %v6658_v1 }
 0x2fb   : > { %v6662_v47 = vpop.eup %6661  ;;  %6687 = vrcp.f32 %v3527_v26  ;;  %v3538_v44 = vadd.f32 1.0, %v6660_v51 }
 0x2fc   : > { %v6664_v12 = vpop.eup %6663  ;;  %6689 = vrcp.f32 %v3529_v20  ;;  %v3540_v27 = vadd.f32 1.0, %v6662_v47  ;;  %v1504_v47 = vpop.f32.mrf.mxu0 }
 0x2fd   : > { %v6666_v13 = vpop.eup %6665  ;;  %6691 = vrcp.f32 %v3538_v44  ;;  %v3539_v21 = vadd.f32 1.0, %v6664_v12  ;;  %v5167_v29 = vmul.f32 -1.442695, %v1504_v47 }
 0x2fe   : > { %v6668_v46 = vpop.eup %6667  ;;  %6693 = vrcp.f32 %v3540_v27  ;;  %v3541_v39 = vadd.f32 1.0, %v6666_v13  ;;  %v1773_v27 = vpop.f32.mrf.mxu1 }
 0x2ff   : > { %v6670_v38 = vpop.eup %6669  ;;  %6695 = vrcp.f32 %v3539_v21  ;;  %v3550_v40 = vadd.f32 1.0, %v6668_v46 }
 0x300   : > { %v6672_v60 = vpop.eup %6671  ;;  %6697 = vrcp.f32 %v3541_v39  ;;  %v3552_v3 = vadd.f32 1.0, %v6670_v38  ;;  %v1508_v38 = vpop.f32.mrf.mxu0 }
 0x301   : > { %v6674_v42 = vpop.eup %6673  ;;  %6699 = vrcp.f32 %v3550_v40  ;;  %v3551_v52 = vadd.f32 1.0, %v6672_v60 }
 0x302   : > { %v6676_v31 = vpop.eup %6675  ;;  %6701 = vrcp.f32 %v3552_v3  ;;  %v3553_v2 = vadd.f32 1.0, %v6674_v42  ;;  %v1777_v3 = vpop.f32.mrf.mxu1 }
 0x303   : > { %v6678_v15 = vpop.eup %6677  ;;  %4739 = vst [vmem:[%s8164_s30 + $0x9e0] sm:$0xff] %v6676_v31  ;;  %6703 = vrcp.f32 %v3551_v52 }
 0x304   : > { %v6680_v45 = vpop.eup %6679  ;;  %4741 = vst [vmem:[%s8164_s30 + $0x9f0] sm:$0xff] %v6678_v15  ;;  %6705 = vrcp.f32 %v3553_v2  ;;  %v1510_v2 = vpop.f32.mrf.mxu0 }
 0x305   : > { %v6682_v35 = vpop.eup %6681  ;;  %4740 = vst [vmem:[%s8164_s30 + $0x9e8] sm:$0xff] %v6680_v45  ;;  %6707 = vpow2.f32 %v5522_v9  ;;  %v5179_v5 = vmul.f32 -1.442695, %v1510_v2 }
 0x306   : > { %v6684_v25 = vpop.eup %6683  ;;  %4742 = vst [vmem:[%s8164_s30 + $0x9f8] sm:$0xff] %v6682_v35  ;;  %6709 = vpow2.f32 %v5524_v58 }
 0x307   : > { %v6686_v49 = vpop.eup %6685  ;;  %4751 = vst [vmem:[%s8164_s30 + $0xa40] sm:$0xff] %v6684_v25  ;;  %6711 = vpow2.f32 %v5523_v4  ;;  %v1779_v4 = vpop.f32.mrf.mxu1 }
 0x308   : > { %v6688_v8 = vpop.eup %6687  ;;  %4753 = vst [vmem:[%s8164_s30 + $0xa50] sm:$0xff] %v6686_v49  ;;  %6713 = vpow2.f32 %v5525_v61  ;;  %v1514_v25 = vpop.f32.mrf.mxu0 }
 0x309   : > { %v6690_v59 = vpop.eup %6689  ;;  %4752 = vst [vmem:[%s8164_s30 + $0xa48] sm:$0xff] %v6688_v8  ;;  %6715 = vpow2.f32 %v5534_v55  ;;  %v1783_v8 = vpop.f32.mrf.mxu1 }
 0x30a   : > { %v6692_v22 = vpop.eup %6691  ;;  %4754 = vst [vmem:[%s8164_s30 + $0xa58] sm:$0xff] %v6690_v59  ;;  %6717 = vpow2.f32 %v5536_v18  ;;  %v5168_v59 = vmul.f32 -1.442695, %v1771_v19 }
 0x30b   : > { %v6694_v10 = vpop.eup %6693  ;;  %4763 = vst [vmem:[%s8164_s30 + $0xaa0] sm:$0xff] %v6692_v22  ;;  %6719 = vpow2.f32 %v5535_v57  ;;  %v5166_v57 = vmul.f32 -1.442695, %v1502_v11 }
 0x30c   : > { %v6696_v56 = vpop.eup %6695  ;;  %4765 = vst [vmem:[%s8164_s30 + $0xab0] sm:$0xff] %v6694_v10  ;;  %6721 = vpow2.f32 %v5537_v37  ;;  %v1516_v10 = vpop.f32.mrf.mxu0 }
 0x30d   : > { %v6698_v30 = vpop.eup %6697  ;;  %4764 = vst [vmem:[%s8164_s30 + $0xaa8] sm:$0xff] %v6696_v56  ;;  %6723 = vpow2.f32 %v5546_v36  ;;  %v5178_v56 = vmul.f32 -1.442695, %v1508_v38 }
 0x30e   : > { %v6700_v41 = vpop.eup %6699  ;;  %4766 = vst [vmem:[%s8164_s30 + $0xab8] sm:$0xff] %v6698_v30  ;;  %6725 = vpow2.f32 %v5548_v6  ;;  %v5169_v6 = vmul.f32 -1.442695, %v1773_v27  ;;  %v5180_v30 = vmul.f32 -1.442695, %v1777_v3 }
 0x30f   : > { %v6702_v50 = vpop.eup %6701  ;;  %4775 = vst [vmem:[%s8164_s30 + $0xb00] sm:$0xff] %v6700_v41  ;;  %6727 = vpow2.f32 %v5547_v23 }
 0x310   : > { %v6704_v53 = vpop.eup %6703  ;;  %4777 = vst [vmem:[%s8164_s30 + $0xb10] sm:$0xff] %v6702_v50  ;;  %6729 = vpow2.f32 %v5549_v0  ;;  %v1785_v0 = vpop.f32.mrf.mxu1 }
 0x311   : > { %v6706_v33 = vpop.eup %6705  ;;  %4776 = vst [vmem:[%s8164_s30 + $0xb08] sm:$0xff] %v6704_v53  ;;  %6731 = vpow2.f32 %v5558_v43  ;;  %v1520_v50 = vpop.f32.mrf.mxu0  ;;  %v5190_v53 = vmul.f32 -1.442695, %v1514_v25 }
 0x312   : > { %v6708_v1 = vpop.eup %6707  ;;  %4778 = vst [vmem:[%s8164_s30 + $0xb18] sm:$0xff] %v6706_v33  ;;  %6733 = vpow2.f32 %v5560_v62  ;;  %v5181_v62 = vmul.f32 -1.442695, %v1779_v4  ;;  %v5192_v33 = vmul.f32 -1.442695, %v1783_v8 }
 0x313   : > { %v6710_v26 = vpop.eup %6709  ;;  %v3562_v16 = vadd.f32 1.0, %v6708_v1  ;;  %6735 = vpow2.f32 %v5559_v48  ;;  %v5191_v1 = vmul.f32 -1.442695, %v1516_v10  ;;  %v5202_v47 = vmul.f32 -1.442695, %v1520_v50 }
 0x314   : > { %v6712_v51 = vpop.eup %6711  ;;  %v3564_v20 = vadd.f32 1.0, %v6710_v26  ;;  %6737 = vpow2.f32 %v5561_v17  ;;  %v1789_v17 = vpop.f32.mrf.mxu1 }
 0x315   : > { %v6714_v44 = vpop.eup %6713  ;;  %6739 = vrcp.f32 %v3562_v16  ;;  %v3563_v12 = vadd.f32 1.0, %v6712_v51  ;;  %v5193_v16 = vmul.f32 -1.442695, %v1785_v0  ;;  %v1522_v51 = vpop.f32.mrf.mxu0  ;;  %v5204_v27 = vmul.f32 -1.442695, %v1789_v17 }
 0x316   : > { %v6716_v7 = vpop.eup %6715  ;;  %6741 = vrcp.f32 %v3564_v20  ;;  %v3565_v13 = vadd.f32 1.0, %v6714_v44  ;;  %v1791_v44 = vpop.f32.mrf.mxu1 }
 0x317   : > { %v6718_v21 = vpop.eup %6717  ;;  %6743 = vrcp.f32 %v3563_v12  ;;  %v3574_v28 = vadd.f32 1.0, %v6716_v7 }
 0x318   : > { %v6720_v46 = vpop.eup %6719  ;;  %6745 = vrcp.f32 %v3565_v13  ;;  %v3576_v39 = vadd.f32 1.0, %v6718_v21  ;;  %v5203_v13 = vmul.f32 -1.442695, %v1522_v51  ;;  %v1795_v38 = vpop.f32.mrf.mxu1 }
 0x319   : > { %v6722_v40 = vpop.eup %6721  ;;  %6747 = vrcp.f32 %v3574_v28  ;;  %v3575_v60 = vadd.f32 1.0, %v6720_v46  ;;  %v5205_v28 = vmul.f32 -1.442695, %v1791_v44  ;;  %v1526_v46 = vpop.f32.mrf.mxu0 }
 0x31a   : > { %v6724_v54 = vpop.eup %6723  ;;  %6749 = vrcp.f32 %v3576_v39  ;;  %v3577_v42 = vadd.f32 1.0, %v6722_v40 }
 0x31b   : > { %v6726_v52 = vpop.eup %6725  ;;  %6751 = vrcp.f32 %v3575_v60  ;;  %v3586_v9 = vadd.f32 1.0, %v6724_v54 }
 0x31c   : > { %v6728_v34 = vpop.eup %6727  ;;  %6753 = vrcp.f32 %v3577_v42  ;;  %v3588_v31 = vadd.f32 1.0, %v6726_v52  ;;  %v1528_v52 = vpop.f32.mrf.mxu0 }
 0x31d   : > { %v6730_v58 = vpop.eup %6729  ;;  %6755 = vrcp.f32 %v3586_v9  ;;  %v3587_v15 = vadd.f32 1.0, %v6728_v34  ;;  %v5215_v17 = vmul.f32 -1.442695, %v1528_v52 }
 0x31e   : > { %v6732_v45 = vpop.eup %6731  ;;  %6757 = vrcp.f32 %v3588_v31  ;;  %v3589_v61 = vadd.f32 1.0, %v6730_v58  ;;  %v1797_v31 = vpop.f32.mrf.mxu1 }
 0x31f   : > { %v6734_v24 = vpop.eup %6733  ;;  %6759 = vrcp.f32 %v3587_v15  ;;  %v3598_v35 = vadd.f32 1.0, %v6732_v45 }
 0x320   : > { %v6736_v55 = vpop.eup %6735  ;;  %6761 = vrcp.f32 %v3589_v61  ;;  %v3600_v63 = vadd.f32 1.0, %v6734_v24  ;;  %v1532_v24 = vpop.f32.mrf.mxu0 }
 0x321   : > { %v6738_v18 = vpop.eup %6737  ;;  %6763 = vrcp.f32 %v3598_v35  ;;  %v3599_v49 = vadd.f32 1.0, %v6736_v55 }
 0x322   : > { %v6740_v37 = vpop.eup %6739  ;;  %6765 = vrcp.f32 %v3600_v63  ;;  %v3601_v32 = vadd.f32 1.0, %v6738_v18  ;;  %v1801_v63 = vpop.f32.mrf.mxu1 }
 0x323   : > { %v6742_v36 = vpop.eup %6741  ;;  %4787 = vst [vmem:[%s8164_s30 + $0xb60] sm:$0xff] %v6740_v37  ;;  %6767 = vrcp.f32 %v3599_v49 }
 0x324   : > { %v6744_v22 = vpop.eup %6743  ;;  %4789 = vst [vmem:[%s8164_s30 + $0xb70] sm:$0xff] %v6742_v36  ;;  %6769 = vrcp.f32 %v3601_v32  ;;  %v1534_v32 = vpop.f32.mrf.mxu0 }
 0x325   : > { %v6746_v23 = vpop.eup %6745  ;;  %4788 = vst [vmem:[%s8164_s30 + $0xb68] sm:$0xff] %v6744_v22  ;;  %6771 = vpow2.f32 %v5166_v57  ;;  %v5227_v44 = vmul.f32 -1.442695, %v1534_v32 }
 0x326   : > { %v6748_v14 = vpop.eup %6747  ;;  %4790 = vst [vmem:[%s8164_s30 + $0xb78] sm:$0xff] %v6746_v23  ;;  %6773 = vpow2.f32 %v5168_v59 }
 0x327   : > { %v6750_v43 = vpop.eup %6749  ;;  %4799 = vst [vmem:[%s8164_s30 + $0xbc0] sm:$0xff] %v6748_v14  ;;  %6775 = vpow2.f32 %v5167_v29  ;;  %v1803_v29 = vpop.f32.mrf.mxu1 }
 0x328   : > { %v6752_v41 = vpop.eup %6751  ;;  %4801 = vst [vmem:[%s8164_s30 + $0xbd0] sm:$0xff] %v6750_v43  ;;  %6777 = vpow2.f32 %v5169_v6  ;;  %v1538_v14 = vpop.f32.mrf.mxu0 }
 0x329   : > { %v6754_v48 = vpop.eup %6753  ;;  %4800 = vst [vmem:[%s8164_s30 + $0xbc8] sm:$0xff] %v6752_v41  ;;  %6779 = vpow2.f32 %v5178_v56  ;;  %v1807_v41 = vpop.f32.mrf.mxu1 }
 0x32a   : > { %v6756_v11 = vpop.eup %6755  ;;  %4802 = vst [vmem:[%s8164_s30 + $0xbd8] sm:$0xff] %v6754_v48  ;;  %6781 = vpow2.f32 %v5180_v30  ;;  %v5216_v48 = vmul.f32 -1.442695, %v1795_v38 }
 0x32b   : > { %v6758_v19 = vpop.eup %6757  ;;  %4811 = vst [vmem:[%s8164_s30 + $0xc20] sm:$0xff] %v6756_v11  ;;  %6783 = vpow2.f32 %v5179_v5  ;;  %v5214_v5 = vmul.f32 -1.442695, %v1526_v46 }
 0x32c   : > { %v6760_v26 = vpop.eup %6759  ;;  %4813 = vst [vmem:[%s8164_s30 + $0xc30] sm:$0xff] %v6758_v19  ;;  %6785 = vpow2.f32 %v5181_v62  ;;  %v1540_v19 = vpop.f32.mrf.mxu0 }
 0x32d   : > { %v6762_v20 = vpop.eup %6761  ;;  %4812 = vst [vmem:[%s8164_s30 + $0xc28] sm:$0xff] %v6760_v26  ;;  %6787 = vpow2.f32 %v5190_v53  ;;  %v5226_v26 = vmul.f32 -1.442695, %v1532_v24 }
 0x32e   : > { %v6764_v12 = vpop.eup %6763  ;;  %4814 = vst [vmem:[%s8164_s30 + $0xc38] sm:$0xff] %v6762_v20  ;;  %6789 = vpow2.f32 %v5192_v33  ;;  %v5217_v33 = vmul.f32 -1.442695, %v1797_v31  ;;  %v5228_v20 = vmul.f32 -1.442695, %v1801_v63 }
 0x32f   : > { %v6766_v7 = vpop.eup %6765  ;;  %4823 = vst [vmem:[%s8164_s30 + $0xc80] sm:$0xff] %v6764_v12  ;;  %6791 = vpow2.f32 %v5191_v1 }
 0x330   : > { %v6768_v21 = vpop.eup %6767  ;;  %4825 = vst [vmem:[%s8164_s30 + $0xc90] sm:$0xff] %v6766_v7  ;;  %6793 = vpow2.f32 %v5193_v16  ;;  %v1809_v16 = vpop.f32.mrf.mxu1 }
 0x331   : > { %v6770_v39 = vpop.eup %6769  ;;  %4824 = vst [vmem:[%s8164_s30 + $0xc88] sm:$0xff] %v6768_v21  ;;  %6795 = vpow2.f32 %v5202_v47  ;;  %v1544_v7 = vpop.f32.mrf.mxu0  ;;  %v5238_v21 = vmul.f32 -1.442695, %v1538_v14 }
 0x332   : > { %v6772_v40 = vpop.eup %6771  ;;  %4826 = vst [vmem:[%s8164_s30 + $0xc98] sm:$0xff] %v6770_v39  ;;  %6797 = vpow2.f32 %v5204_v27  ;;  %v5229_v27 = vmul.f32 -1.442695, %v1803_v29  ;;  %v5240_v39 = vmul.f32 -1.442695, %v1807_v41 }
 0x333   : > { %v6774_v60 = vpop.eup %6773  ;;  %v3206_v3 = vadd.f32 1.0, %v6772_v40  ;;  %6799 = vpow2.f32 %v5203_v13  ;;  %v5239_v40 = vmul.f32 -1.442695, %v1540_v19  ;;  %v5250_v52 = vmul.f32 -1.442695, %v1544_v7 }
 0x334   : > { %v6776_v54 = vpop.eup %6775  ;;  %v3208_v42 = vadd.f32 1.0, %v6774_v60  ;;  %6801 = vpow2.f32 %v5205_v28  ;;  %v1813_v28 = vpop.f32.mrf.mxu1 }
 0x335   : > { %v6778_v9 = vpop.eup %6777  ;;  %6803 = vrcp.f32 %v3206_v3  ;;  %v3207_v34 = vadd.f32 1.0, %v6776_v54  ;;  %v5241_v3 = vmul.f32 -1.442695, %v1809_v16  ;;  %v1546_v54 = vpop.f32.mrf.mxu0  ;;  %v5252_v31 = vmul.f32 -1.442695, %v1813_v28 }
 0x336   : > { %v6780_v2 = vpop.eup %6779  ;;  %6805 = vrcp.f32 %v3208_v42  ;;  %v3209_v58 = vadd.f32 1.0, %v6778_v9  ;;  %v1815_v9 = vpop.f32.mrf.mxu1 }
 0x337   : > { %v6782_v15 = vpop.eup %6781  ;;  %6807 = vrcp.f32 %v3207_v34  ;;  %v3218_v4 = vadd.f32 1.0, %v6780_v2 }
 0x338   : > { %v6784_v45 = vpop.eup %6783  ;;  %6809 = vrcp.f32 %v3209_v58  ;;  %v3220_v61 = vadd.f32 1.0, %v6782_v15  ;;  %v5251_v58 = vmul.f32 -1.442695, %v1546_v54  ;;  %v1819_v24 = vpop.f32.mrf.mxu1 }
 0x339   : > { %v6786_v35 = vpop.eup %6785  ;;  %6811 = vrcp.f32 %v3218_v4  ;;  %v3219_v55 = vadd.f32 1.0, %v6784_v45  ;;  %v5253_v4 = vmul.f32 -1.442695, %v1815_v9  ;;  %v1550_v45 = vpop.f32.mrf.mxu0 }
 0x33a   : > { %v6788_v25 = vpop.eup %6787  ;;  %6813 = vrcp.f32 %v3220_v61  ;;  %v3221_v18 = vadd.f32 1.0, %v6786_v35 }
 0x33b   : > { %v6790_v49 = vpop.eup %6789  ;;  %6815 = vrcp.f32 %v3219_v55  ;;  %v3230_v57 = vadd.f32 1.0, %v6788_v25 }
 0x33c   : > { %v6792_v8 = vpop.eup %6791  ;;  %6817 = vrcp.f32 %v3221_v18  ;;  %v3232_v37 = vadd.f32 1.0, %v6790_v49  ;;  %v1552_v49 = vpop.f32.mrf.mxu0 }
 0x33d   : > { %v6794_v59 = vpop.eup %6793  ;;  %6819 = vrcp.f32 %v3230_v57  ;;  %v3231_v36 = vadd.f32 1.0, %v6792_v8  ;;  %v5263_v28 = vmul.f32 -1.442695, %v1552_v49 }
 0x33e   : > { %v6796_v22 = vpop.eup %6795  ;;  %6821 = vrcp.f32 %v3232_v37  ;;  %v3233_v6 = vadd.f32 1.0, %v6794_v59  ;;  %v1821_v37 = vpop.f32.mrf.mxu1 }
 0x33f   : > { %v6798_v10 = vpop.eup %6797  ;;  %6823 = vrcp.f32 %v3231_v36  ;;  %v3242_v23 = vadd.f32 1.0, %v6796_v22 }
 0x340   : > { %v6800_v56 = vpop.eup %6799  ;;  %6825 = vrcp.f32 %v3233_v6  ;;  %v3244_v0 = vadd.f32 1.0, %v6798_v10  ;;  %v1556_v10 = vpop.f32.mrf.mxu0 }
 0x341   : > { %v6802_v30 = vpop.eup %6801  ;;  %6827 = vrcp.f32 %v3242_v23  ;;  %v3243_v43 = vadd.f32 1.0, %v6800_v56 }
 0x342   : > { %v6804_v62 = vpop.eup %6803  ;;  %6829 = vrcp.f32 %v3244_v0  ;;  %v3245_v50 = vadd.f32 1.0, %v6802_v30  ;;  %v1825_v0 = vpop.f32.mrf.mxu1 }
 0x343   : > { %v6806_v53 = vpop.eup %6805  ;;  %4430 = vst [vmem:[%s8164_s30 + $0x40] sm:$0xff] %v6804_v62  ;;  %6831 = vrcp.f32 %v3243_v43 }
 0x344   : > { %v6808_v11 = vpop.eup %6807  ;;  %4432 = vst [vmem:[%s8164_s30 + $0x50] sm:$0xff] %v6806_v53  ;;  %6833 = vrcp.f32 %v3245_v50  ;;  %v1558_v50 = vpop.f32.mrf.mxu0 }
 0x345   : > { %v6810_v1 = vpop.eup %6809  ;;  %4431 = vst [vmem:[%s8164_s30 + $0x48] sm:$0xff] %v6808_v11  ;;  %6835 = vpow2.f32 %v5214_v5  ;;  %v5275_v9 = vmul.f32 -1.442695, %v1558_v50 }
 0x346   : > { %v6812_v51 = vpop.eup %6811  ;;  %4434 = vst.msk [vmem:[%s8164_s30 + $0x58] sm:$0xff] %vm4433_vm1, %v6810_v1  ;;  %6837 = vpow2.f32 %v5216_v48 }
 0x347   : > { %v6814_v47 = vpop.eup %6813  ;;  %4443 = vst [vmem:[%s8164_s30 + $0xa0] sm:$0xff] %v6812_v51  ;;  %6839 = vpow2.f32 %v5215_v17  ;;  %v1827_v17 = vpop.f32.mrf.mxu1 }
 0x348   : > { %v6816_v12 = vpop.eup %6815  ;;  %4445 = vst [vmem:[%s8164_s30 + $0xb0] sm:$0xff] %v6814_v47  ;;  %6841 = vpow2.f32 %v5217_v33  ;;  %v1562_v51 = vpop.f32.mrf.mxu0 }
 0x349   : > { %v6818_v13 = vpop.eup %6817  ;;  %4444 = vst [vmem:[%s8164_s30 + $0xa8] sm:$0xff] %v6816_v12  ;;  %6843 = vpow2.f32 %v5226_v26  ;;  %v1831_v12 = vpop.f32.mrf.mxu1 }
 0x34a   : > { %v6820_v46 = vpop.eup %6819  ;;  %4446 = vst.msk [vmem:[%s8164_s30 + $0xb8] sm:$0xff] %vm4433_vm1, %v6818_v13  ;;  %6845 = vpow2.f32 %v5228_v20  ;;  %v5264_v13 = vmul.f32 -1.442695, %v1819_v24 }
 0x34b   : > { %v6822_v38 = vpop.eup %6821  ;;  %4455 = vst [vmem:[%s8164_s30 + $0x100] sm:$0xff] %v6820_v46  ;;  %6847 = vpow2.f32 %v5227_v44  ;;  %v5262_v44 = vmul.f32 -1.442695, %v1550_v45 }
 0x34c   : > { %v6824_v60 = vpop.eup %6823  ;;  %4457 = vst [vmem:[%s8164_s30 + $0x110] sm:$0xff] %v6822_v38  ;;  %6849 = vpow2.f32 %v5229_v27  ;;  %v1564_v38 = vpop.f32.mrf.mxu0 }
 0x34d   : > { %v6826_v42 = vpop.eup %6825  ;;  %4456 = vst [vmem:[%s8164_s30 + $0x108] sm:$0xff] %v6824_v60  ;;  %6851 = vpow2.f32 %v5238_v21  ;;  %v5274_v60 = vmul.f32 -1.442695, %v1556_v10 }
 0x34e   : > { %v6828_v34 = vpop.eup %6827  ;;  %4458 = vst.msk [vmem:[%s8164_s30 + $0x118] sm:$0xff] %vm4433_vm1, %v6826_v42  ;;  %6853 = vpow2.f32 %v5240_v39  ;;  %v5265_v39 = vmul.f32 -1.442695, %v1821_v37  ;;  %v5276_v42 = vmul.f32 -1.442695, %v1825_v0 }
 0x34f   : > { %v6830_v2 = vpop.eup %6829  ;;  %4467 = vst [vmem:[%s8164_s30 + $0x160] sm:$0xff] %v6828_v34  ;;  %6855 = vpow2.f32 %v5239_v40 }
 0x350   : > { %v6832_v15 = vpop.eup %6831  ;;  %4469 = vst [vmem:[%s8164_s30 + $0x170] sm:$0xff] %v6830_v2  ;;  %6857 = vpow2.f32 %v5241_v3  ;;  %v1833_v3 = vpop.f32.mrf.mxu1 }
 0x351   : > { %v6834_v61 = vpop.eup %6833  ;;  %4468 = vst [vmem:[%s8164_s30 + $0x168] sm:$0xff] %v6832_v15  ;;  %6859 = vpow2.f32 %v5250_v52  ;;  %v1568_v2 = vpop.f32.mrf.mxu0  ;;  %v5286_v15 = vmul.f32 -1.442695, %v1562_v51 }
 0x352   : > { %v6836_v35 = vpop.eup %6835  ;;  %4470 = vst.msk [vmem:[%s8164_s30 + $0x178] sm:$0xff] %vm4433_vm1, %v6834_v61  ;;  %6861 = vpow2.f32 %v5252_v31  ;;  %v5277_v31 = vmul.f32 -1.442695, %v1827_v17  ;;  %v5288_v61 = vmul.f32 -1.442695, %v1831_v12 }
 0x353   : > { %v6838_v55 = vpop.eup %6837  ;;  %v3254_v63 = vadd.f32 1.0, %v6836_v35  ;;  %6863 = vpow2.f32 %v5251_v58  ;;  %v5287_v35 = vmul.f32 -1.442695, %v1564_v38  ;;  %v5298_v49 = vmul.f32 -1.442695, %v1568_v2 }
 0x354   : > { %v6840_v25 = vpop.eup %6839  ;;  %v3256_v18 = vadd.f32 1.0, %v6838_v55  ;;  %6865 = vpow2.f32 %v5253_v4  ;;  %v1837_v4 = vpop.f32.mrf.mxu1 }
 0x355   : > { %v6842_v57 = vpop.eup %6841  ;;  %6867 = vrcp.f32 %v3254_v63  ;;  %v3255_v8 = vadd.f32 1.0, %v6840_v25  ;;  %v5289_v63 = vmul.f32 -1.442695, %v1833_v3  ;;  %v1570_v25 = vpop.f32.mrf.mxu0  ;;  %v5300_v37 = vmul.f32 -1.442695, %v1837_v4 }
 0x356   : > { %v6844_v32 = vpop.eup %6843  ;;  %6869 = vrcp.f32 %v3256_v18  ;;  %v3257_v59 = vadd.f32 1.0, %v6842_v57  ;;  %v1839_v57 = vpop.f32.mrf.mxu1 }
 0x357   : > { %v6846_v36 = vpop.eup %6845  ;;  %6871 = vrcp.f32 %v3255_v8  ;;  %v3266_v29 = vadd.f32 1.0, %v6844_v32 }
 0x358   : > { %v6848_v22 = vpop.eup %6847  ;;  %6873 = vrcp.f32 %v3257_v59  ;;  %v3268_v6 = vadd.f32 1.0, %v6846_v36  ;;  %v5299_v59 = vmul.f32 -1.442695, %v1570_v25  ;;  %v1843_v10 = vpop.f32.mrf.mxu1 }
 0x359   : > { %v6850_v23 = vpop.eup %6849  ;;  %6875 = vrcp.f32 %v3266_v29  ;;  %v3267_v56 = vadd.f32 1.0, %v6848_v22  ;;  %v5301_v29 = vmul.f32 -1.442695, %v1839_v57  ;;  %v1574_v22 = vpop.f32.mrf.mxu0 }
 0x35a   : > { %v6852_v14 = vpop.eup %6851  ;;  %6877 = vrcp.f32 %v3268_v6  ;;  %v3269_v30 = vadd.f32 1.0, %v6850_v23 }
 0x35b   : > { %v6854_v43 = vpop.eup %6853  ;;  %6879 = vrcp.f32 %v3267_v56  ;;  %v3278_v5 = vadd.f32 1.0, %v6852_v14 }
 0x35c   : > { %v6856_v41 = vpop.eup %6855  ;;  %6881 = vrcp.f32 %v3269_v30  ;;  %v3280_v62 = vadd.f32 1.0, %v6854_v43  ;;  %v1576_v43 = vpop.f32.mrf.mxu0 }
 0x35d   : > { %v6858_v48 = vpop.eup %6857  ;;  %6883 = vrcp.f32 %v3278_v5  ;;  %v3279_v53 = vadd.f32 1.0, %v6856_v41  ;;  %v5311_v4 = vmul.f32 -1.442695, %v1576_v43 }
 0x35e   : > { %v6860_v11 = vpop.eup %6859  ;;  %6885 = vrcp.f32 %v3280_v62  ;;  %v3281_v33 = vadd.f32 1.0, %v6858_v48  ;;  %v1845_v62 = vpop.f32.mrf.mxu1 }
 0x35f   : > { %v6862_v19 = vpop.eup %6861  ;;  %6887 = vrcp.f32 %v3279_v53  ;;  %v3290_v1 = vadd.f32 1.0, %v6860_v11 }
 0x360   : > { %v6864_v26 = vpop.eup %6863  ;;  %6889 = vrcp.f32 %v3281_v33  ;;  %v3292_v16 = vadd.f32 1.0, %v6862_v19  ;;  %v1580_v19 = vpop.f32.mrf.mxu0 }
 0x361   : > { %v6866_v20 = vpop.eup %6865  ;;  %6891 = vrcp.f32 %v3290_v1  ;;  %v3291_v47 = vadd.f32 1.0, %v6864_v26 }
 0x362   : > { %v6868_v27 = vpop.eup %6867  ;;  %6893 = vrcp.f32 %v3292_v16  ;;  %v3293_v7 = vadd.f32 1.0, %v6866_v20  ;;  %v1849_v16 = vpop.f32.mrf.mxu1 }
 0x363   : > { %v6870_v21 = vpop.eup %6869  ;;  %4479 = vst [vmem:[%s8164_s30 + $0x1c0] sm:$0xff] %v6868_v27  ;;  %6895 = vrcp.f32 %v3291_v47 }
 0x364   : > { %v6872_v46 = vpop.eup %6871  ;;  %4481 = vst [vmem:[%s8164_s30 + $0x1d0] sm:$0xff] %v6870_v21  ;;  %6897 = vrcp.f32 %v3293_v7  ;;  %v1582_v7 = vpop.f32.mrf.mxu0 }
 0x365   : > { %v6874_v40 = vpop.eup %6873  ;;  %4480 = vst [vmem:[%s8164_s30 + $0x1c8] sm:$0xff] %v6872_v46  ;;  %6899 = vpow2.f32 %v5262_v44  ;;  %v5323_v57 = vmul.f32 -1.442695, %v1582_v7 }
 0x366   : > { %v6876_v54 = vpop.eup %6875  ;;  %4482 = vst.msk [vmem:[%s8164_s30 + $0x1d8] sm:$0xff] %vm4433_vm1, %v6874_v40  ;;  %6901 = vpow2.f32 %v5264_v13 }
 0x367   : > { %v6878_v52 = vpop.eup %6877  ;;  %4491 = vst [vmem:[%s8164_s30 + $0x220] sm:$0xff] %v6876_v54  ;;  %6903 = vpow2.f32 %v5263_v28  ;;  %v1851_v28 = vpop.f32.mrf.mxu1 }
 0x368   : > { %v6880_v34 = vpop.eup %6879  ;;  %4493 = vst [vmem:[%s8164_s30 + $0x230] sm:$0xff] %v6878_v52  ;;  %6905 = vpow2.f32 %v5265_v39  ;;  %v1586_v54 = vpop.f32.mrf.mxu0 }
 0x369   : > { %v6882_v58 = vpop.eup %6881  ;;  %4492 = vst [vmem:[%s8164_s30 + $0x228] sm:$0xff] %v6880_v34  ;;  %6907 = vpow2.f32 %v5274_v60  ;;  %v1855_v34 = vpop.f32.mrf.mxu1 }
 0x36a   : > { %v6884_v45 = vpop.eup %6883  ;;  %4494 = vst.msk [vmem:[%s8164_s30 + $0x238] sm:$0xff] %vm4433_vm1, %v6882_v58  ;;  %6909 = vpow2.f32 %v5276_v42  ;;  %v5312_v58 = vmul.f32 -1.442695, %v1843_v10 }
 0x36b   : > { %v6886_v24 = vpop.eup %6885  ;;  %4503 = vst [vmem:[%s8164_s30 + $0x280] sm:$0xff] %v6884_v45  ;;  %6911 = vpow2.f32 %v5275_v9  ;;  %v5310_v9 = vmul.f32 -1.442695, %v1574_v22 }
 0x36c   : > { %v6888_v55 = vpop.eup %6887  ;;  %4505 = vst [vmem:[%s8164_s30 + $0x290] sm:$0xff] %v6886_v24  ;;  %6913 = vpow2.f32 %v5277_v31  ;;  %v1588_v24 = vpop.f32.mrf.mxu0 }
 0x36d   : > { %v6890_v18 = vpop.eup %6889  ;;  %4504 = vst [vmem:[%s8164_s30 + $0x288] sm:$0xff] %v6888_v55  ;;  %6915 = vpow2.f32 %v5286_v15  ;;  %v5322_v55 = vmul.f32 -1.442695, %v1580_v19 }
 0x36e   : > { %v6892_v8 = vpop.eup %6891  ;;  %4506 = vst.msk [vmem:[%s8164_s30 + $0x298] sm:$0xff] %vm4433_vm1, %v6890_v18  ;;  %6917 = vpow2.f32 %v5288_v61  ;;  %v5313_v61 = vmul.f32 -1.442695, %v1845_v62  ;;  %v5324_v18 = vmul.f32 -1.442695, %v1849_v16 }
 0x36f   : > { %v6894_v32 = vpop.eup %6893  ;;  %4515 = vst [vmem:[%s8164_s30 + $0x2e0] sm:$0xff] %v6892_v8  ;;  %6919 = vpow2.f32 %v5287_v35 }
 0x370   : > { %v6896_v36 = vpop.eup %6895  ;;  %4517 = vst [vmem:[%s8164_s30 + $0x2f0] sm:$0xff] %v6894_v32  ;;  %6921 = vpow2.f32 %v5289_v63  ;;  %v1857_v63 = vpop.f32.mrf.mxu1 }
 0x371   : > { %v6898_v6 = vpop.eup %6897  ;;  %4516 = vst [vmem:[%s8164_s30 + $0x2e8] sm:$0xff] %v6896_v36  ;;  %6923 = vpow2.f32 %v5298_v49  ;;  %v1592_v32 = vpop.f32.mrf.mxu0  ;;  %v5334_v36 = vmul.f32 -1.442695, %v1586_v54 }
 0x372   : > { %v6900_v23 = vpop.eup %6899  ;;  %4518 = vst.msk [vmem:[%s8164_s30 + $0x2f8] sm:$0xff] %vm4433_vm1, %v6898_v6  ;;  %6925 = vpow2.f32 %v5300_v37  ;;  %v5325_v37 = vmul.f32 -1.442695, %v1851_v28  ;;  %v5336_v6 = vmul.f32 -1.442695, %v1855_v34 }
 0x373   : > { %v6902_v56 = vpop.eup %6901  ;;  %v3302_v0 = vadd.f32 1.0, %v6900_v23  ;;  %6927 = vpow2.f32 %v5299_v59  ;;  %v5335_v23 = vmul.f32 -1.442695, %v1588_v24  ;;  %v5346_v43 = vmul.f32 -1.442695, %v1592_v32 }
 0x374   : > { %v6904_v14 = vpop.eup %6903  ;;  %v3304_v30 = vadd.f32 1.0, %v6902_v56  ;;  %6929 = vpow2.f32 %v5301_v29  ;;  %v1861_v29 = vpop.f32.mrf.mxu1 }
 0x375   : > { %v6906_v5 = vpop.eup %6905  ;;  %6931 = vrcp.f32 %v3302_v0  ;;  %v3303_v41 = vadd.f32 1.0, %v6904_v14  ;;  %v5337_v0 = vmul.f32 -1.442695, %v1857_v63  ;;  %v1594_v14 = vpop.f32.mrf.mxu0  ;;  %v5348_v62 = vmul.f32 -1.442695, %v1861_v29 }
 0x376   : > { %v6908_v50 = vpop.eup %6907  ;;  %6933 = vrcp.f32 %v3304_v30  ;;  %v3305_v48 = vadd.f32 1.0, %v6906_v5  ;;  %v1863_v5 = vpop.f32.mrf.mxu1 }
 0x377   : > { %v6910_v53 = vpop.eup %6909  ;;  %6935 = vrcp.f32 %v3303_v41  ;;  %v3314_v17 = vadd.f32 1.0, %v6908_v50 }
 0x378   : > { %v6912_v11 = vpop.eup %6911  ;;  %6937 = vrcp.f32 %v3305_v48  ;;  %v3316_v33 = vadd.f32 1.0, %v6910_v53  ;;  %v5347_v48 = vmul.f32 -1.442695, %v1594_v14  ;;  %v1867_v19 = vpop.f32.mrf.mxu1 }
 0x379   : > { %v6914_v1 = vpop.eup %6913  ;;  %6939 = vrcp.f32 %v3314_v17  ;;  %v3315_v26 = vadd.f32 1.0, %v6912_v11  ;;  %v5349_v17 = vmul.f32 -1.442695, %v1863_v5  ;;  %v1598_v11 = vpop.f32.mrf.mxu0 }
 0x37a   : > { %v6916_v51 = vpop.eup %6915  ;;  %6941 = vrcp.f32 %v3316_v33  ;;  %v3317_v20 = vadd.f32 1.0, %v6914_v1 }
 0x37b   : > { %v6918_v47 = vpop.eup %6917  ;;  %6943 = vrcp.f32 %v3315_v26  ;;  %v3326_v44 = vadd.f32 1.0, %v6916_v51 }
 0x37c   : > { %v6920_v12 = vpop.eup %6919  ;;  %6945 = vrcp.f32 %v3317_v20  ;;  %v3328_v27 = vadd.f32 1.0, %v6918_v47  ;;  %v1600_v47 = vpop.f32.mrf.mxu0 }
 0x37d   : > { %v6922_v13 = vpop.eup %6921  ;;  %6947 = vrcp.f32 %v3326_v44  ;;  %v3327_v21 = vadd.f32 1.0, %v6920_v12  ;;  %v5359_v29 = vmul.f32 -1.442695, %v1600_v47 }
 0x37e   : > { %v6924_v46 = vpop.eup %6923  ;;  %6949 = vrcp.f32 %v3328_v27  ;;  %v3329_v39 = vadd.f32 1.0, %v6922_v13  ;;  %v1869_v27 = vpop.f32.mrf.mxu1 }
 0x37f   : > { %v6926_v38 = vpop.eup %6925  ;;  %6951 = vrcp.f32 %v3327_v21  ;;  %v3338_v40 = vadd.f32 1.0, %v6924_v46 }
 0x380   : > { %v6928_v60 = vpop.eup %6927  ;;  %6953 = vrcp.f32 %v3329_v39  ;;  %v3340_v3 = vadd.f32 1.0, %v6926_v38  ;;  %v1604_v38 = vpop.f32.mrf.mxu0 }
 0x381   : > { %v6930_v42 = vpop.eup %6929  ;;  %6955 = vrcp.f32 %v3338_v40  ;;  %v3339_v52 = vadd.f32 1.0, %v6928_v60 }
 0x382   : > { %v6932_v31 = vpop.eup %6931  ;;  %6957 = vrcp.f32 %v3340_v3  ;;  %v3341_v2 = vadd.f32 1.0, %v6930_v42  ;;  %v1873_v3 = vpop.f32.mrf.mxu1 }
 0x383   : > { %v6934_v15 = vpop.eup %6933  ;;  %4527 = vst [vmem:[%s8164_s30 + $0x340] sm:$0xff] %v6932_v31  ;;  %6959 = vrcp.f32 %v3339_v52 }
 0x384   : > { %v6936_v45 = vpop.eup %6935  ;;  %4529 = vst [vmem:[%s8164_s30 + $0x350] sm:$0xff] %v6934_v15  ;;  %6961 = vrcp.f32 %v3341_v2  ;;  %v1606_v2 = vpop.f32.mrf.mxu0 }
 0x385   : > { %v6938_v35 = vpop.eup %6937  ;;  %4528 = vst [vmem:[%s8164_s30 + $0x348] sm:$0xff] %v6936_v45  ;;  %6963 = vpow2.f32 %v5310_v9  ;;  %v5371_v5 = vmul.f32 -1.442695, %v1606_v2 }
 0x386   : > { %v6940_v25 = vpop.eup %6939  ;;  %4530 = vst.msk [vmem:[%s8164_s30 + $0x358] sm:$0xff] %vm4433_vm1, %v6938_v35  ;;  %6965 = vpow2.f32 %v5312_v58 }
 0x387   : > { %v6942_v49 = vpop.eup %6941  ;;  %4539 = vst [vmem:[%s8164_s30 + $0x3a0] sm:$0xff] %v6940_v25  ;;  %6967 = vpow2.f32 %v5311_v4  ;;  %v1875_v4 = vpop.f32.mrf.mxu1 }
 0x388   : > { %v6944_v8 = vpop.eup %6943  ;;  %4541 = vst [vmem:[%s8164_s30 + $0x3b0] sm:$0xff] %v6942_v49  ;;  %6969 = vpow2.f32 %v5313_v61  ;;  %v1610_v25 = vpop.f32.mrf.mxu0 }
 0x389   : > { %v6946_v59 = vpop.eup %6945  ;;  %4540 = vst [vmem:[%s8164_s30 + $0x3a8] sm:$0xff] %v6944_v8  ;;  %6971 = vpow2.f32 %v5322_v55  ;;  %v1879_v8 = vpop.f32.mrf.mxu1 }
 0x38a   : > { %v6948_v22 = vpop.eup %6947  ;;  %4542 = vst.msk [vmem:[%s8164_s30 + $0x3b8] sm:$0xff] %vm4433_vm1, %v6946_v59  ;;  %6973 = vpow2.f32 %v5324_v18  ;;  %v5360_v59 = vmul.f32 -1.442695, %v1867_v19 }
 0x38b   : > { %v6950_v10 = vpop.eup %6949  ;;  %4551 = vst [vmem:[%s8164_s30 + $0x400] sm:$0xff] %v6948_v22  ;;  %6975 = vpow2.f32 %v5323_v57  ;;  %v5358_v57 = vmul.f32 -1.442695, %v1598_v11 }
 0x38c   : > { %v6952_v56 = vpop.eup %6951  ;;  %4553 = vst [vmem:[%s8164_s30 + $0x410] sm:$0xff] %v6950_v10  ;;  %6977 = vpow2.f32 %v5325_v37  ;;  %v1612_v10 = vpop.f32.mrf.mxu0 }
 0x38d   : > { %v6954_v30 = vpop.eup %6953  ;;  %4552 = vst [vmem:[%s8164_s30 + $0x408] sm:$0xff] %v6952_v56  ;;  %6979 = vpow2.f32 %v5334_v36  ;;  %v5370_v56 = vmul.f32 -1.442695, %v1604_v38 }
 0x38e   : > { %v6956_v41 = vpop.eup %6955  ;;  %4554 = vst.msk [vmem:[%s8164_s30 + $0x418] sm:$0xff] %vm4433_vm1, %v6954_v30  ;;  %6981 = vpow2.f32 %v5336_v6  ;;  %v5361_v6 = vmul.f32 -1.442695, %v1869_v27  ;;  %v5372_v30 = vmul.f32 -1.442695, %v1873_v3 }
 0x38f   : > { %v6958_v50 = vpop.eup %6957  ;;  %4563 = vst [vmem:[%s8164_s30 + $0x460] sm:$0xff] %v6956_v41  ;;  %6983 = vpow2.f32 %v5335_v23 }
 0x390   : > { %v6960_v53 = vpop.eup %6959  ;;  %4565 = vst [vmem:[%s8164_s30 + $0x470] sm:$0xff] %v6958_v50  ;;  %6985 = vpow2.f32 %v5337_v0  ;;  %v1881_v0 = vpop.f32.mrf.mxu1 }
 0x391   : > { %v6962_v33 = vpop.eup %6961  ;;  %4564 = vst [vmem:[%s8164_s30 + $0x468] sm:$0xff] %v6960_v53  ;;  %6987 = vpow2.f32 %v5346_v43  ;;  %v1616_v50 = vpop.f32.mrf.mxu0  ;;  %v5382_v53 = vmul.f32 -1.442695, %v1610_v25 }
 0x392   : > { %v6964_v1 = vpop.eup %6963  ;;  %4566 = vst.msk [vmem:[%s8164_s30 + $0x478] sm:$0xff] %vm4433_vm1, %v6962_v33  ;;  %6989 = vpow2.f32 %v5348_v62  ;;  %v5373_v62 = vmul.f32 -1.442695, %v1875_v4  ;;  %v5384_v33 = vmul.f32 -1.442695, %v1879_v8 }
 0x393   : > { %v6966_v26 = vpop.eup %6965  ;;  %v3350_v16 = vadd.f32 1.0, %v6964_v1  ;;  %6991 = vpow2.f32 %v5347_v48  ;;  %v5383_v1 = vmul.f32 -1.442695, %v1612_v10  ;;  %v5394_v47 = vmul.f32 -1.442695, %v1616_v50 }
 0x394   : > { %v6968_v51 = vpop.eup %6967  ;;  %v3352_v20 = vadd.f32 1.0, %v6966_v26  ;;  %6993 = vpow2.f32 %v5349_v17  ;;  %v1885_v17 = vpop.f32.mrf.mxu1 }
 0x395   : > { %v6970_v44 = vpop.eup %6969  ;;  %6995 = vrcp.f32 %v3350_v16  ;;  %v3351_v12 = vadd.f32 1.0, %v6968_v51  ;;  %v5385_v16 = vmul.f32 -1.442695, %v1881_v0  ;;  %v1618_v51 = vpop.f32.mrf.mxu0  ;;  %v5396_v27 = vmul.f32 -1.442695, %v1885_v17 }
 0x396   : > { %v6972_v7 = vpop.eup %6971  ;;  %6997 = vrcp.f32 %v3352_v20  ;;  %v3353_v13 = vadd.f32 1.0, %v6970_v44  ;;  %v1887_v44 = vpop.f32.mrf.mxu1 }
 0x397   : > { %v6974_v21 = vpop.eup %6973  ;;  %6999 = vrcp.f32 %v3351_v12  ;;  %v3362_v28 = vadd.f32 1.0, %v6972_v7 }
 0x398   : > { %v6976_v46 = vpop.eup %6975  ;;  %7001 = vrcp.f32 %v3353_v13  ;;  %v3364_v39 = vadd.f32 1.0, %v6974_v21  ;;  %v5395_v13 = vmul.f32 -1.442695, %v1618_v51  ;;  %v1891_v38 = vpop.f32.mrf.mxu1 }
 0x399   : > { %v6978_v40 = vpop.eup %6977  ;;  %7003 = vrcp.f32 %v3362_v28  ;;  %v3363_v60 = vadd.f32 1.0, %v6976_v46  ;;  %v5397_v28 = vmul.f32 -1.442695, %v1887_v44  ;;  %v1622_v46 = vpop.f32.mrf.mxu0 }
 0x39a   : > { %v6980_v54 = vpop.eup %6979  ;;  %7005 = vrcp.f32 %v3364_v39  ;;  %v3365_v42 = vadd.f32 1.0, %v6978_v40 }
 0x39b   : > { %v6982_v52 = vpop.eup %6981  ;;  %7007 = vrcp.f32 %v3363_v60  ;;  %v3374_v9 = vadd.f32 1.0, %v6980_v54 }
 0x39c   : > { %v6984_v34 = vpop.eup %6983  ;;  %7009 = vrcp.f32 %v3365_v42  ;;  %v3376_v31 = vadd.f32 1.0, %v6982_v52  ;;  %v1624_v52 = vpop.f32.mrf.mxu0 }
 0x39d   : > { %v6986_v58 = vpop.eup %6985  ;;  %7011 = vrcp.f32 %v3374_v9  ;;  %v3375_v15 = vadd.f32 1.0, %v6984_v34  ;;  %v5407_v17 = vmul.f32 -1.442695, %v1624_v52 }
 0x39e   : > { %v6988_v45 = vpop.eup %6987  ;;  %7013 = vrcp.f32 %v3376_v31  ;;  %v3377_v61 = vadd.f32 1.0, %v6986_v58  ;;  %v1893_v31 = vpop.f32.mrf.mxu1 }
 0x39f   : > { %v6990_v24 = vpop.eup %6989  ;;  %7015 = vrcp.f32 %v3375_v15  ;;  %v3386_v35 = vadd.f32 1.0, %v6988_v45 }
 0x3a0   : > { %v6992_v55 = vpop.eup %6991  ;;  %7017 = vrcp.f32 %v3377_v61  ;;  %v3388_v63 = vadd.f32 1.0, %v6990_v24  ;;  %v1628_v24 = vpop.f32.mrf.mxu0 }
 0x3a1   : > { %v6994_v18 = vpop.eup %6993  ;;  %7019 = vrcp.f32 %v3386_v35  ;;  %v3387_v49 = vadd.f32 1.0, %v6992_v55 }
 0x3a2   : > { %v6996_v37 = vpop.eup %6995  ;;  %7021 = vrcp.f32 %v3388_v63  ;;  %v3389_v32 = vadd.f32 1.0, %v6994_v18  ;;  %v1897_v63 = vpop.f32.mrf.mxu1 }
 0x3a3   : > { %v6998_v36 = vpop.eup %6997  ;;  %4575 = vst [vmem:[%s8164_s30 + $0x4c0] sm:$0xff] %v6996_v37  ;;  %7023 = vrcp.f32 %v3387_v49 }
 0x3a4   : > { %v7000_v22 = vpop.eup %6999  ;;  %4577 = vst [vmem:[%s8164_s30 + $0x4d0] sm:$0xff] %v6998_v36  ;;  %7025 = vrcp.f32 %v3389_v32  ;;  %v1630_v32 = vpop.f32.mrf.mxu0 }
 0x3a5   : > { %v7002_v23 = vpop.eup %7001  ;;  %4576 = vst [vmem:[%s8164_s30 + $0x4c8] sm:$0xff] %v7000_v22  ;;  %7027 = vpow2.f32 %v5358_v57  ;;  %v5419_v44 = vmul.f32 -1.442695, %v1630_v32 }
 0x3a6   : > { %v7004_v14 = vpop.eup %7003  ;;  %4578 = vst.msk [vmem:[%s8164_s30 + $0x4d8] sm:$0xff] %vm4433_vm1, %v7002_v23  ;;  %7029 = vpow2.f32 %v5360_v59 }
 0x3a7   : > { %v7006_v43 = vpop.eup %7005  ;;  %4587 = vst [vmem:[%s8164_s30 + $0x520] sm:$0xff] %v7004_v14  ;;  %7031 = vpow2.f32 %v5359_v29  ;;  %v1899_v29 = vpop.f32.mrf.mxu1 }
 0x3a8   : > { %v7008_v41 = vpop.eup %7007  ;;  %4589 = vst [vmem:[%s8164_s30 + $0x530] sm:$0xff] %v7006_v43  ;;  %7033 = vpow2.f32 %v5361_v6  ;;  %v1634_v14 = vpop.f32.mrf.mxu0 }
 0x3a9   : > { %v7010_v48 = vpop.eup %7009  ;;  %4588 = vst [vmem:[%s8164_s30 + $0x528] sm:$0xff] %v7008_v41  ;;  %7035 = vpow2.f32 %v5370_v56  ;;  %v1903_v41 = vpop.f32.mrf.mxu1 }
 0x3aa   : > { %v7012_v11 = vpop.eup %7011  ;;  %4590 = vst.msk [vmem:[%s8164_s30 + $0x538] sm:$0xff] %vm4433_vm1, %v7010_v48  ;;  %7037 = vpow2.f32 %v5372_v30  ;;  %v5408_v48 = vmul.f32 -1.442695, %v1891_v38 }
 0x3ab   : > { %v7014_v19 = vpop.eup %7013  ;;  %4599 = vst [vmem:[%s8164_s30 + $0x580] sm:$0xff] %v7012_v11  ;;  %7039 = vpow2.f32 %v5371_v5  ;;  %v5406_v5 = vmul.f32 -1.442695, %v1622_v46 }
 0x3ac   : > { %v7016_v26 = vpop.eup %7015  ;;  %4601 = vst [vmem:[%s8164_s30 + $0x590] sm:$0xff] %v7014_v19  ;;  %7041 = vpow2.f32 %v5373_v62  ;;  %v1636_v19 = vpop.f32.mrf.mxu0 }
 0x3ad   : > { %v7018_v20 = vpop.eup %7017  ;;  %4600 = vst [vmem:[%s8164_s30 + $0x588] sm:$0xff] %v7016_v26  ;;  %7043 = vpow2.f32 %v5382_v53  ;;  %v5418_v26 = vmul.f32 -1.442695, %v1628_v24 }
 0x3ae   : > { %v7020_v12 = vpop.eup %7019  ;;  %4602 = vst.msk [vmem:[%s8164_s30 + $0x598] sm:$0xff] %vm4433_vm1, %v7018_v20  ;;  %7045 = vpow2.f32 %v5384_v33  ;;  %v5409_v33 = vmul.f32 -1.442695, %v1893_v31  ;;  %v5420_v20 = vmul.f32 -1.442695, %v1897_v63 }
 0x3af   : > { %v7022_v7 = vpop.eup %7021  ;;  %4611 = vst [vmem:[%s8164_s30 + $0x5e0] sm:$0xff] %v7020_v12  ;;  %7047 = vpow2.f32 %v5383_v1 }
 0x3b0   : > { %v7024_v21 = vpop.eup %7023  ;;  %4613 = vst [vmem:[%s8164_s30 + $0x5f0] sm:$0xff] %v7022_v7  ;;  %7049 = vpow2.f32 %v5385_v16  ;;  %v1905_v16 = vpop.f32.mrf.mxu1 }
 0x3b1   : > { %v7026_v39 = vpop.eup %7025  ;;  %4612 = vst [vmem:[%s8164_s30 + $0x5e8] sm:$0xff] %v7024_v21  ;;  %7051 = vpow2.f32 %v5394_v47  ;;  %v1640_v7 = vpop.f32.mrf.mxu0  ;;  %v5430_v21 = vmul.f32 -1.442695, %v1634_v14 }
 0x3b2   : > { %v7028_v40 = vpop.eup %7027  ;;  %4614 = vst.msk [vmem:[%s8164_s30 + $0x5f8] sm:$0xff] %vm4433_vm1, %v7026_v39  ;;  %7053 = vpow2.f32 %v5396_v27  ;;  %v5421_v27 = vmul.f32 -1.442695, %v1899_v29  ;;  %v5432_v39 = vmul.f32 -1.442695, %v1903_v41 }
 0x3b3   : > { %v7030_v60 = vpop.eup %7029  ;;  %v3398_v3 = vadd.f32 1.0, %v7028_v40  ;;  %7055 = vpow2.f32 %v5395_v13  ;;  %v5431_v40 = vmul.f32 -1.442695, %v1636_v19  ;;  %v5442_v52 = vmul.f32 -1.442695, %v1640_v7 }
 0x3b4   : > { %v7032_v54 = vpop.eup %7031  ;;  %v3400_v42 = vadd.f32 1.0, %v7030_v60  ;;  %7057 = vpow2.f32 %v5397_v28  ;;  %v1909_v28 = vpop.f32.mrf.mxu1 }
 0x3b5   : > { %v7034_v9 = vpop.eup %7033  ;;  %7059 = vrcp.f32 %v3398_v3  ;;  %v3399_v34 = vadd.f32 1.0, %v7032_v54  ;;  %v5433_v3 = vmul.f32 -1.442695, %v1905_v16  ;;  %v1642_v54 = vpop.f32.mrf.mxu0  ;;  %v5444_v31 = vmul.f32 -1.442695, %v1909_v28 }
 0x3b6   : > { %v7036_v2 = vpop.eup %7035  ;;  %7061 = vrcp.f32 %v3400_v42  ;;  %v3401_v58 = vadd.f32 1.0, %v7034_v9  ;;  %v1911_v9 = vpop.f32.mrf.mxu1 }
 0x3b7   : > { %v7038_v15 = vpop.eup %7037  ;;  %7063 = vrcp.f32 %v3399_v34  ;;  %v3410_v4 = vadd.f32 1.0, %v7036_v2 }
 0x3b8   : > { %v7040_v45 = vpop.eup %7039  ;;  %7065 = vrcp.f32 %v3401_v58  ;;  %v3412_v61 = vadd.f32 1.0, %v7038_v15  ;;  %v5443_v58 = vmul.f32 -1.442695, %v1642_v54  ;;  %v1915_v24 = vpop.f32.mrf.mxu1 }
 0x3b9   : > { %v7042_v35 = vpop.eup %7041  ;;  %7067 = vrcp.f32 %v3410_v4  ;;  %v3411_v55 = vadd.f32 1.0, %v7040_v45  ;;  %v5445_v4 = vmul.f32 -1.442695, %v1911_v9  ;;  %v1646_v45 = vpop.f32.mrf.mxu0 }
 0x3ba   : > { %v7044_v25 = vpop.eup %7043  ;;  %7069 = vrcp.f32 %v3412_v61  ;;  %v3413_v18 = vadd.f32 1.0, %v7042_v35 }
 0x3bb   : > { %v7046_v49 = vpop.eup %7045  ;;  %7071 = vrcp.f32 %v3411_v55  ;;  %v3422_v57 = vadd.f32 1.0, %v7044_v25 }
 0x3bc   : > { %v7048_v8 = vpop.eup %7047  ;;  %7073 = vrcp.f32 %v3413_v18  ;;  %v3424_v37 = vadd.f32 1.0, %v7046_v49  ;;  %v1648_v49 = vpop.f32.mrf.mxu0 }
 0x3bd   : > { %v7050_v59 = vpop.eup %7049  ;;  %7075 = vrcp.f32 %v3422_v57  ;;  %v3423_v36 = vadd.f32 1.0, %v7048_v8  ;;  %v5455_v28 = vmul.f32 -1.442695, %v1648_v49 }
 0x3be   : > { %v7052_v22 = vpop.eup %7051  ;;  %7077 = vrcp.f32 %v3424_v37  ;;  %v3425_v6 = vadd.f32 1.0, %v7050_v59  ;;  %v1917_v37 = vpop.f32.mrf.mxu1 }
 0x3bf   : > { %v7054_v10 = vpop.eup %7053  ;;  %7079 = vrcp.f32 %v3423_v36  ;;  %v3434_v23 = vadd.f32 1.0, %v7052_v22 }
 0x3c0   : > { %v7056_v56 = vpop.eup %7055  ;;  %7081 = vrcp.f32 %v3425_v6  ;;  %v3436_v0 = vadd.f32 1.0, %v7054_v10  ;;  %v1652_v10 = vpop.f32.mrf.mxu0 }
 0x3c1   : > { %v7058_v30 = vpop.eup %7057  ;;  %7083 = vrcp.f32 %v3434_v23  ;;  %v3435_v43 = vadd.f32 1.0, %v7056_v56 }
 0x3c2   : > { %v7060_v62 = vpop.eup %7059  ;;  %7085 = vrcp.f32 %v3436_v0  ;;  %v3437_v50 = vadd.f32 1.0, %v7058_v30  ;;  %v1921_v0 = vpop.f32.mrf.mxu1 }
 0x3c3   : > { %v7062_v53 = vpop.eup %7061  ;;  %4623 = vst [vmem:[%s8164_s30 + $0x640] sm:$0xff] %v7060_v62  ;;  %7087 = vrcp.f32 %v3435_v43 }
 0x3c4   : > { %v7064_v11 = vpop.eup %7063  ;;  %4625 = vst [vmem:[%s8164_s30 + $0x650] sm:$0xff] %v7062_v53  ;;  %7089 = vrcp.f32 %v3437_v50  ;;  %v1654_v50 = vpop.f32.mrf.mxu0 }
 0x3c5   : > { %v7066_v1 = vpop.eup %7065  ;;  %4624 = vst [vmem:[%s8164_s30 + $0x648] sm:$0xff] %v7064_v11  ;;  %7091 = vpow2.f32 %v5406_v5  ;;  %v5467_v9 = vmul.f32 -1.442695, %v1654_v50 }
 0x3c6   : > { %v7068_v51 = vpop.eup %7067  ;;  %4626 = vst.msk [vmem:[%s8164_s30 + $0x658] sm:$0xff] %vm4433_vm1, %v7066_v1  ;;  %7093 = vpow2.f32 %v5408_v48 }
 0x3c7   : > { %v7070_v47 = vpop.eup %7069  ;;  %4635 = vst [vmem:[%s8164_s30 + $0x6a0] sm:$0xff] %v7068_v51  ;;  %7095 = vpow2.f32 %v5407_v17  ;;  %v1923_v17 = vpop.f32.mrf.mxu1 }
 0x3c8   : > { %v7072_v12 = vpop.eup %7071  ;;  %4637 = vst [vmem:[%s8164_s30 + $0x6b0] sm:$0xff] %v7070_v47  ;;  %7097 = vpow2.f32 %v5409_v33  ;;  %v1658_v51 = vpop.f32.mrf.mxu0 }
 0x3c9   : > { %v7074_v13 = vpop.eup %7073  ;;  %4636 = vst [vmem:[%s8164_s30 + $0x6a8] sm:$0xff] %v7072_v12  ;;  %7099 = vpow2.f32 %v5418_v26  ;;  %v1927_v12 = vpop.f32.mrf.mxu1 }
 0x3ca   : > { %v7076_v46 = vpop.eup %7075  ;;  %4638 = vst.msk [vmem:[%s8164_s30 + $0x6b8] sm:$0xff] %vm4433_vm1, %v7074_v13  ;;  %7101 = vpow2.f32 %v5420_v20  ;;  %v5456_v13 = vmul.f32 -1.442695, %v1915_v24 }
 0x3cb   : > { %v7078_v38 = vpop.eup %7077  ;;  %4647 = vst [vmem:[%s8164_s30 + $0x700] sm:$0xff] %v7076_v46  ;;  %7103 = vpow2.f32 %v5419_v44  ;;  %v5454_v44 = vmul.f32 -1.442695, %v1646_v45 }
 0x3cc   : > { %v7080_v60 = vpop.eup %7079  ;;  %4649 = vst [vmem:[%s8164_s30 + $0x710] sm:$0xff] %v7078_v38  ;;  %7105 = vpow2.f32 %v5421_v27  ;;  %v1660_v38 = vpop.f32.mrf.mxu0 }
 0x3cd   : > { %v7082_v42 = vpop.eup %7081  ;;  %4648 = vst [vmem:[%s8164_s30 + $0x708] sm:$0xff] %v7080_v60  ;;  %7107 = vpow2.f32 %v5430_v21  ;;  %v5466_v60 = vmul.f32 -1.442695, %v1652_v10 }
 0x3ce   : > { %v7084_v34 = vpop.eup %7083  ;;  %4650 = vst.msk [vmem:[%s8164_s30 + $0x718] sm:$0xff] %vm4433_vm1, %v7082_v42  ;;  %7109 = vpow2.f32 %v5432_v39  ;;  %v5457_v39 = vmul.f32 -1.442695, %v1917_v37  ;;  %v5468_v42 = vmul.f32 -1.442695, %v1921_v0 }
 0x3cf   : > { %v7086_v2 = vpop.eup %7085  ;;  %4659 = vst [vmem:[%s8164_s30 + $0x760] sm:$0xff] %v7084_v34  ;;  %7111 = vpow2.f32 %v5431_v40 }
 0x3d0   : > { %v7088_v15 = vpop.eup %7087  ;;  %4661 = vst [vmem:[%s8164_s30 + $0x770] sm:$0xff] %v7086_v2  ;;  %7113 = vpow2.f32 %v5433_v3  ;;  %v1929_v3 = vpop.f32.mrf.mxu1 }
 0x3d1   : > { %v7090_v61 = vpop.eup %7089  ;;  %4660 = vst [vmem:[%s8164_s30 + $0x768] sm:$0xff] %v7088_v15  ;;  %7115 = vpow2.f32 %v5442_v52  ;;  %v1664_v2 = vpop.f32.mrf.mxu0  ;;  %v5478_v15 = vmul.f32 -1.442695, %v1658_v51 }
 0x3d2   : > { %v7092_v35 = vpop.eup %7091  ;;  %4662 = vst.msk [vmem:[%s8164_s30 + $0x778] sm:$0xff] %vm4433_vm1, %v7090_v61  ;;  %7117 = vpow2.f32 %v5444_v31  ;;  %v5469_v31 = vmul.f32 -1.442695, %v1923_v17  ;;  %v5480_v61 = vmul.f32 -1.442695, %v1927_v12 }
 0x3d3   : > { %v7094_v55 = vpop.eup %7093  ;;  %v3446_v63 = vadd.f32 1.0, %v7092_v35  ;;  %7119 = vpow2.f32 %v5443_v58  ;;  %v5479_v35 = vmul.f32 -1.442695, %v1660_v38  ;;  %v5490_v49 = vmul.f32 -1.442695, %v1664_v2 }
 0x3d4   : > { %v7096_v25 = vpop.eup %7095  ;;  %v3448_v18 = vadd.f32 1.0, %v7094_v55  ;;  %7121 = vpow2.f32 %v5445_v4  ;;  %v1933_v4 = vpop.f32.mrf.mxu1 }
 0x3d5   : > { %v7098_v57 = vpop.eup %7097  ;;  %7123 = vrcp.f32 %v3446_v63  ;;  %v3447_v8 = vadd.f32 1.0, %v7096_v25  ;;  %v5481_v63 = vmul.f32 -1.442695, %v1929_v3  ;;  %v1666_v25 = vpop.f32.mrf.mxu0  ;;  %v5492_v37 = vmul.f32 -1.442695, %v1933_v4 }
 0x3d6   : > { %v7100_v32 = vpop.eup %7099  ;;  %7125 = vrcp.f32 %v3448_v18  ;;  %v3449_v59 = vadd.f32 1.0, %v7098_v57  ;;  %v1935_v57 = vpop.f32.mrf.mxu1 }
 0x3d7   : > { %v7102_v36 = vpop.eup %7101  ;;  %7127 = vrcp.f32 %v3447_v8  ;;  %v3458_v29 = vadd.f32 1.0, %v7100_v32 }
 0x3d8   : > { %v7104_v22 = vpop.eup %7103  ;;  %7129 = vrcp.f32 %v3449_v59  ;;  %v3460_v6 = vadd.f32 1.0, %v7102_v36  ;;  %v5491_v59 = vmul.f32 -1.442695, %v1666_v25  ;;  %v1939_v10 = vpop.f32.mrf.mxu1 }
 0x3d9   : > { %v7106_v23 = vpop.eup %7105  ;;  %7131 = vrcp.f32 %v3458_v29  ;;  %v3459_v56 = vadd.f32 1.0, %v7104_v22  ;;  %v5493_v29 = vmul.f32 -1.442695, %v1935_v57  ;;  %v1670_v22 = vpop.f32.mrf.mxu0 }
 0x3da   : > { %v7108_v14 = vpop.eup %7107  ;;  %7133 = vrcp.f32 %v3460_v6  ;;  %v3461_v30 = vadd.f32 1.0, %v7106_v23 }
 0x3db   : > { %v7110_v43 = vpop.eup %7109  ;;  %7135 = vrcp.f32 %v3459_v56  ;;  %v3470_v5 = vadd.f32 1.0, %v7108_v14 }
 0x3dc   : > { %v7112_v41 = vpop.eup %7111  ;;  %7137 = vrcp.f32 %v3461_v30  ;;  %v3472_v62 = vadd.f32 1.0, %v7110_v43  ;;  %v1672_v43 = vpop.f32.mrf.mxu0 }
 0x3dd   : > { %v7114_v48 = vpop.eup %7113  ;;  %7139 = vrcp.f32 %v3470_v5  ;;  %v3471_v53 = vadd.f32 1.0, %v7112_v41  ;;  %v5503_v4 = vmul.f32 -1.442695, %v1672_v43 }
 0x3de   : > { %v7116_v11 = vpop.eup %7115  ;;  %7141 = vrcp.f32 %v3472_v62  ;;  %v3473_v33 = vadd.f32 1.0, %v7114_v48  ;;  %v1941_v62 = vpop.f32.mrf.mxu1 }
 0x3df   : > { %v7118_v19 = vpop.eup %7117  ;;  %7143 = vrcp.f32 %v3471_v53  ;;  %v3482_v1 = vadd.f32 1.0, %v7116_v11 }
 0x3e0   : > { %v7120_v26 = vpop.eup %7119  ;;  %7145 = vrcp.f32 %v3473_v33  ;;  %v3484_v16 = vadd.f32 1.0, %v7118_v19  ;;  %v1676_v19 = vpop.f32.mrf.mxu0 }
 0x3e1   : > { %v7122_v20 = vpop.eup %7121  ;;  %7147 = vrcp.f32 %v3482_v1  ;;  %v3483_v47 = vadd.f32 1.0, %v7120_v26 }
 0x3e2   : > { %v7124_v27 = vpop.eup %7123  ;;  %7149 = vrcp.f32 %v3484_v16  ;;  %v3485_v7 = vadd.f32 1.0, %v7122_v20  ;;  %v1945_v16 = vpop.f32.mrf.mxu1 }
 0x3e3   : > { %v7126_v21 = vpop.eup %7125  ;;  %4671 = vst [vmem:[%s8164_s30 + $0x7c0] sm:$0xff] %v7124_v27  ;;  %7151 = vrcp.f32 %v3483_v47 }
 0x3e4   : > { %v7128_v46 = vpop.eup %7127  ;;  %4673 = vst [vmem:[%s8164_s30 + $0x7d0] sm:$0xff] %v7126_v21  ;;  %7153 = vrcp.f32 %v3485_v7  ;;  %v1678_v7 = vpop.f32.mrf.mxu0 }
 0x3e5   : > { %v7130_v40 = vpop.eup %7129  ;;  %4672 = vst [vmem:[%s8164_s30 + $0x7c8] sm:$0xff] %v7128_v46  ;;  %7155 = vpow2.f32 %v5454_v44  ;;  %v5515_v57 = vmul.f32 -1.442695, %v1678_v7 }
 0x3e6   : > { %v7132_v54 = vpop.eup %7131  ;;  %4674 = vst.msk [vmem:[%s8164_s30 + $0x7d8] sm:$0xff] %vm4433_vm1, %v7130_v40  ;;  %7157 = vpow2.f32 %v5456_v13 }
 0x3e7   : > { %v7134_v52 = vpop.eup %7133  ;;  %4683 = vst [vmem:[%s8164_s30 + $0x820] sm:$0xff] %v7132_v54  ;;  %7159 = vpow2.f32 %v5455_v28  ;;  %v1947_v28 = vpop.f32.mrf.mxu1 }
 0x3e8   : > { %v7136_v34 = vpop.eup %7135  ;;  %4685 = vst [vmem:[%s8164_s30 + $0x830] sm:$0xff] %v7134_v52  ;;  %7161 = vpow2.f32 %v5457_v39  ;;  %v1682_v54 = vpop.f32.mrf.mxu0 }
 0x3e9   : > { %v7138_v58 = vpop.eup %7137  ;;  %4684 = vst [vmem:[%s8164_s30 + $0x828] sm:$0xff] %v7136_v34  ;;  %7163 = vpow2.f32 %v5466_v60  ;;  %v1951_v34 = vpop.f32.mrf.mxu1 }
 0x3ea   : > { %v7140_v45 = vpop.eup %7139  ;;  %4686 = vst.msk [vmem:[%s8164_s30 + $0x838] sm:$0xff] %vm4433_vm1, %v7138_v58  ;;  %7165 = vpow2.f32 %v5468_v42  ;;  %v5504_v58 = vmul.f32 -1.442695, %v1939_v10 }
 0x3eb   : > { %v7142_v24 = vpop.eup %7141  ;;  %4695 = vst [vmem:[%s8164_s30 + $0x880] sm:$0xff] %v7140_v45  ;;  %7167 = vpow2.f32 %v5467_v9  ;;  %v5502_v9 = vmul.f32 -1.442695, %v1670_v22 }
 0x3ec   : > { %v7144_v55 = vpop.eup %7143  ;;  %4697 = vst [vmem:[%s8164_s30 + $0x890] sm:$0xff] %v7142_v24  ;;  %7169 = vpow2.f32 %v5469_v31  ;;  %v1684_v24 = vpop.f32.mrf.mxu0 }
 0x3ed   : > { %v7146_v18 = vpop.eup %7145  ;;  %4696 = vst [vmem:[%s8164_s30 + $0x888] sm:$0xff] %v7144_v55  ;;  %7171 = vpow2.f32 %v5478_v15  ;;  %v5514_v55 = vmul.f32 -1.442695, %v1676_v19 }
 0x3ee   : > { %v7148_v8 = vpop.eup %7147  ;;  %4698 = vst.msk [vmem:[%s8164_s30 + $0x898] sm:$0xff] %vm4433_vm1, %v7146_v18  ;;  %7173 = vpow2.f32 %v5480_v61  ;;  %v5505_v61 = vmul.f32 -1.442695, %v1941_v62  ;;  %v5516_v18 = vmul.f32 -1.442695, %v1945_v16 }
 0x3ef   : > { %v7150_v32 = vpop.eup %7149  ;;  %4707 = vst [vmem:[%s8164_s30 + $0x8e0] sm:$0xff] %v7148_v8  ;;  %7175 = vpow2.f32 %v5479_v35 }
 0x3f0   : > { %v7152_v36 = vpop.eup %7151  ;;  %4709 = vst [vmem:[%s8164_s30 + $0x8f0] sm:$0xff] %v7150_v32  ;;  %7177 = vpow2.f32 %v5481_v63  ;;  %v1953_v63 = vpop.f32.mrf.mxu1 }
 0x3f1   : > { %v7154_v6 = vpop.eup %7153  ;;  %4708 = vst [vmem:[%s8164_s30 + $0x8e8] sm:$0xff] %v7152_v36  ;;  %7179 = vpow2.f32 %v5490_v49  ;;  %v1688_v32 = vpop.f32.mrf.mxu0  ;;  %v5526_v36 = vmul.f32 -1.442695, %v1682_v54 }
 0x3f2   : > { %v7156_v23 = vpop.eup %7155  ;;  %4710 = vst.msk [vmem:[%s8164_s30 + $0x8f8] sm:$0xff] %vm4433_vm1, %v7154_v6  ;;  %7181 = vpow2.f32 %v5492_v37  ;;  %v5517_v37 = vmul.f32 -1.442695, %v1947_v28  ;;  %v5528_v6 = vmul.f32 -1.442695, %v1951_v34 }
 0x3f3   : > { %v7158_v56 = vpop.eup %7157  ;;  %v3494_v0 = vadd.f32 1.0, %v7156_v23  ;;  %7183 = vpow2.f32 %v5491_v59  ;;  %v5527_v23 = vmul.f32 -1.442695, %v1684_v24  ;;  %v5538_v43 = vmul.f32 -1.442695, %v1688_v32 }
 0x3f4   : > { %v7160_v14 = vpop.eup %7159  ;;  %v3496_v30 = vadd.f32 1.0, %v7158_v56  ;;  %7185 = vpow2.f32 %v5493_v29  ;;  %v1957_v29 = vpop.f32.mrf.mxu1 }
 0x3f5   : > { %v7162_v5 = vpop.eup %7161  ;;  %7187 = vrcp.f32 %v3494_v0  ;;  %v3495_v41 = vadd.f32 1.0, %v7160_v14  ;;  %v5529_v0 = vmul.f32 -1.442695, %v1953_v63  ;;  %v1690_v14 = vpop.f32.mrf.mxu0  ;;  %v5540_v62 = vmul.f32 -1.442695, %v1957_v29 }
 0x3f6   : > { %v7164_v50 = vpop.eup %7163  ;;  %7189 = vrcp.f32 %v3496_v30  ;;  %v3497_v48 = vadd.f32 1.0, %v7162_v5  ;;  %v1959_v5 = vpop.f32.mrf.mxu1 }
 0x3f7   : > { %v7166_v53 = vpop.eup %7165  ;;  %7191 = vrcp.f32 %v3495_v41  ;;  %v3506_v17 = vadd.f32 1.0, %v7164_v50 }
 0x3f8   : > { %v7168_v11 = vpop.eup %7167  ;;  %7193 = vrcp.f32 %v3497_v48  ;;  %v3508_v33 = vadd.f32 1.0, %v7166_v53  ;;  %v5539_v48 = vmul.f32 -1.442695, %v1690_v14 }
 0x3f9   : > { %v7170_v1 = vpop.eup %7169  ;;  %7195 = vrcp.f32 %v3506_v17  ;;  %v3507_v26 = vadd.f32 1.0, %v7168_v11  ;;  %v5541_v17 = vmul.f32 -1.442695, %v1959_v5 }
 0x3fa   : > { %v7172_v51 = vpop.eup %7171  ;;  %7197 = vrcp.f32 %v3508_v33  ;;  %v3509_v20 = vadd.f32 1.0, %v7170_v1 }
 0x3fb   : > { %v7174_v47 = vpop.eup %7173  ;;  %7199 = vrcp.f32 %v3507_v26  ;;  %v3518_v44 = vadd.f32 1.0, %v7172_v51 }
 0x3fc   : > { %v7176_v12 = vpop.eup %7175  ;;  %7201 = vrcp.f32 %v3509_v20  ;;  %v3520_v27 = vadd.f32 1.0, %v7174_v47 }
 0x3fd   : > { %v7178_v13 = vpop.eup %7177  ;;  %7203 = vrcp.f32 %v3518_v44  ;;  %v3519_v21 = vadd.f32 1.0, %v7176_v12 }
 0x3fe   : > { %v7180_v46 = vpop.eup %7179  ;;  %7205 = vrcp.f32 %v3520_v27  ;;  %v3521_v39 = vadd.f32 1.0, %v7178_v13 }
 0x3ff   : > { %v7182_v38 = vpop.eup %7181  ;;  %7207 = vrcp.f32 %v3519_v21  ;;  %v3530_v40 = vadd.f32 1.0, %v7180_v46  ;;  %v1694_v21 = vpop.f32.mrf.mxu0 }
 0x400   : > { %v7184_v60 = vpop.eup %7183  ;;  %7209 = vrcp.f32 %v3521_v39  ;;  %v3532_v3 = vadd.f32 1.0, %v7182_v38  ;;  %v1963_v39 = vpop.f32.mrf.mxu1  ;;  %v5550_v63 = vmul.f32 -1.442695, %v1694_v21 }
 0x401   : > { %v7186_v42 = vpop.eup %7185  ;;  %7211 = vrcp.f32 %v3530_v40  ;;  %v3531_v52 = vadd.f32 1.0, %v7184_v60 }
 0x402   : > { %v7188_v31 = vpop.eup %7187  ;;  %7213 = vrcp.f32 %v3532_v3  ;;  %v3533_v2 = vadd.f32 1.0, %v7186_v42 }
 0x403   : > { %v7190_v15 = vpop.eup %7189  ;;  %4719 = vst [vmem:[%s8164_s30 + $0x940] sm:$0xff] %v7188_v31  ;;  %7215 = vrcp.f32 %v3531_v52  ;;  %v1696_v52 = vpop.f32.mrf.mxu0 }
 0x404   : > { %v7192_v45 = vpop.eup %7191  ;;  %4721 = vst [vmem:[%s8164_s30 + $0x950] sm:$0xff] %v7190_v15  ;;  %7217 = vrcp.f32 %v3533_v2  ;;  %v1965_v31 = vpop.f32.mrf.mxu1 }
 0x405   : > { %v7194_v35 = vpop.eup %7193  ;;  %4720 = vst [vmem:[%s8164_s30 + $0x948] sm:$0xff] %v7192_v45  ;;  %7219 = vpow2.f32 %v5502_v9  ;;  %v1700_v24 = vpop.f32.mrf.mxu0 }
 0x406   : > { %v7196_v25 = vpop.eup %7195  ;;  %4722 = vst.msk [vmem:[%s8164_s30 + $0x958] sm:$0xff] %vm4433_vm1, %v7194_v35  ;;  %7221 = vpow2.f32 %v5504_v58 }
 0x407   : > { %v7198_v49 = vpop.eup %7197  ;;  %4731 = vst [vmem:[%s8164_s30 + $0x9a0] sm:$0xff] %v7196_v25  ;;  %7223 = vpow2.f32 %v5503_v4  ;;  %v1969_v25 = vpop.f32.mrf.mxu1 }
 0x408   : > { %v7200_v8 = vpop.eup %7199  ;;  %4733 = vst [vmem:[%s8164_s30 + $0x9b0] sm:$0xff] %v7198_v49  ;;  %7225 = vpow2.f32 %v5505_v61 }
 0x409   : > { %v7202_v59 = vpop.eup %7201  ;;  %4732 = vst [vmem:[%s8164_s30 + $0x9a8] sm:$0xff] %v7200_v8  ;;  %7227 = vpow2.f32 %v5514_v55 }
 0x40a   : > { %v7204_v22 = vpop.eup %7203  ;;  %4734 = vst.msk [vmem:[%s8164_s30 + $0x9b8] sm:$0xff] %vm4433_vm1, %v7202_v59  ;;  %7229 = vpow2.f32 %v5516_v18  ;;  %v5553_v59 = vmul.f32 -1.442695, %v1965_v31 }
 0x40b   : > { %v7206_v10 = vpop.eup %7205  ;;  %4743 = vst [vmem:[%s8164_s30 + $0xa00] sm:$0xff] %v7204_v22  ;;  %7231 = vpow2.f32 %v5515_v57  ;;  %v5552_v57 = vmul.f32 -1.442695, %v1963_v39  ;;  %v5562_v22 = vmul.f32 -1.442695, %v1700_v24 }
 0x40c   : > { %v7208_v56 = vpop.eup %7207  ;;  %4745 = vst [vmem:[%s8164_s30 + $0xa10] sm:$0xff] %v7206_v10  ;;  %7233 = vpow2.f32 %v5517_v37  ;;  %v5551_v37 = vmul.f32 -1.442695, %v1696_v52 }
 0x40d   : > { %v7210_v30 = vpop.eup %7209  ;;  %4744 = vst [vmem:[%s8164_s30 + $0xa08] sm:$0xff] %v7208_v56  ;;  %7235 = vpow2.f32 %v5526_v36  ;;  %v1702_v36 = vpop.f32.mrf.mxu0 }
 0x40e   : > { %v7212_v41 = vpop.eup %7211  ;;  %4746 = vst.msk [vmem:[%s8164_s30 + $0xa18] sm:$0xff] %vm4433_vm1, %v7210_v30  ;;  %7237 = vpow2.f32 %v5528_v6  ;;  %v1971_v6 = vpop.f32.mrf.mxu1 }
 0x40f   : > { %v7214_v50 = vpop.eup %7213  ;;  %4755 = vst [vmem:[%s8164_s30 + $0xa60] sm:$0xff] %v7212_v41  ;;  %7239 = vpow2.f32 %v5527_v23  ;;  %v5564_v23 = vmul.f32 -1.442695, %v1969_v25  ;;  %v5565_v30 = vmul.f32 -1.442695, %v1971_v6 }
 0x410   : > { %v7216_v53 = vpop.eup %7215  ;;  %4757 = vst [vmem:[%s8164_s30 + $0xa70] sm:$0xff] %v7214_v50  ;;  %7241 = vpow2.f32 %v5529_v0  ;;  %v5563_v0 = vmul.f32 -1.442695, %v1702_v36 }
 0x411   : > { %v7218_v11 = vpop.eup %7217  ;;  %4756 = vst [vmem:[%s8164_s30 + $0xa68] sm:$0xff] %v7216_v53  ;;  %7243 = vpow2.f32 %v5538_v43 }
 0x412   : > { %v7220_v33 = vpop.eup %7219  ;;  %4758 = vst.msk [vmem:[%s8164_s30 + $0xa78] sm:$0xff] %vm4433_vm1, %v7218_v11  ;;  %7245 = vpow2.f32 %v5540_v62 }
 0x413   : > { %v7222_v19 = vpop.eup %7221  ;;  %v3542_v1 = vadd.f32 1.0, %v7220_v33  ;;  %7247 = vpow2.f32 %v5539_v48 }
 0x414   : > { %v7224_v26 = vpop.eup %7223  ;;  %v3544_v16 = vadd.f32 1.0, %v7222_v19  ;;  %7249 = vpow2.f32 %v5541_v17 }
 0x415   : > { %v7226_v51 = vpop.eup %7225  ;;  %7251 = vrcp.f32 %v3542_v1  ;;  %v3543_v20 = vadd.f32 1.0, %v7224_v26 }
 0x416   : > { %v7228_v47 = vpop.eup %7227  ;;  %7253 = vrcp.f32 %v3544_v16  ;;  %v3545_v44 = vadd.f32 1.0, %v7226_v51 }
 0x417   : > { %v7230_v12 = vpop.eup %7229  ;;  %7255 = vrcp.f32 %v3543_v20  ;;  %v3554_v27 = vadd.f32 1.0, %v7228_v47 }
 0x418   : > { %v7232_v7 = vpop.eup %7231  ;;  %7257 = vrcp.f32 %v3545_v44  ;;  %v3556_v13 = vadd.f32 1.0, %v7230_v12 }
 0x419   : > { %v7234_v28 = vpop.eup %7233  ;;  %7259 = vrcp.f32 %v3554_v27  ;;  %v3555_v46 = vadd.f32 1.0, %v7232_v7 }
 0x41a   : > { %v7236_v38 = vpop.eup %7235  ;;  %7261 = vrcp.f32 %v3556_v13  ;;  %v3557_v40 = vadd.f32 1.0, %v7234_v28 }
 0x41b   : > { %v7238_v60 = vpop.eup %7237  ;;  %7263 = vrcp.f32 %v3555_v46  ;;  %v3566_v3 = vadd.f32 1.0, %v7236_v38 }
 0x41c   : > { %v7240_v54 = vpop.eup %7239  ;;  %7265 = vrcp.f32 %v3557_v40  ;;  %v3568_v42 = vadd.f32 1.0, %v7238_v60 }
 0x41d   : > { %v7242_v9 = vpop.eup %7241  ;;  %7267 = vrcp.f32 %v3566_v3  ;;  %v3567_v34 = vadd.f32 1.0, %v7240_v54 }
 0x41e   : > { %v7244_v2 = vpop.eup %7243  ;;  %7269 = vrcp.f32 %v3568_v42  ;;  %v3569_v58 = vadd.f32 1.0, %v7242_v9 }
 0x41f   : > { %v7246_v15 = vpop.eup %7245  ;;  %7271 = vrcp.f32 %v3567_v34  ;;  %v3578_v4 = vadd.f32 1.0, %v7244_v2 }
 0x420   : > { %v7248_v45 = vpop.eup %7247  ;;  %7273 = vrcp.f32 %v3569_v58  ;;  %v3580_v61 = vadd.f32 1.0, %v7246_v15 }
 0x421   : > { %v7250_v35 = vpop.eup %7249  ;;  %7275 = vrcp.f32 %v3578_v4  ;;  %v3579_v55 = vadd.f32 1.0, %v7248_v45 }
 0x422   : > { %v7252_v18 = vpop.eup %7251  ;;  %7277 = vrcp.f32 %v3580_v61  ;;  %v3581_v49 = vadd.f32 1.0, %v7250_v35 }
 0x423   : > { %v7254_v8 = vpop.eup %7253  ;;  %4767 = vst [vmem:[%s8164_s30 + $0xac0] sm:$0xff] %v7252_v18  ;;  %7279 = vrcp.f32 %v3579_v55 }
 0x424   : > { %v7256_v32 = vpop.eup %7255  ;;  %4769 = vst [vmem:[%s8164_s30 + $0xad0] sm:$0xff] %v7254_v8  ;;  %7281 = vrcp.f32 %v3581_v49 }
 0x425   : > { %v7258_v29 = vpop.eup %7257  ;;  %4768 = vst [vmem:[%s8164_s30 + $0xac8] sm:$0xff] %v7256_v32  ;;  %7283 = vpow2.f32 %v5550_v63 }
 0x426   : > { %v7260_v10 = vpop.eup %7259  ;;  %4770 = vst.msk [vmem:[%s8164_s30 + $0xad8] sm:$0xff] %vm4433_vm1, %v7258_v29  ;;  %7285 = vpow2.f32 %v5552_v57 }
 0x427   : > { %v7262_v56 = vpop.eup %7261  ;;  %4779 = vst [vmem:[%s8164_s30 + $0xb20] sm:$0xff] %v7260_v10  ;;  %7287 = vpow2.f32 %v5551_v37 }
 0x428   : > { %v7264_v14 = vpop.eup %7263  ;;  %4781 = vst [vmem:[%s8164_s30 + $0xb30] sm:$0xff] %v7262_v56  ;;  %7289 = vpow2.f32 %v5553_v59 }
 0x429   : > { %v7266_v43 = vpop.eup %7265  ;;  %4780 = vst [vmem:[%s8164_s30 + $0xb28] sm:$0xff] %v7264_v14  ;;  %7291 = vpow2.f32 %v5562_v22 }
 0x42a   : > { %v7268_v5 = vpop.eup %7267  ;;  %4782 = vst.msk [vmem:[%s8164_s30 + $0xb38] sm:$0xff] %vm4433_vm1, %v7266_v43  ;;  %7293 = vpow2.f32 %v5564_v23 }
 0x42b   : > { %v7270_v41 = vpop.eup %7269  ;;  %4791 = vst [vmem:[%s8164_s30 + $0xb80] sm:$0xff] %v7268_v5  ;;  %7295 = vpow2.f32 %v5563_v0 }
 0x42c   : > { %v7272_v62 = vpop.eup %7271  ;;  %4793 = vst [vmem:[%s8164_s30 + $0xb90] sm:$0xff] %v7270_v41  ;;  %7297 = vpow2.f32 %v5565_v30 }
 0x42d   : > { %v7274_v50 = vpop.eup %7273  ;;  %4792 = vst [vmem:[%s8164_s30 + $0xb88] sm:$0xff] %v7272_v62 }
 0x42e   : > { %v7276_v48 = vpop.eup %7275  ;;  %4794 = vst.msk [vmem:[%s8164_s30 + $0xb98] sm:$0xff] %vm4433_vm1, %v7274_v50 }
 0x42f   : > { %v7278_v53 = vpop.eup %7277  ;;  %4803 = vst [vmem:[%s8164_s30 + $0xbe0] sm:$0xff] %v7276_v48 }
 0x430   : > { %v7280_v17 = vpop.eup %7279  ;;  %4805 = vst [vmem:[%s8164_s30 + $0xbf0] sm:$0xff] %v7278_v53 }
 0x431   : > { %v7282_v11 = vpop.eup %7281  ;;  %4804 = vst [vmem:[%s8164_s30 + $0xbe8] sm:$0xff] %v7280_v17 }
 0x432   : > { %v7284_v33 = vpop.eup %7283  ;;  %4806 = vst.msk [vmem:[%s8164_s30 + $0xbf8] sm:$0xff] %vm4433_vm1, %v7282_v11 }
 0x433   : > { %v7286_v19 = vpop.eup %7285  ;;  %v3590_v1 = vadd.f32 1.0, %v7284_v33 }
 0x434   : > { %v7288_v26 = vpop.eup %7287  ;;  %v3592_v16 = vadd.f32 1.0, %v7286_v19 }
 0x435   : > { %v7290_v51 = vpop.eup %7289  ;;  %7299 = vrcp.f32 %v3590_v1  ;;  %v3591_v20 = vadd.f32 1.0, %v7288_v26 }
 0x436   : > { %v7292_v47 = vpop.eup %7291  ;;  %7301 = vrcp.f32 %v3592_v16  ;;  %v3593_v44 = vadd.f32 1.0, %v7290_v51 }
 0x437   : > { %v7294_v12 = vpop.eup %7293  ;;  %7303 = vrcp.f32 %v3591_v20  ;;  %v3602_v27 = vadd.f32 1.0, %v7292_v47 }
 0x438   : > { %v7296_v7 = vpop.eup %7295  ;;  %7305 = vrcp.f32 %v3593_v44  ;;  %v3604_v13 = vadd.f32 1.0, %v7294_v12 }
 0x439   : > { %v7298_v21 = vpop.eup %7297  ;;  %7307 = vrcp.f32 %v3602_v27  ;;  %v3603_v28 = vadd.f32 1.0, %v7296_v7 }
 0x43a   : > { %7309 = vrcp.f32 %v3604_v13  ;;  %v3605_v46 = vadd.f32 1.0, %v7298_v21 }
 0x43b   : > { %7311 = vrcp.f32 %v3603_v28 }
 0x43c   : > { %7313 = vrcp.f32 %v3605_v46 }
 0x442   : > { %v7300_v39 = vpop.eup %7299 }
 0x443   : > { %v7302_v38 = vpop.eup %7301  ;;  %4815 = vst [vmem:[%s8164_s30 + $0xc40] sm:$0xff] %v7300_v39 }
 0x444   : > { %v7304_v40 = vpop.eup %7303  ;;  %4817 = vst [vmem:[%s8164_s30 + $0xc50] sm:$0xff] %v7302_v38 }
 0x445   : > { %v7306_v60 = vpop.eup %7305  ;;  %4816 = vst [vmem:[%s8164_s30 + $0xc48] sm:$0xff] %v7304_v40 }
 0x446   : > { %v7308_v3 = vpop.eup %7307  ;;  %4818 = vst.msk [vmem:[%s8164_s30 + $0xc58] sm:$0xff] %vm4433_vm1, %v7306_v60 }
 0x447   : > { %v7310_v54 = vpop.eup %7309  ;;  %4827 = vst [vmem:[%s8164_s30 + $0xca0] sm:$0xff] %v7308_v3 }
 0x448   : > { %v7312_v42 = vpop.eup %7311  ;;  %4829 = vst [vmem:[%s8164_s30 + $0xcb0] sm:$0xff] %v7310_v54 }
 0x449   : > { %v7314_v52 = vpop.eup %7313  ;;  %4828 = vst [vmem:[%s8164_s30 + $0xca8] sm:$0xff] %v7312_v42 }
 0x44a   : > { %4830 = vst.msk [vmem:[%s8164_s30 + $0xcb8] sm:$0xff] %vm4433_vm1, %v7314_v52 }
 0x44b   : > { %7390 = shalt.err (!%p7387_p11)
}
 0x44c   : > { %s7391_s27 = scalar_lea.hbm %s9312_s22, 52224  ;;  %s7395_s30 = scalar_lea.hbm %s9384_s2, 1671168 }
 0x44d   : > { %p7392_p13 = scmp.ne.s32.totalorder %s9312_s22, %s7391_s27  ;;  %p7396_p6 = scmp.lt.s32.totalorder %s9312_s22, %s9384_s2 }
 0x44e   : > { %p7397_p4 = scmp.lt.s32.totalorder %s7395_s30, %s7391_s27 }
 0x44f   : > { %p7393_p0 = pnand %p7392_p13, %p7603_p12 }
 0x450   : > { %p7398_p7 = por %p7397_p4, %p7396_p6 }
 0x451   : > { %p7394_p1 = pneg %p7393_p0 }
 0x453   : > { %p7399_p5 = pnand %p7398_p7, %p7394_p1 }
 0x455   : > { %7402 = shalt.err (!%p7399_p5)
}
 0x456   : > { %s7504_s7 = smov 1536   ;;  %s7505_s12 = smov 96  }
 0x457   : > { %5577 = dma.vmem_to_hbm [thread:$0]  (%p7603_p12), %s9314_s26, 52224, %s9312_s22, %s9322_s18, %s7504_s7, %s7504_s7, %s7505_s12  }
 0x458 PF: > { %p5589_p8 = scmp.ge.s32.totalorder %s7497_s19, 2  ;;  %s4863_s15 = sand.u32 1, %s7457_s9  }
 0x459   : > { %s4864_s16 = scalar_lea.sflag [#allocation4], %s4863_s15 }
 0x45a   : > { %p5584_p9 = pnand %p5589_p8, %p7616_p2 }
 0x45c   : > { %p5585_p10 = pneg %p5584_p9 }
 0x45e   : > { %7452 = dma.done.wait (%p5585_p10), %s4864_s16, 52224  }
 0x45f   : > { %7454 = vsyncadd (%p5585_p10), %s4864_s16, 4294915072  ;;  %s18_s19 = sadd.s32 1, %s7497_s19   ;;  %s9443_s16 = sld [smem:[#allocation8_spill]] }
 0x460   : > { %p15_p3 = scmp.ge.s32.totalorder %s18_s19, 34   ;;  %s9444_s3 = sld [smem:[#allocation9_spill]] }
 0x461   : > { %s9445_s18 = sld [smem:[#allocation10_spill]]  ;;  %s9446_s9 = smov %s7461_s10 }
 0x462   : > { %s9447_s10 = smov %s7465_s11  ;;  %s9448_s11 = smov %s7611_s5 }
 0x463   : > { %s9449_s12 = smov %s7473_s13  ;;  %s9450_s13 = smov %s7477_s14 }
 0x464   : > { %s9451_s14 = smov %s7608_s4  ;;  %s9452_s15 = smov %s7489_s17 }
 0x465   :  { %17 = sbr.rel (!%p15_p3) target bundleno = 9 (0x9), region = 76 }
 0x466   : > { %s9453_s17 = smov %s9444_s3 }
 0x46a   :  { %4869 = vsyncpa [#allocation3], 1 }
 0x46b   :  { %4871 = vsyncpa [#allocation3 + $0x1], 1 }
 0x46c   :  { %4872 = vsyncpa [#allocation4], 1 }
 0x46d   :  { %4874 = vsyncpa [#allocation4 + $0x1], 1 }

</bundles_post_ra>
